<compile_context>
chip_gen: v7x
topology: tpu7x:2x2x1
jax: 0.10.0
libtpu: 0.0.40
codegen_flags: <defaults>
</compile_context>

<pallas_src>
import functools

import jax
import jax.numpy as jnp
from jax import lax
from jax.experimental import pallas as pl
from jax.experimental.pallas import tpu as pltpu

LN_EPS = 1e-5                      # torch.nn.LayerNorm default
_INV_SQRT2 = 0.7071067811865476    # 1/sqrt(2) for exact (erf) GELU


# ------------------------------ fused kernel -------------------------------- #

def _cross_block_kernel(src_ref, tgt_ref,
                        wq_ref, pq_ref, wk_ref, pk_ref, wv_ref, bv_ref,
                        wp_ref, bp_ref,
                        w1_ref, b1_ref, w2_ref, b2_ref,
                        n1w_ref, n1b_ref, n2w_ref, n2b_ref,
                        src_out_ref, tgt_out_ref,
                        ctx_ref, *, num_heads):
    """One grid step = one batch element; tokens stay resident in VMEM/vregs."""
    C = src_ref.shape[2]
    hd = C // num_heads

    def layer_norm(x, w, b):                             # f32 statistics
        mu = jnp.mean(x, axis=-1, keepdims=True)
        xc = x - mu
        var = jnp.mean(xc * xc, axis=-1, keepdims=True)  # biased, like torch
        return (xc * lax.rsqrt(var + LN_EPS)) * w + b

    def attend(q_tok, kv_tok):
        # Dense, lane-aligned projections (bf16 operands, f32 accumulation).
        # Pos-enc, q/k biases and the attention scale are pre-folded into
        # pq_ref / pk_ref / wq_ref by the wrapper.
        qb = q_tok.astype(jnp.bfloat16)
        kb = kv_tok.astype(jnp.bfloat16)
        q = jnp.dot(qb, wq_ref[...], preferred_element_type=jnp.float32) + pq_ref[...]
        k = jnp.dot(kb, wk_ref[...], preferred_element_type=jnp.float32) + pk_ref[...]
        v = jnp.dot(kb, wv_ref[...], preferred_element_type=jnp.float32) + bv_ref[...]
        q16 = q.astype(jnp.bfloat16)
        k16 = k.astype(jnp.bfloat16)
        v16 = v.astype(jnp.bfloat16)

        # Head loop only covers the score / context matmuls (static, tiny count).
        for h in range(num_heads):
            lo = h * hd
            s = lax.dot_general(q16[:, lo:lo + hd], k16[:, lo:lo + hd],
                                (((1,), (1,)), ((), ())),
                                preferred_element_type=jnp.float32)      # (N, Nk)
            s = s - jnp.max(s, axis=-1, keepdims=True)                   # f32 softmax
            p = jnp.exp(s)
            p = p * (1.0 / jnp.sum(p, axis=-1, keepdims=True))           # exact recip
            ctx_ref[:, lo:lo + hd] = jnp.dot(p.astype(jnp.bfloat16),
                                             v16[:, lo:lo + hd],
                                             preferred_element_type=jnp.float32)
        # Single dense output projection over all heads (no per-head K=hd passes).
        ctx = ctx_ref[...].astype(jnp.bfloat16)
        return jnp.dot(ctx, wp_ref[...], preferred_element_type=jnp.float32) + bp_ref[...]

    def mlp(x):
        h = jnp.dot(x.astype(jnp.bfloat16), w1_ref[...],
                    preferred_element_type=jnp.float32) + b1_ref[...]
        h = 0.5 * h * (1.0 + lax.erf(h * _INV_SQRT2))    # exact GELU (torch default)
        return jnp.dot(h.astype(jnp.bfloat16), w2_ref[...],
                       preferred_element_type=jnp.float32) + b2_ref[...]

    src = src_ref[0].astype(jnp.float32)                 # (N, C); residuals in f32
    tgt = tgt_ref[0].astype(jnp.float32)

    n1w, n1b = n1w_ref[...], n1b_ref[...]
    src_n = layer_norm(src, n1w, n1b)
    tgt_n = layer_norm(tgt, n1w, n1b)

    # src = src + attn(norm1(src), norm1(tgt));  DropPath/Dropout = identity (p=0)
    src_u = src + attend(src_n, tgt_n)
    # PyTorch uses the *updated, un-normalized* src as key/value source here.
    tgt_u = tgt + attend(tgt_n, src_u)

    n2w, n2b = n2w_ref[...], n2b_ref[...]
    src_o = src_u + mlp(layer_norm(src_u, n2w, n2b))
    tgt_o = tgt_u + mlp(layer_norm(tgt_u, n2w, n2b))

    src_out_ref[0] = src_o.astype(src_out_ref.dtype)
    tgt_out_ref[0] = tgt_o.astype(tgt_out_ref.dtype)


# --------------------- positional encoding (param prep) --------------------- #

def coords_grid(H, W):
    # FlowFormer coords_grid stacks (x, y) = (col, row); row-major flatten -> (N, 2)
    ys, xs = jnp.meshgrid(jnp.arange(H, dtype=jnp.float32),
                          jnp.arange(W, dtype=jnp.float32), indexing="ij")
    return jnp.stack([xs, ys], axis=-1).reshape(-1, 2)


def linear_position_embedding_sine(coords, dim, normalize_factor=1.0 / 200.0):
    # LinearPositionEmbeddingSine (note the literal 3.14, as in FlowFormer source —
    # intentionally NOT pi, do not "fix").
    freq = jnp.arange(dim // 4, dtype=jnp.float32)
    ax = 3.14 * coords[..., 0:1] * freq * normalize_factor
    ay = 3.14 * coords[..., 1:2] * freq * normalize_factor
    return jnp.concatenate([jnp.sin(ax), jnp.cos(ax), jnp.sin(ay), jnp.cos(ay)], axis=-1)


# ------------------------------ CrossBlock ---------------------------------- #

def cross_block_forward(src, tgt, params, size, num_heads):
    Hs, Ws = size
    B, N, C = src.shape
    Hd = params['fc1_w'].shape[0]
    hd = C // num_heads
    scale = hd ** -0.5

    # sr_ratio = 1 (module default): key/value grid == query grid.
    pos = linear_position_embedding_sine(coords_grid(Hs, Ws), C)        # (N, C)

    # ---- one-off parameter prep (tiny, runs once per jit call) ----
    # Dense weights stored bf16 for the MXU; additive terms stay f32.
    wq = (params['q_w'].T * scale).astype(jnp.bfloat16)                 # scale folded into Wq
    wk = params['k_w'].T.astype(jnp.bfloat16)
    wv = params['v_w'].T.astype(jnp.bfloat16)
    wp = params['proj_w'].T.astype(jnp.bfloat16)
    w1 = params['fc1_w'].T.astype(jnp.bfloat16)
    w2 = params['fc2_w'].T.astype(jnp.bfloat16)
    pq = (pos @ params['q_w'].T + params['q_b']) * scale                # (N, C) f32
    pk = pos @ params['k_w'].T + params['k_b']                          # (N, C) f32
    bv = params['v_b'].reshape(1, C)
    bp = params['proj_b'].reshape(1, C)
    b1 = params['fc1_b'].reshape(1, Hd)
    b2 = params['fc2_b'].reshape(1, C)
    n1w = params['norm1_w'].reshape(1, C)
    n1b = params['norm1_b'].reshape(1, C)
    n2w = params['norm2_w'].reshape(1, C)
    n2b = params['norm2_b'].reshape(1, C)

    tok_spec = pl.BlockSpec((1, N, C), lambda i: (i, 0, 0))
    full = lambda shape: pl.BlockSpec(shape, lambda i, _s=shape: (0,) * len(_s))

    # ---- explicit VMEM budget (padded-lane accounting, 2x headroom) ----
    def rup(x, m):
        return (x + m - 1) // m * m
    Cp, Hdp, Nkp, Np = rup(C, 128), rup(Hd, 128), rup(N, 128), rup(N, 8)
    est = (4 * 2 * Np * Cp * 4                                           # token blocks (dbl-buf, f32)
           + 2 * (4 * rup(C, 16) * Cp + rup(C, 16) * Hdp + rup(Hd, 16) * Cp) * 2   # bf16 weights
           + 2 * (2 * Np * Cp + 7 * 8 * Cp + 8 * Hdp) * 4                # f32 pos / bias / norms
           + Np * Cp * 4                                                 # ctx scratch
           + (8 * Np * Cp + Np * Nkp + 2 * Np * Hdp) * 4)                # live f32 intermediates
    vmem_limit = int(min(max(2 * est, 32 << 20), 64 << 20))              # ≥ v5e default, ≤ v7x physical

    # advisory cost estimate for XLA's scheduler
    flops = B * (16 * N * C * C + 8 * N * N * C + 8 * N * C * Hd + 24 * N * C)
    transcendentals = B * (2 * num_heads * N * N + 2 * N * Hd + 4 * N)
    bytes_accessed = (4 * 4 * B * N * C
                      + 2 * (4 * C * C + 2 * C * Hd)
                      + 4 * (2 * N * C + 5 * C + Hd))

    kern = functools.partial(_cross_block_kernel, num_heads=num_heads)
    src_o, tgt_o = pl.pallas_call(
        kern,
        out_shape=(jax.ShapeDtypeStruct((B, N, C), src.dtype),
                   jax.ShapeDtypeStruct((B, N, C), tgt.dtype)),
        grid=(B,),
        in_specs=[
            tok_spec, tok_spec,
            full((C, C)), full((N, C)),            # wq (scaled, bf16), (pos@Wq + bq)*scale
            full((C, C)), full((N, C)),            # wk, pos@Wk + bk
            full((C, C)), full((1, C)),            # wv, bv
            full((C, C)), full((1, C)),            # wp, bp
            full((C, Hd)), full((1, Hd)),          # fc1
            full((Hd, C)), full((1, C)),           # fc2
            full((1, C)), full((1, C)), full((1, C)), full((1, C)),   # norm1 / norm2
        ],
        out_specs=(tok_spec, tok_spec),
        scratch_shapes=[pltpu.VMEM((N, C), jnp.float32)],   # per-head context slab
        compiler_params=pltpu.CompilerParams(
            dimension_semantics=("parallel",),     # one batch elem per TC on v7x megacore
            vmem_limit_bytes=vmem_limit),
        cost_estimate=pl.CostEstimate(flops=flops, transcendentals=transcendentals,
                                      bytes_accessed=bytes_accessed),
    )(src, tgt, wq, pq, wk, pk, wv, bv, wp, bp, w1, b1, w2, b2, n1w, n1b, n2w, n2b)
    return src_o, tgt_o


# --------------------------- pure-JAX reference ------------------------------ #

def _reference_forward(src, tgt, params, size, num_heads):
    Hs, Ws = size
    B, N, C = src.shape
    hd = C // num_heads
    scale = hd ** -0.5
    pos = linear_position_embedding_sine(coords_grid(Hs, Ws), C)[None]

    def ln(x, w, b):
        mu = x.mean(-1, keepdims=True)
        var = ((x - mu) ** 2).mean(-1, keepdims=True)
        return (x - mu) / jnp.sqrt(var + LN_EPS) * w + b

    def attn(x, t):
        q = (x + pos) @ params['q_w'].T + params['q_b']
        k = (t + pos) @ params['k_w'].T + params['k_b']
        v = t @ params['v_w'].T + params['v_b']
        q = q.reshape(B, N, num_heads, hd).transpose(0, 2, 1, 3)
        k = k.reshape(B, N, num_heads, hd).transpose(0, 2, 1, 3)
        v = v.reshape(B, N, num_heads, hd).transpose(0, 2, 1, 3)
        a = jax.nn.softmax((q @ k.transpose(0, 1, 3, 2)) * scale, axis=-1)
        o = (a @ v).transpose(0, 2, 1, 3).reshape(B, N, C)
        return o @ params['proj_w'].T + params['proj_b']

    def mlp(x):
        h = x @ params['fc1_w'].T + params['fc1_b']
        h = 0.5 * h * (1.0 + lax.erf(h * _INV_SQRT2))
        return h @ params['fc2_w'].T + params['fc2_b']

    def ref_block(s, t):
        s_n = ln(s, params['norm1_w'], params['norm1_b'])
        t_n = ln(t, params['norm1_w'], params['norm1_b'])
        s_u = s + attn(s_n, t_n)
        t_u = t + attn(t_n, s_u)
        s_o = s_u + mlp(ln(s_u, params['norm2_w'], params['norm2_b']))
        t_o = t_u + mlp(ln(t_u, params['norm2_w'], params['norm2_b']))
        return s_o, t_o

    return ref_block(src, tgt)


# ----------------------------------- main ------------------------------------ #

def init_params(key, dim, mlp_hidden):
    # Deterministic synthetic init; PyTorch nn.Linear weight layout (out, in).
    def lin(k, out_f, in_f):
        kw, kb = jax.random.split(k)
        w = jax.random.normal(kw, (out_f, in_f), jnp.float32) * 0.02
        b = jax.random.normal(kb, (out_f,), jnp.float32) * 0.02
        return w, b

    ks = jax.random.split(key, 6)
    p = {}
    p['q_w'], p['q_b'] = lin(ks[0], dim, dim)
    p['k_w'], p['k_b'] = lin(ks[1], dim, dim)
    p['v_w'], p['v_b'] = lin(ks[2], dim, dim)
    p['proj_w'], p['proj_b'] = lin(ks[3], dim, dim)
    p['fc1_w'], p['fc1_b'] = lin(ks[4], mlp_hidden, dim)
    p['fc2_w'], p['fc2_b'] = lin(ks[5], dim, mlp_hidden)
    p['norm1_w'] = jnp.ones((dim,), jnp.float32)
    p['norm1_b'] = jnp.zeros((dim,), jnp.float32)
    p['norm2_w'] = jnp.ones((dim,), jnp.float32)
    p['norm2_b'] = jnp.zeros((dim,), jnp.float32)
    return p


if __name__ == "__main__":
    B, Hs, Ws = 2, 8, 8
    dim, num_heads, mlp_ratio = 32, 2, 4.0      # dim % 4 == 0 (pos enc), dim % heads == 0
    N = Hs * Ws
    mlp_hidden = int(dim * mlp_ratio)

    key = jax.random.PRNGKey(0)
    k_src, k_tgt, k_par = jax.random.split(key, 3)
    src = jax.random.normal(k_src, (B, N, dim), jnp.float32)
    tgt = jax.random.normal(k_tgt, (B, N, dim), jnp.float32)
    params = init_params(k_par, dim, mlp_hidden)

    fwd = jax.jit(functools.partial(cross_block_forward,
                                    size=(Hs, Ws), num_heads=num_heads))
    src_o, tgt_o = fwd(src, tgt, params)
    jax.block_until_ready((src_o, tgt_o))

    assert src_o.shape == (B, N, dim) and tgt_o.shape == (B, N, dim)
    assert bool(jnp.all(jnp.isfinite(src_o))) and bool(jnp.all(jnp.isfinite(tgt_o)))

    # correctness vs. pure-JAX f32 reference (bf16 MXU inputs => loose-ish tolerance)
    src_r, tgt_r = _reference_forward(src, tgt, params, (Hs, Ws), num_heads)
    assert bool(jnp.allclose(src_o, src_r, rtol=1e-2, atol=2e-3)), "src mismatch"
    assert bool(jnp.allclose(tgt_o, tgt_r, rtol=1e-2, atol=2e-3)), "tgt mismatch"

    print("KERNEL_OK")
</pallas_src>

<mosaic_0001>
module attributes {stable_mosaic.version = 11 : i64} {
  func.func @_cross_block_kernel(%arg0: i32, %arg1: memref<1x64x32xf32, #tpu.memory_space<vmem>>, %arg2: memref<1x64x32xf32, #tpu.memory_space<vmem>>, %arg3: memref<32x32xbf16, #tpu.memory_space<vmem>>, %arg4: memref<64x32xf32, #tpu.memory_space<vmem>>, %arg5: memref<32x32xbf16, #tpu.memory_space<vmem>>, %arg6: memref<64x32xf32, #tpu.memory_space<vmem>>, %arg7: memref<32x32xbf16, #tpu.memory_space<vmem>>, %arg8: memref<1x32xf32, #tpu.memory_space<vmem>>, %arg9: memref<32x32xbf16, #tpu.memory_space<vmem>>, %arg10: memref<1x32xf32, #tpu.memory_space<vmem>>, %arg11: memref<32x128xbf16, #tpu.memory_space<vmem>>, %arg12: memref<1x128xf32, #tpu.memory_space<vmem>>, %arg13: memref<128x32xbf16, #tpu.memory_space<vmem>>, %arg14: memref<1x32xf32, #tpu.memory_space<vmem>>, %arg15: memref<1x32xf32, #tpu.memory_space<vmem>>, %arg16: memref<1x32xf32, #tpu.memory_space<vmem>>, %arg17: memref<1x32xf32, #tpu.memory_space<vmem>>, %arg18: memref<1x32xf32, #tpu.memory_space<vmem>>, %arg19: memref<1x64x32xf32, #tpu.memory_space<vmem>>, %arg20: memref<1x64x32xf32, #tpu.memory_space<vmem>>, %arg21: memref<64x32xf32, #tpu.memory_space<vmem>>) attributes {dimension_semantics = [#tpu.dimension_semantics<parallel>], iteration_bounds = array<i64: 2>, scalar_prefetch = 0 : i64, scratch_operands = 1 : i64, tpu.core_type = #tpu.core_type<tc>, window_params = [{transform_indices = @transform_0, window_bounds = array<i64: 1, 64, 32>}, {transform_indices = @transform_1, window_bounds = array<i64: 1, 64, 32>}, {pipeline_mode = #tpu.pipeline_mode<synchronous>, transform_indices = @transform_2, window_bounds = array<i64: 32, 32>}, {pipeline_mode = #tpu.pipeline_mode<synchronous>, transform_indices = @transform_3, window_bounds = array<i64: 64, 32>}, {pipeline_mode = #tpu.pipeline_mode<synchronous>, transform_indices = @transform_4, window_bounds = array<i64: 32, 32>}, {pipeline_mode = #tpu.pipeline_mode<synchronous>, transform_indices = @transform_5, window_bounds = array<i64: 64, 32>}, {pipeline_mode = #tpu.pipeline_mode<synchronous>, transform_indices = @transform_6, window_bounds = array<i64: 32, 32>}, {pipeline_mode = #tpu.pipeline_mode<synchronous>, transform_indices = @transform_7, window_bounds = array<i64: 1, 32>}, {pipeline_mode = #tpu.pipeline_mode<synchronous>, transform_indices = @transform_8, window_bounds = array<i64: 32, 32>}, {pipeline_mode = #tpu.pipeline_mode<synchronous>, transform_indices = @transform_9, window_bounds = array<i64: 1, 32>}, {pipeline_mode = #tpu.pipeline_mode<synchronous>, transform_indices = @transform_10, window_bounds = array<i64: 32, 128>}, {pipeline_mode = #tpu.pipeline_mode<synchronous>, transform_indices = @transform_11, window_bounds = array<i64: 1, 128>}, {pipeline_mode = #tpu.pipeline_mode<synchronous>, transform_indices = @transform_12, window_bounds = array<i64: 128, 32>}, {pipeline_mode = #tpu.pipeline_mode<synchronous>, transform_indices = @transform_13, window_bounds = array<i64: 1, 32>}, {pipeline_mode = #tpu.pipeline_mode<synchronous>, transform_indices = @transform_14, window_bounds = array<i64: 1, 32>}, {pipeline_mode = #tpu.pipeline_mode<synchronous>, transform_indices = @transform_15, window_bounds = array<i64: 1, 32>}, {pipeline_mode = #tpu.pipeline_mode<synchronous>, transform_indices = @transform_16, window_bounds = array<i64: 1, 32>}, {pipeline_mode = #tpu.pipeline_mode<synchronous>, transform_indices = @transform_17, window_bounds = array<i64: 1, 32>}, {transform_indices = @transform_18, window_bounds = array<i64: 1, 64, 32>}, {transform_indices = @transform_19, window_bounds = array<i64: 1, 64, 32>}]} {
    %c0 = arith.constant 0 : index
    %c0_0 = arith.constant 0 : index
    %c0_1 = arith.constant 0 : index
    %0 = vector.load %arg1[%c0, %c0_0, %c0_1] : memref<1x64x32xf32, #tpu.memory_space<vmem>>, vector<1x64x32xf32>
    %1 = vector.shape_cast %0 : vector<1x64x32xf32> to vector<64x32xf32>
    %c0_2 = arith.constant 0 : index
    %c0_3 = arith.constant 0 : index
    %c0_4 = arith.constant 0 : index
    %2 = vector.load %arg2[%c0_2, %c0_3, %c0_4] : memref<1x64x32xf32, #tpu.memory_space<vmem>>, vector<1x64x32xf32>
    %3 = vector.shape_cast %2 : vector<1x64x32xf32> to vector<64x32xf32>
    %c0_5 = arith.constant 0 : index
    %c0_6 = arith.constant 0 : index
    %4 = vector.load %arg15[%c0_5, %c0_6] : memref<1x32xf32, #tpu.memory_space<vmem>>, vector<1x32xf32>
    %c0_7 = arith.constant 0 : index
    %c0_8 = arith.constant 0 : index
    %5 = vector.load %arg16[%c0_7, %c0_8] : memref<1x32xf32, #tpu.memory_space<vmem>>, vector<1x32xf32>
    %cst = arith.constant dense<0.000000e+00> : vector<64xf32>
    %6 = vector.multi_reduction <add>, %1, %cst [1] : vector<64x32xf32> to vector<64xf32>
    %7 = vector.shape_cast %6 : vector<64xf32> to vector<64x1xf32>
    %cst_9 = arith.constant 3.200000e+01 : f32
    %8 = vector.broadcast %cst_9 : f32 to vector<64x1xf32>
    %9 = arith.divf %7, %8 : vector<64x1xf32>
    %10 = vector.broadcast %9 : vector<64x1xf32> to vector<64x32xf32>
    %11 = arith.subf %1, %10 : vector<64x32xf32>
    %12 = arith.mulf %11, %11 : vector<64x32xf32>
    %cst_10 = arith.constant dense<0.000000e+00> : vector<64xf32>
    %13 = vector.multi_reduction <add>, %12, %cst_10 [1] : vector<64x32xf32> to vector<64xf32>
    %14 = vector.shape_cast %13 : vector<64xf32> to vector<64x1xf32>
    %cst_11 = arith.constant 3.200000e+01 : f32
    %15 = vector.broadcast %cst_11 : f32 to vector<64x1xf32>
    %16 = arith.divf %14, %15 : vector<64x1xf32>
    %cst_12 = arith.constant 9.99999974E-6 : f32
    %17 = vector.broadcast %cst_12 : f32 to vector<64x1xf32>
    %18 = arith.addf %16, %17 : vector<64x1xf32>
    %19 = math.rsqrt %18 : vector<64x1xf32>
    %20 = vector.broadcast %19 : vector<64x1xf32> to vector<64x32xf32>
    %21 = arith.mulf %11, %20 : vector<64x32xf32>
    %22 = vector.broadcast %4 : vector<1x32xf32> to vector<64x32xf32>
    %23 = arith.mulf %21, %22 : vector<64x32xf32>
    %24 = vector.broadcast %5 : vector<1x32xf32> to vector<64x32xf32>
    %25 = arith.addf %23, %24 : vector<64x32xf32>
    %cst_13 = arith.constant dense<0.000000e+00> : vector<64xf32>
    %26 = vector.multi_reduction <add>, %3, %cst_13 [1] : vector<64x32xf32> to vector<64xf32>
    %27 = vector.shape_cast %26 : vector<64xf32> to vector<64x1xf32>
    %cst_14 = arith.constant 3.200000e+01 : f32
    %28 = vector.broadcast %cst_14 : f32 to vector<64x1xf32>
    %29 = arith.divf %27, %28 : vector<64x1xf32>
    %30 = vector.broadcast %29 : vector<64x1xf32> to vector<64x32xf32>
    %31 = arith.subf %3, %30 : vector<64x32xf32>
    %32 = arith.mulf %31, %31 : vector<64x32xf32>
    %cst_15 = arith.constant dense<0.000000e+00> : vector<64xf32>
    %33 = vector.multi_reduction <add>, %32, %cst_15 [1] : vector<64x32xf32> to vector<64xf32>
    %34 = vector.shape_cast %33 : vector<64xf32> to vector<64x1xf32>
    %cst_16 = arith.constant 3.200000e+01 : f32
    %35 = vector.broadcast %cst_16 : f32 to vector<64x1xf32>
    %36 = arith.divf %34, %35 : vector<64x1xf32>
    %cst_17 = arith.constant 9.99999974E-6 : f32
    %37 = vector.broadcast %cst_17 : f32 to vector<64x1xf32>
    %38 = arith.addf %36, %37 : vector<64x1xf32>
    %39 = math.rsqrt %38 : vector<64x1xf32>
    %40 = vector.broadcast %39 : vector<64x1xf32> to vector<64x32xf32>
    %41 = arith.mulf %31, %40 : vector<64x32xf32>
    %42 = vector.broadcast %4 : vector<1x32xf32> to vector<64x32xf32>
    %43 = arith.mulf %41, %42 : vector<64x32xf32>
    %44 = vector.broadcast %5 : vector<1x32xf32> to vector<64x32xf32>
    %45 = arith.addf %43, %44 : vector<64x32xf32>
    %46 = arith.truncf %25 : vector<64x32xf32> to vector<64x32xbf16>
    %47 = arith.truncf %45 : vector<64x32xf32> to vector<64x32xbf16>
    %c0_18 = arith.constant 0 : index
    %c0_19 = arith.constant 0 : index
    %48 = vector.load %arg3[%c0_18, %c0_19] : memref<32x32xbf16, #tpu.memory_space<vmem>>, vector<32x32xbf16>
    %cst_20 = arith.constant dense<0.000000e+00> : vector<64x32xf32>
    %49 = tpu.matmul %46, %48, %cst_20 {dimension_numbers = #tpu.dot_dimension_numbers<[1], [0], [0], [1], [0, 0, 1, 1], [], []>} : vector<64x32xbf16>, vector<32x32xbf16>, vector<64x32xf32> -> vector<64x32xf32>
    %c0_21 = arith.constant 0 : index
    %c0_22 = arith.constant 0 : index
    %50 = vector.load %arg4[%c0_21, %c0_22] : memref<64x32xf32, #tpu.memory_space<vmem>>, vector<64x32xf32>
    %51 = arith.addf %49, %50 : vector<64x32xf32>
    %c0_23 = arith.constant 0 : index
    %c0_24 = arith.constant 0 : index
    %52 = vector.load %arg5[%c0_23, %c0_24] : memref<32x32xbf16, #tpu.memory_space<vmem>>, vector<32x32xbf16>
    %cst_25 = arith.constant dense<0.000000e+00> : vector<64x32xf32>
    %53 = tpu.matmul %47, %52, %cst_25 {dimension_numbers = #tpu.dot_dimension_numbers<[1], [0], [0], [1], [0, 0, 1, 1], [], []>} : vector<64x32xbf16>, vector<32x32xbf16>, vector<64x32xf32> -> vector<64x32xf32>
    %c0_26 = arith.constant 0 : index
    %c0_27 = arith.constant 0 : index
    %54 = vector.load %arg6[%c0_26, %c0_27] : memref<64x32xf32, #tpu.memory_space<vmem>>, vector<64x32xf32>
    %55 = arith.addf %53, %54 : vector<64x32xf32>
    %c0_28 = arith.constant 0 : index
    %c0_29 = arith.constant 0 : index
    %56 = vector.load %arg7[%c0_28, %c0_29] : memref<32x32xbf16, #tpu.memory_space<vmem>>, vector<32x32xbf16>
    %cst_30 = arith.constant dense<0.000000e+00> : vector<64x32xf32>
    %57 = tpu.matmul %47, %56, %cst_30 {dimension_numbers = #tpu.dot_dimension_numbers<[1], [0], [0], [1], [0, 0, 1, 1], [], []>} : vector<64x32xbf16>, vector<32x32xbf16>, vector<64x32xf32> -> vector<64x32xf32>
    %c0_31 = arith.constant 0 : index
    %c0_32 = arith.constant 0 : index
    %58 = vector.load %arg8[%c0_31, %c0_32] : memref<1x32xf32, #tpu.memory_space<vmem>>, vector<1x32xf32>
    %59 = vector.broadcast %58 : vector<1x32xf32> to vector<64x32xf32>
    %60 = arith.addf %57, %59 : vector<64x32xf32>
    %61 = arith.truncf %51 : vector<64x32xf32> to vector<64x32xbf16>
    %62 = arith.truncf %55 : vector<64x32xf32> to vector<64x32xbf16>
    %63 = arith.truncf %60 : vector<64x32xf32> to vector<64x32xbf16>
    %64 = vector.extract_strided_slice %61 {offsets = [0, 0], sizes = [64, 16], strides = [1, 1]} : vector<64x32xbf16> to vector<64x16xbf16>
    %65 = vector.extract_strided_slice %62 {offsets = [0, 0], sizes = [64, 16], strides = [1, 1]} : vector<64x32xbf16> to vector<64x16xbf16>
    %cst_33 = arith.constant dense<0.000000e+00> : vector<64x64xf32>
    %66 = tpu.matmul %64, %65, %cst_33 {dimension_numbers = #tpu.dot_dimension_numbers<[1], [1], [0], [0], [0, 0, 1, 0], [], []>} : vector<64x16xbf16>, vector<64x16xbf16>, vector<64x64xf32> -> vector<64x64xf32>
    %cst_34 = arith.constant dense<0xFF800000> : vector<64xf32>
    %67 = vector.multi_reduction <maximumf>, %66, %cst_34 [1] : vector<64x64xf32> to vector<64xf32>
    %68 = vector.shape_cast %67 : vector<64xf32> to vector<64x1xf32>
    %69 = vector.broadcast %68 : vector<64x1xf32> to vector<64x64xf32>
    %70 = arith.subf %66, %69 : vector<64x64xf32>
    %71 = math.exp %70 : vector<64x64xf32>
    %cst_35 = arith.constant dense<0.000000e+00> : vector<64xf32>
    %72 = vector.multi_reduction <add>, %71, %cst_35 [1] : vector<64x64xf32> to vector<64xf32>
    %73 = vector.shape_cast %72 : vector<64xf32> to vector<64x1xf32>
    %cst_36 = arith.constant 1.000000e+00 : f32
    %74 = vector.broadcast %cst_36 : f32 to vector<64x1xf32>
    %75 = arith.divf %74, %73 : vector<64x1xf32>
    %76 = vector.broadcast %75 : vector<64x1xf32> to vector<64x64xf32>
    %77 = arith.mulf %71, %76 : vector<64x64xf32>
    %78 = arith.truncf %77 : vector<64x64xf32> to vector<64x64xbf16>
    %79 = vector.extract_strided_slice %63 {offsets = [0, 0], sizes = [64, 16], strides = [1, 1]} : vector<64x32xbf16> to vector<64x16xbf16>
    %cst_37 = arith.constant dense<0.000000e+00> : vector<64x16xf32>
    %80 = tpu.matmul %78, %79, %cst_37 {dimension_numbers = #tpu.dot_dimension_numbers<[1], [0], [0], [1], [0, 0, 1, 1], [], []>} : vector<64x64xbf16>, vector<64x16xbf16>, vector<64x16xf32> -> vector<64x16xf32>
    %c0_38 = arith.constant 0 : index
    %c0_39 = arith.constant 0 : index
    %81 = vector.load %arg21[%c0_38, %c0_39] : memref<64x32xf32, #tpu.memory_space<vmem>>, vector<64x16xf32>
    tpu.vector_store %arg21[%c0_38, %c0_39], %80 {strides = array<i32>} : memref<64x32xf32, #tpu.memory_space<vmem>>, vector<64x16xf32>,
    %82 = vector.extract_strided_slice %61 {offsets = [0, 16], sizes = [64, 16], strides = [1, 1]} : vector<64x32xbf16> to vector<64x16xbf16>
    %83 = vector.extract_strided_slice %62 {offsets = [0, 16], sizes = [64, 16], strides = [1, 1]} : vector<64x32xbf16> to vector<64x16xbf16>
    %cst_40 = arith.constant dense<0.000000e+00> : vector<64x64xf32>
    %84 = tpu.matmul %82, %83, %cst_40 {dimension_numbers = #tpu.dot_dimension_numbers<[1], [1], [0], [0], [0, 0, 1, 0], [], []>} : vector<64x16xbf16>, vector<64x16xbf16>, vector<64x64xf32> -> vector<64x64xf32>
    %cst_41 = arith.constant dense<0xFF800000> : vector<64xf32>
    %85 = vector.multi_reduction <maximumf>, %84, %cst_41 [1] : vector<64x64xf32> to vector<64xf32>
    %86 = vector.shape_cast %85 : vector<64xf32> to vector<64x1xf32>
    %87 = vector.broadcast %86 : vector<64x1xf32> to vector<64x64xf32>
    %88 = arith.subf %84, %87 : vector<64x64xf32>
    %89 = math.exp %88 : vector<64x64xf32>
    %cst_42 = arith.constant dense<0.000000e+00> : vector<64xf32>
    %90 = vector.multi_reduction <add>, %89, %cst_42 [1] : vector<64x64xf32> to vector<64xf32>
    %91 = vector.shape_cast %90 : vector<64xf32> to vector<64x1xf32>
    %cst_43 = arith.constant 1.000000e+00 : f32
    %92 = vector.broadcast %cst_43 : f32 to vector<64x1xf32>
    %93 = arith.divf %92, %91 : vector<64x1xf32>
    %94 = vector.broadcast %93 : vector<64x1xf32> to vector<64x64xf32>
    %95 = arith.mulf %89, %94 : vector<64x64xf32>
    %96 = arith.truncf %95 : vector<64x64xf32> to vector<64x64xbf16>
    %97 = vector.extract_strided_slice %63 {offsets = [0, 16], sizes = [64, 16], strides = [1, 1]} : vector<64x32xbf16> to vector<64x16xbf16>
    %cst_44 = arith.constant dense<0.000000e+00> : vector<64x16xf32>
    %98 = tpu.matmul %96, %97, %cst_44 {dimension_numbers = #tpu.dot_dimension_numbers<[1], [0], [0], [1], [0, 0, 1, 1], [], []>} : vector<64x64xbf16>, vector<64x16xbf16>, vector<64x16xf32> -> vector<64x16xf32>
    %c0_45 = arith.constant 0 : index
    %c16 = arith.constant 16 : index
    %99 = vector.load %arg21[%c0_45, %c16] : memref<64x32xf32, #tpu.memory_space<vmem>>, vector<64x16xf32>
    tpu.vector_store %arg21[%c0_45, %c16], %98 {strides = array<i32>} : memref<64x32xf32, #tpu.memory_space<vmem>>, vector<64x16xf32>,
    %c0_46 = arith.constant 0 : index
    %c0_47 = arith.constant 0 : index
    %100 = vector.load %arg21[%c0_46, %c0_47] : memref<64x32xf32, #tpu.memory_space<vmem>>, vector<64x32xf32>
    %101 = arith.truncf %100 : vector<64x32xf32> to vector<64x32xbf16>
    %c0_48 = arith.constant 0 : index
    %c0_49 = arith.constant 0 : index
    %102 = vector.load %arg9[%c0_48, %c0_49] : memref<32x32xbf16, #tpu.memory_space<vmem>>, vector<32x32xbf16>
    %cst_50 = arith.constant dense<0.000000e+00> : vector<64x32xf32>
    %103 = tpu.matmul %101, %102, %cst_50 {dimension_numbers = #tpu.dot_dimension_numbers<[1], [0], [0], [1], [0, 0, 1, 1], [], []>} : vector<64x32xbf16>, vector<32x32xbf16>, vector<64x32xf32> -> vector<64x32xf32>
    %c0_51 = arith.constant 0 : index
    %c0_52 = arith.constant 0 : index
    %104 = vector.load %arg10[%c0_51, %c0_52] : memref<1x32xf32, #tpu.memory_space<vmem>>, vector<1x32xf32>
    %105 = vector.broadcast %104 : vector<1x32xf32> to vector<64x32xf32>
    %106 = arith.addf %103, %105 : vector<64x32xf32>
    %107 = arith.addf %1, %106 : vector<64x32xf32>
    %108 = arith.truncf %45 : vector<64x32xf32> to vector<64x32xbf16>
    %109 = arith.truncf %107 : vector<64x32xf32> to vector<64x32xbf16>
    %c0_53 = arith.constant 0 : index
    %c0_54 = arith.constant 0 : index
    %110 = vector.load %arg3[%c0_53, %c0_54] : memref<32x32xbf16, #tpu.memory_space<vmem>>, vector<32x32xbf16>
    %cst_55 = arith.constant dense<0.000000e+00> : vector<64x32xf32>
    %111 = tpu.matmul %108, %110, %cst_55 {dimension_numbers = #tpu.dot_dimension_numbers<[1], [0], [0], [1], [0, 0, 1, 1], [], []>} : vector<64x32xbf16>, vector<32x32xbf16>, vector<64x32xf32> -> vector<64x32xf32>
    %c0_56 = arith.constant 0 : index
    %c0_57 = arith.constant 0 : index
    %112 = vector.load %arg4[%c0_56, %c0_57] : memref<64x32xf32, #tpu.memory_space<vmem>>, vector<64x32xf32>
    %113 = arith.addf %111, %112 : vector<64x32xf32>
    %c0_58 = arith.constant 0 : index
    %c0_59 = arith.constant 0 : index
    %114 = vector.load %arg5[%c0_58, %c0_59] : memref<32x32xbf16, #tpu.memory_space<vmem>>, vector<32x32xbf16>
    %cst_60 = arith.constant dense<0.000000e+00> : vector<64x32xf32>
    %115 = tpu.matmul %109, %114, %cst_60 {dimension_numbers = #tpu.dot_dimension_numbers<[1], [0], [0], [1], [0, 0, 1, 1], [], []>} : vector<64x32xbf16>, vector<32x32xbf16>, vector<64x32xf32> -> vector<64x32xf32>
    %c0_61 = arith.constant 0 : index
    %c0_62 = arith.constant 0 : index
    %116 = vector.load %arg6[%c0_61, %c0_62] : memref<64x32xf32, #tpu.memory_space<vmem>>, vector<64x32xf32>
    %117 = arith.addf %115, %116 : vector<64x32xf32>
    %c0_63 = arith.constant 0 : index
    %c0_64 = arith.constant 0 : index
    %118 = vector.load %arg7[%c0_63, %c0_64] : memref<32x32xbf16, #tpu.memory_space<vmem>>, vector<32x32xbf16>
    %cst_65 = arith.constant dense<0.000000e+00> : vector<64x32xf32>
    %119 = tpu.matmul %109, %118, %cst_65 {dimension_numbers = #tpu.dot_dimension_numbers<[1], [0], [0], [1], [0, 0, 1, 1], [], []>} : vector<64x32xbf16>, vector<32x32xbf16>, vector<64x32xf32> -> vector<64x32xf32>
    %c0_66 = arith.constant 0 : index
    %c0_67 = arith.constant 0 : index
    %120 = vector.load %arg8[%c0_66, %c0_67] : memref<1x32xf32, #tpu.memory_space<vmem>>, vector<1x32xf32>
    %121 = vector.broadcast %120 : vector<1x32xf32> to vector<64x32xf32>
    %122 = arith.addf %119, %121 : vector<64x32xf32>
    %123 = arith.truncf %113 : vector<64x32xf32> to vector<64x32xbf16>
    %124 = arith.truncf %117 : vector<64x32xf32> to vector<64x32xbf16>
    %125 = arith.truncf %122 : vector<64x32xf32> to vector<64x32xbf16>
    %126 = vector.extract_strided_slice %123 {offsets = [0, 0], sizes = [64, 16], strides = [1, 1]} : vector<64x32xbf16> to vector<64x16xbf16>
    %127 = vector.extract_strided_slice %124 {offsets = [0, 0], sizes = [64, 16], strides = [1, 1]} : vector<64x32xbf16> to vector<64x16xbf16>
    %cst_68 = arith.constant dense<0.000000e+00> : vector<64x64xf32>
    %128 = tpu.matmul %126, %127, %cst_68 {dimension_numbers = #tpu.dot_dimension_numbers<[1], [1], [0], [0], [0, 0, 1, 0], [], []>} : vector<64x16xbf16>, vector<64x16xbf16>, vector<64x64xf32> -> vector<64x64xf32>
    %cst_69 = arith.constant dense<0xFF800000> : vector<64xf32>
    %129 = vector.multi_reduction <maximumf>, %128, %cst_69 [1] : vector<64x64xf32> to vector<64xf32>
    %130 = vector.shape_cast %129 : vector<64xf32> to vector<64x1xf32>
    %131 = vector.broadcast %130 : vector<64x1xf32> to vector<64x64xf32>
    %132 = arith.subf %128, %131 : vector<64x64xf32>
    %133 = math.exp %132 : vector<64x64xf32>
    %cst_70 = arith.constant dense<0.000000e+00> : vector<64xf32>
    %134 = vector.multi_reduction <add>, %133, %cst_70 [1] : vector<64x64xf32> to vector<64xf32>
    %135 = vector.shape_cast %134 : vector<64xf32> to vector<64x1xf32>
    %cst_71 = arith.constant 1.000000e+00 : f32
    %136 = vector.broadcast %cst_71 : f32 to vector<64x1xf32>
    %137 = arith.divf %136, %135 : vector<64x1xf32>
    %138 = vector.broadcast %137 : vector<64x1xf32> to vector<64x64xf32>
    %139 = arith.mulf %133, %138 : vector<64x64xf32>
    %140 = arith.truncf %139 : vector<64x64xf32> to vector<64x64xbf16>
    %141 = vector.extract_strided_slice %125 {offsets = [0, 0], sizes = [64, 16], strides = [1, 1]} : vector<64x32xbf16> to vector<64x16xbf16>
    %cst_72 = arith.constant dense<0.000000e+00> : vector<64x16xf32>
    %142 = tpu.matmul %140, %141, %cst_72 {dimension_numbers = #tpu.dot_dimension_numbers<[1], [0], [0], [1], [0, 0, 1, 1], [], []>} : vector<64x64xbf16>, vector<64x16xbf16>, vector<64x16xf32> -> vector<64x16xf32>
    %c0_73 = arith.constant 0 : index
    %c0_74 = arith.constant 0 : index
    %143 = vector.load %arg21[%c0_73, %c0_74] : memref<64x32xf32, #tpu.memory_space<vmem>>, vector<64x16xf32>
    tpu.vector_store %arg21[%c0_73, %c0_74], %142 {strides = array<i32>} : memref<64x32xf32, #tpu.memory_space<vmem>>, vector<64x16xf32>,
    %144 = vector.extract_strided_slice %123 {offsets = [0, 16], sizes = [64, 16], strides = [1, 1]} : vector<64x32xbf16> to vector<64x16xbf16>
    %145 = vector.extract_strided_slice %124 {offsets = [0, 16], sizes = [64, 16], strides = [1, 1]} : vector<64x32xbf16> to vector<64x16xbf16>
    %cst_75 = arith.constant dense<0.000000e+00> : vector<64x64xf32>
    %146 = tpu.matmul %144, %145, %cst_75 {dimension_numbers = #tpu.dot_dimension_numbers<[1], [1], [0], [0], [0, 0, 1, 0], [], []>} : vector<64x16xbf16>, vector<64x16xbf16>, vector<64x64xf32> -> vector<64x64xf32>
    %cst_76 = arith.constant dense<0xFF800000> : vector<64xf32>
    %147 = vector.multi_reduction <maximumf>, %146, %cst_76 [1] : vector<64x64xf32> to vector<64xf32>
    %148 = vector.shape_cast %147 : vector<64xf32> to vector<64x1xf32>
    %149 = vector.broadcast %148 : vector<64x1xf32> to vector<64x64xf32>
    %150 = arith.subf %146, %149 : vector<64x64xf32>
    %151 = math.exp %150 : vector<64x64xf32>
    %cst_77 = arith.constant dense<0.000000e+00> : vector<64xf32>
    %152 = vector.multi_reduction <add>, %151, %cst_77 [1] : vector<64x64xf32> to vector<64xf32>
    %153 = vector.shape_cast %152 : vector<64xf32> to vector<64x1xf32>
    %cst_78 = arith.constant 1.000000e+00 : f32
    %154 = vector.broadcast %cst_78 : f32 to vector<64x1xf32>
    %155 = arith.divf %154, %153 : vector<64x1xf32>
    %156 = vector.broadcast %155 : vector<64x1xf32> to vector<64x64xf32>
    %157 = arith.mulf %151, %156 : vector<64x64xf32>
    %158 = arith.truncf %157 : vector<64x64xf32> to vector<64x64xbf16>
    %159 = vector.extract_strided_slice %125 {offsets = [0, 16], sizes = [64, 16], strides = [1, 1]} : vector<64x32xbf16> to vector<64x16xbf16>
    %cst_79 = arith.constant dense<0.000000e+00> : vector<64x16xf32>
    %160 = tpu.matmul %158, %159, %cst_79 {dimension_numbers = #tpu.dot_dimension_numbers<[1], [0], [0], [1], [0, 0, 1, 1], [], []>} : vector<64x64xbf16>, vector<64x16xbf16>, vector<64x16xf32> -> vector<64x16xf32>
    %c0_80 = arith.constant 0 : index
    %c16_81 = arith.constant 16 : index
    %161 = vector.load %arg21[%c0_80, %c16_81] : memref<64x32xf32, #tpu.memory_space<vmem>>, vector<64x16xf32>
    tpu.vector_store %arg21[%c0_80, %c16_81], %160 {strides = array<i32>} : memref<64x32xf32, #tpu.memory_space<vmem>>, vector<64x16xf32>,
    %c0_82 = arith.constant 0 : index
    %c0_83 = arith.constant 0 : index
    %162 = vector.load %arg21[%c0_82, %c0_83] : memref<64x32xf32, #tpu.memory_space<vmem>>, vector<64x32xf32>
    %163 = arith.truncf %162 : vector<64x32xf32> to vector<64x32xbf16>
    %c0_84 = arith.constant 0 : index
    %c0_85 = arith.constant 0 : index
    %164 = vector.load %arg9[%c0_84, %c0_85] : memref<32x32xbf16, #tpu.memory_space<vmem>>, vector<32x32xbf16>
    %cst_86 = arith.constant dense<0.000000e+00> : vector<64x32xf32>
    %165 = tpu.matmul %163, %164, %cst_86 {dimension_numbers = #tpu.dot_dimension_numbers<[1], [0], [0], [1], [0, 0, 1, 1], [], []>} : vector<64x32xbf16>, vector<32x32xbf16>, vector<64x32xf32> -> vector<64x32xf32>
    %c0_87 = arith.constant 0 : index
    %c0_88 = arith.constant 0 : index
    %166 = vector.load %arg10[%c0_87, %c0_88] : memref<1x32xf32, #tpu.memory_space<vmem>>, vector<1x32xf32>
    %167 = vector.broadcast %166 : vector<1x32xf32> to vector<64x32xf32>
    %168 = arith.addf %165, %167 : vector<64x32xf32>
    %169 = arith.addf %3, %168 : vector<64x32xf32>
    %c0_89 = arith.constant 0 : index
    %c0_90 = arith.constant 0 : index
    %170 = vector.load %arg17[%c0_89, %c0_90] : memref<1x32xf32, #tpu.memory_space<vmem>>, vector<1x32xf32>
    %c0_91 = arith.constant 0 : index
    %c0_92 = arith.constant 0 : index
    %171 = vector.load %arg18[%c0_91, %c0_92] : memref<1x32xf32, #tpu.memory_space<vmem>>, vector<1x32xf32>
    %cst_93 = arith.constant dense<0.000000e+00> : vector<64xf32>
    %172 = vector.multi_reduction <add>, %107, %cst_93 [1] : vector<64x32xf32> to vector<64xf32>
    %173 = vector.shape_cast %172 : vector<64xf32> to vector<64x1xf32>
    %cst_94 = arith.constant 3.200000e+01 : f32
    %174 = vector.broadcast %cst_94 : f32 to vector<64x1xf32>
    %175 = arith.divf %173, %174 : vector<64x1xf32>
    %176 = vector.broadcast %175 : vector<64x1xf32> to vector<64x32xf32>
    %177 = arith.subf %107, %176 : vector<64x32xf32>
    %178 = arith.mulf %177, %177 : vector<64x32xf32>
    %cst_95 = arith.constant dense<0.000000e+00> : vector<64xf32>
    %179 = vector.multi_reduction <add>, %178, %cst_95 [1] : vector<64x32xf32> to vector<64xf32>
    %180 = vector.shape_cast %179 : vector<64xf32> to vector<64x1xf32>
    %cst_96 = arith.constant 3.200000e+01 : f32
    %181 = vector.broadcast %cst_96 : f32 to vector<64x1xf32>
    %182 = arith.divf %180, %181 : vector<64x1xf32>
    %cst_97 = arith.constant 9.99999974E-6 : f32
    %183 = vector.broadcast %cst_97 : f32 to vector<64x1xf32>
    %184 = arith.addf %182, %183 : vector<64x1xf32>
    %185 = math.rsqrt %184 : vector<64x1xf32>
    %186 = vector.broadcast %185 : vector<64x1xf32> to vector<64x32xf32>
    %187 = arith.mulf %177, %186 : vector<64x32xf32>
    %188 = vector.broadcast %170 : vector<1x32xf32> to vector<64x32xf32>
    %189 = arith.mulf %187, %188 : vector<64x32xf32>
    %190 = vector.broadcast %171 : vector<1x32xf32> to vector<64x32xf32>
    %191 = arith.addf %189, %190 : vector<64x32xf32>
    %192 = arith.truncf %191 : vector<64x32xf32> to vector<64x32xbf16>
    %c0_98 = arith.constant 0 : index
    %c0_99 = arith.constant 0 : index
    %193 = vector.load %arg11[%c0_98, %c0_99] : memref<32x128xbf16, #tpu.memory_space<vmem>>, vector<32x128xbf16>
    %cst_100 = arith.constant dense<0.000000e+00> : vector<64x128xf32>
    %194 = tpu.matmul %192, %193, %cst_100 {dimension_numbers = #tpu.dot_dimension_numbers<[1], [0], [0], [1], [0, 0, 1, 1], [], []>} : vector<64x32xbf16>, vector<32x128xbf16>, vector<64x128xf32> -> vector<64x128xf32>
    %c0_101 = arith.constant 0 : index
    %c0_102 = arith.constant 0 : index
    %195 = vector.load %arg12[%c0_101, %c0_102] : memref<1x128xf32, #tpu.memory_space<vmem>>, vector<1x128xf32>
    %196 = vector.broadcast %195 : vector<1x128xf32> to vector<64x128xf32>
    %197 = arith.addf %194, %196 : vector<64x128xf32>
    %cst_103 = arith.constant 5.000000e-01 : f32
    %198 = vector.broadcast %cst_103 : f32 to vector<64x128xf32>
    %199 = arith.mulf %198, %197 : vector<64x128xf32>
    %cst_104 = arith.constant 0.707106769 : f32
    %200 = vector.broadcast %cst_104 : f32 to vector<64x128xf32>
    %201 = arith.mulf %197, %200 : vector<64x128xf32>
    %202 = math.erf %201 : vector<64x128xf32>
    %cst_105 = arith.constant 1.000000e+00 : f32
    %203 = vector.broadcast %cst_105 : f32 to vector<64x128xf32>
    %204 = arith.addf %203, %202 : vector<64x128xf32>
    %205 = arith.mulf %199, %204 : vector<64x128xf32>
    %206 = arith.truncf %205 : vector<64x128xf32> to vector<64x128xbf16>
    %c0_106 = arith.constant 0 : index
    %c0_107 = arith.constant 0 : index
    %207 = vector.load %arg13[%c0_106, %c0_107] : memref<128x32xbf16, #tpu.memory_space<vmem>>, vector<128x32xbf16>
    %cst_108 = arith.constant dense<0.000000e+00> : vector<64x32xf32>
    %208 = tpu.matmul %206, %207, %cst_108 {dimension_numbers = #tpu.dot_dimension_numbers<[1], [0], [0], [1], [0, 0, 1, 1], [], []>} : vector<64x128xbf16>, vector<128x32xbf16>, vector<64x32xf32> -> vector<64x32xf32>
    %c0_109 = arith.constant 0 : index
    %c0_110 = arith.constant 0 : index
    %209 = vector.load %arg14[%c0_109, %c0_110] : memref<1x32xf32, #tpu.memory_space<vmem>>, vector<1x32xf32>
    %210 = vector.broadcast %209 : vector<1x32xf32> to vector<64x32xf32>
    %211 = arith.addf %208, %210 : vector<64x32xf32>
    %212 = arith.addf %107, %211 : vector<64x32xf32>
    %cst_111 = arith.constant dense<0.000000e+00> : vector<64xf32>
    %213 = vector.multi_reduction <add>, %169, %cst_111 [1] : vector<64x32xf32> to vector<64xf32>
    %214 = vector.shape_cast %213 : vector<64xf32> to vector<64x1xf32>
    %cst_112 = arith.constant 3.200000e+01 : f32
    %215 = vector.broadcast %cst_112 : f32 to vector<64x1xf32>
    %216 = arith.divf %214, %215 : vector<64x1xf32>
    %217 = vector.broadcast %216 : vector<64x1xf32> to vector<64x32xf32>
    %218 = arith.subf %169, %217 : vector<64x32xf32>
    %219 = arith.mulf %218, %218 : vector<64x32xf32>
    %cst_113 = arith.constant dense<0.000000e+00> : vector<64xf32>
    %220 = vector.multi_reduction <add>, %219, %cst_113 [1] : vector<64x32xf32> to vector<64xf32>
    %221 = vector.shape_cast %220 : vector<64xf32> to vector<64x1xf32>
    %cst_114 = arith.constant 3.200000e+01 : f32
    %222 = vector.broadcast %cst_114 : f32 to vector<64x1xf32>
    %223 = arith.divf %221, %222 : vector<64x1xf32>
    %cst_115 = arith.constant 9.99999974E-6 : f32
    %224 = vector.broadcast %cst_115 : f32 to vector<64x1xf32>
    %225 = arith.addf %223, %224 : vector<64x1xf32>
    %226 = math.rsqrt %225 : vector<64x1xf32>
    %227 = vector.broadcast %226 : vector<64x1xf32> to vector<64x32xf32>
    %228 = arith.mulf %218, %227 : vector<64x32xf32>
    %229 = vector.broadcast %170 : vector<1x32xf32> to vector<64x32xf32>
    %230 = arith.mulf %228, %229 : vector<64x32xf32>
    %231 = vector.broadcast %171 : vector<1x32xf32> to vector<64x32xf32>
    %232 = arith.addf %230, %231 : vector<64x32xf32>
    %233 = arith.truncf %232 : vector<64x32xf32> to vector<64x32xbf16>
    %c0_116 = arith.constant 0 : index
    %c0_117 = arith.constant 0 : index
    %234 = vector.load %arg11[%c0_116, %c0_117] : memref<32x128xbf16, #tpu.memory_space<vmem>>, vector<32x128xbf16>
    %cst_118 = arith.constant dense<0.000000e+00> : vector<64x128xf32>
    %235 = tpu.matmul %233, %234, %cst_118 {dimension_numbers = #tpu.dot_dimension_numbers<[1], [0], [0], [1], [0, 0, 1, 1], [], []>} : vector<64x32xbf16>, vector<32x128xbf16>, vector<64x128xf32> -> vector<64x128xf32>
    %c0_119 = arith.constant 0 : index
    %c0_120 = arith.constant 0 : index
    %236 = vector.load %arg12[%c0_119, %c0_120] : memref<1x128xf32, #tpu.memory_space<vmem>>, vector<1x128xf32>
    %237 = vector.broadcast %236 : vector<1x128xf32> to vector<64x128xf32>
    %238 = arith.addf %235, %237 : vector<64x128xf32>
    %cst_121 = arith.constant 5.000000e-01 : f32
    %239 = vector.broadcast %cst_121 : f32 to vector<64x128xf32>
    %240 = arith.mulf %239, %238 : vector<64x128xf32>
    %cst_122 = arith.constant 0.707106769 : f32
    %241 = vector.broadcast %cst_122 : f32 to vector<64x128xf32>
    %242 = arith.mulf %238, %241 : vector<64x128xf32>
    %243 = math.erf %242 : vector<64x128xf32>
    %cst_123 = arith.constant 1.000000e+00 : f32
    %244 = vector.broadcast %cst_123 : f32 to vector<64x128xf32>
    %245 = arith.addf %244, %243 : vector<64x128xf32>
    %246 = arith.mulf %240, %245 : vector<64x128xf32>
    %247 = arith.truncf %246 : vector<64x128xf32> to vector<64x128xbf16>
    %c0_124 = arith.constant 0 : index
    %c0_125 = arith.constant 0 : index
    %248 = vector.load %arg13[%c0_124, %c0_125] : memref<128x32xbf16, #tpu.memory_space<vmem>>, vector<128x32xbf16>
    %cst_126 = arith.constant dense<0.000000e+00> : vector<64x32xf32>
    %249 = tpu.matmul %247, %248, %cst_126 {dimension_numbers = #tpu.dot_dimension_numbers<[1], [0], [0], [1], [0, 0, 1, 1], [], []>} : vector<64x128xbf16>, vector<128x32xbf16>, vector<64x32xf32> -> vector<64x32xf32>
    %c0_127 = arith.constant 0 : index
    %c0_128 = arith.constant 0 : index
    %250 = vector.load %arg14[%c0_127, %c0_128] : memref<1x32xf32, #tpu.memory_space<vmem>>, vector<1x32xf32>
    %251 = vector.broadcast %250 : vector<1x32xf32> to vector<64x32xf32>
    %252 = arith.addf %249, %251 : vector<64x32xf32>
    %253 = arith.addf %169, %252 : vector<64x32xf32>
    %c0_129 = arith.constant 0 : index
    %c0_130 = arith.constant 0 : index
    %c0_131 = arith.constant 0 : index
    %254 = vector.load %arg19[%c0_129, %c0_130, %c0_131] : memref<1x64x32xf32, #tpu.memory_space<vmem>>, vector<1x64x32xf32>
    %255 = vector.shape_cast %254 : vector<1x64x32xf32> to vector<64x32xf32>
    %256 = vector.shape_cast %212 : vector<64x32xf32> to vector<1x64x32xf32>
    tpu.vector_store %arg19[%c0_129, %c0_130, %c0_131], %256 {strides = array<i32>} : memref<1x64x32xf32, #tpu.memory_space<vmem>>, vector<1x64x32xf32>,
    %c0_132 = arith.constant 0 : index
    %c0_133 = arith.constant 0 : index
    %c0_134 = arith.constant 0 : index
    %257 = vector.load %arg20[%c0_132, %c0_133, %c0_134] : memref<1x64x32xf32, #tpu.memory_space<vmem>>, vector<1x64x32xf32>
    %258 = vector.shape_cast %257 : vector<1x64x32xf32> to vector<64x32xf32>
    %259 = vector.shape_cast %253 : vector<64x32xf32> to vector<1x64x32xf32>
    tpu.vector_store %arg20[%c0_132, %c0_133, %c0_134], %259 {strides = array<i32>} : memref<1x64x32xf32, #tpu.memory_space<vmem>>, vector<1x64x32xf32>,
    return
  }
  func.func @transform_0(%arg0: i32) -> (i32, i32, i32) {
    %c0_i32 = arith.constant 0 : i32
    %c0_i32_0 = arith.constant 0 : i32
    %c0_i32_1 = arith.constant 0 : i32
    return %arg0, %c0_i32, %c0_i32_0 : i32, i32, i32
  }
  func.func @transform_1(%arg0: i32) -> (i32, i32, i32) {
    %c0_i32 = arith.constant 0 : i32
    %c0_i32_0 = arith.constant 0 : i32
    %c0_i32_1 = arith.constant 0 : i32
    return %arg0, %c0_i32, %c0_i32_0 : i32, i32, i32
  }
  func.func @transform_2(%arg0: i32) -> (i32, i32) {
    %c0_i32 = arith.constant 0 : i32
    %c0_i32_0 = arith.constant 0 : i32
    %c0_i32_1 = arith.constant 0 : i32
    return %c0_i32, %c0_i32_0 : i32, i32
  }
  func.func @transform_3(%arg0: i32) -> (i32, i32) {
    %c0_i32 = arith.constant 0 : i32
    %c0_i32_0 = arith.constant 0 : i32
    %c0_i32_1 = arith.constant 0 : i32
    return %c0_i32, %c0_i32_0 : i32, i32
  }
  func.func @transform_4(%arg0: i32) -> (i32, i32) {
    %c0_i32 = arith.constant 0 : i32
    %c0_i32_0 = arith.constant 0 : i32
    %c0_i32_1 = arith.constant 0 : i32
    return %c0_i32, %c0_i32_0 : i32, i32
  }
  func.func @transform_5(%arg0: i32) -> (i32, i32) {
    %c0_i32 = arith.constant 0 : i32
    %c0_i32_0 = arith.constant 0 : i32
    %c0_i32_1 = arith.constant 0 : i32
    return %c0_i32, %c0_i32_0 : i32, i32
  }
  func.func @transform_6(%arg0: i32) -> (i32, i32) {
    %c0_i32 = arith.constant 0 : i32
    %c0_i32_0 = arith.constant 0 : i32
    %c0_i32_1 = arith.constant 0 : i32
    return %c0_i32, %c0_i32_0 : i32, i32
  }
  func.func @transform_7(%arg0: i32) -> (i32, i32) {
    %c0_i32 = arith.constant 0 : i32
    %c0_i32_0 = arith.constant 0 : i32
    %c0_i32_1 = arith.constant 0 : i32
    return %c0_i32, %c0_i32_0 : i32, i32
  }
  func.func @transform_8(%arg0: i32) -> (i32, i32) {
    %c0_i32 = arith.constant 0 : i32
    %c0_i32_0 = arith.constant 0 : i32
    %c0_i32_1 = arith.constant 0 : i32
    return %c0_i32, %c0_i32_0 : i32, i32
  }
  func.func @transform_9(%arg0: i32) -> (i32, i32) {
    %c0_i32 = arith.constant 0 : i32
    %c0_i32_0 = arith.constant 0 : i32
    %c0_i32_1 = arith.constant 0 : i32
    return %c0_i32, %c0_i32_0 : i32, i32
  }
  func.func @transform_10(%arg0: i32) -> (i32, i32) {
    %c0_i32 = arith.constant 0 : i32
    %c0_i32_0 = arith.constant 0 : i32
    %c0_i32_1 = arith.constant 0 : i32
    return %c0_i32, %c0_i32_0 : i32, i32
  }
  func.func @transform_11(%arg0: i32) -> (i32, i32) {
    %c0_i32 = arith.constant 0 : i32
    %c0_i32_0 = arith.constant 0 : i32
    %c0_i32_1 = arith.constant 0 : i32
    return %c0_i32, %c0_i32_0 : i32, i32
  }
  func.func @transform_12(%arg0: i32) -> (i32, i32) {
    %c0_i32 = arith.constant 0 : i32
    %c0_i32_0 = arith.constant 0 : i32
    %c0_i32_1 = arith.constant 0 : i32
    return %c0_i32, %c0_i32_0 : i32, i32
  }
  func.func @transform_13(%arg0: i32) -> (i32, i32) {
    %c0_i32 = arith.constant 0 : i32
    %c0_i32_0 = arith.constant 0 : i32
    %c0_i32_1 = arith.constant 0 : i32
    return %c0_i32, %c0_i32_0 : i32, i32
  }
  func.func @transform_14(%arg0: i32) -> (i32, i32) {
    %c0_i32 = arith.constant 0 : i32
    %c0_i32_0 = arith.constant 0 : i32
    %c0_i32_1 = arith.constant 0 : i32
    return %c0_i32, %c0_i32_0 : i32, i32
  }
  func.func @transform_15(%arg0: i32) -> (i32, i32) {
    %c0_i32 = arith.constant 0 : i32
    %c0_i32_0 = arith.constant 0 : i32
    %c0_i32_1 = arith.constant 0 : i32
    return %c0_i32, %c0_i32_0 : i32, i32
  }
  func.func @transform_16(%arg0: i32) -> (i32, i32) {
    %c0_i32 = arith.constant 0 : i32
    %c0_i32_0 = arith.constant 0 : i32
    %c0_i32_1 = arith.constant 0 : i32
    return %c0_i32, %c0_i32_0 : i32, i32
  }
  func.func @transform_17(%arg0: i32) -> (i32, i32) {
    %c0_i32 = arith.constant 0 : i32
    %c0_i32_0 = arith.constant 0 : i32
    %c0_i32_1 = arith.constant 0 : i32
    return %c0_i32, %c0_i32_0 : i32, i32
  }
  func.func @transform_18(%arg0: i32) -> (i32, i32, i32) {
    %c0_i32 = arith.constant 0 : i32
    %c0_i32_0 = arith.constant 0 : i32
    %c0_i32_1 = arith.constant 0 : i32
    return %arg0, %c0_i32, %c0_i32_0 : i32, i32, i32
  }
  func.func @transform_19(%arg0: i32) -> (i32, i32, i32) {
    %c0_i32 = arith.constant 0 : i32
    %c0_i32_0 = arith.constant 0 : i32
    %c0_i32_1 = arith.constant 0 : i32
    return %arg0, %c0_i32, %c0_i32_0 : i32, i32, i32
  }
}

</mosaic_0001>

<bundles_post_ra>
// kernel: cross_block_forward.1
= control target key start
LH: loop header
LB: loop body
LE: loop exit
PB: predicated region body
PF: predicated region fallthrough
CT: control target
= control target key end

     0   :  { %s6080_s0 = inlined_call_operand.vmem [shape: f32[2,64,32], index: 0, kind: input, shape index: {}]   ;;  %s6081_s1 = inlined_call_operand.vmem [shape: f32[2,64,32], index: 1, kind: input, shape index: {}]   ;;  %s6082_s2 = inlined_call_operand.vmem [shape: bf16[32,32], index: 2, kind: input, shape index: {}]   ;;  %s6083_s3 = inlined_call_operand.vmem [shape: f32[64,32], index: 3, kind: input, shape index: {}]   ;;  %s6084_s4 = inlined_call_operand.vmem [shape: bf16[32,32], index: 4, kind: input, shape index: {}]   ;;  %s6085_s5 = inlined_call_operand.vmem [shape: f32[64,32], index: 5, kind: input, shape index: {}]   ;;  %s6086_s6 = inlined_call_operand.vmem [shape: bf16[32,32], index: 6, kind: input, shape index: {}]   ;;  %s6087_s7 = inlined_call_operand.vmem [shape: f32[1,32], index: 7, kind: input, shape index: {}]   ;;  %s6088_s8 = inlined_call_operand.vmem [shape: bf16[32,32], index: 8, kind: input, shape index: {}]   ;;  %s6089_s9 = inlined_call_operand.vmem [shape: f32[1,32], index: 9, kind: input, shape index: {}]   ;;  %s6090_s10 = inlined_call_operand.vmem [shape: bf16[32,128], index: 10, kind: input, shape index: {}]   ;;  %s6091_s11 = inlined_call_operand.vmem [shape: f32[1,128], index: 11, kind: input, shape index: {}]   ;;  %s6092_s12 = inlined_call_operand.vmem [shape: bf16[128,32], index: 12, kind: input, shape index: {}]   ;;  %s6093_s13 = inlined_call_operand.vmem [shape: f32[1,32], index: 13, kind: input, shape index: {}]   ;;  %s6094_s14 = inlined_call_operand.vmem [shape: f32[1,32], index: 14, kind: input, shape index: {}]   ;;  %s6095_s15 = inlined_call_operand.vmem [shape: f32[1,32], index: 15, kind: input, shape index: {}]   ;;  %s6096_s16 = inlined_call_operand.vmem [shape: f32[1,32], index: 16, kind: input, shape index: {}]   ;;  %s6097_s17 = inlined_call_operand.vmem [shape: f32[1,32], index: 17, kind: input, shape index: {}]   ;;  %s6098_s18 = inlined_call_operand.vmem [shape: f32[2,64,32], index: 18, kind: output, shape index: {0}]   ;;  %s6099_s19 = inlined_call_operand.vmem [shape: f32[2,64,32], index: 19, kind: output, shape index: {1}]  }
   0x1   :  { %6102 = sst [smem:[#allocation3_spill]] %s6080_s0  ;;  %s4838_s0 = smov 0  }
   0x2   :  { %6103 = sst [smem:[#allocation4_spill]] %s6081_s1 }
   0x3   :  { %6104 = sst [smem:[#allocation5_spill]] %s6082_s2 }
   0x4   :  { %6105 = sst [smem:[#allocation6_spill]] %s6083_s3 }
   0x5   :  { %6106 = sst [smem:[#allocation7_spill]] %s6094_s14 }
   0x6 LB: > { %s3856_s30 = sadd.s32 4294967295, %s4734_s0   ;;  %p3860_p0 = scmp.ge.s32.totalorder %s4734_s0, 1  ;;  %s4734_s0 = sphi %s4838_s0, %s30_s0  }
   0x7   : > { %p550_p1 = scmp.lt.s32.totalorder %s4734_s0, 3 }
   0x9   : > { %p551_p2 = pnand %p3860_p0, %p550_p1 }
   0xa   : > { %p616_p3 = scmp.lt.s32.totalorder (!%p551_p2), %s3856_s30, 1  ;;  %vm655_vm0 = vcmask (!%p551_p2), 261120   ;;  %s6107_s22 = sld [smem:[#allocation3_spill]] (!%p551_p2)  ;;  %vm1219_vm1 = vcmask (!%p551_p2), 130048   ;;  %vm1309_vm2 = vcmask (!%p551_p2), 523264   ;;  %vm1833_vm3 = vcmask (!%p551_p2), 261248  }
   0xb   : > { %554 = sbr.rel (%p551_p2) target bundleno = 5149 (0x141d), region = 92  ;;  %s6108_s25 = sld [smem:[#allocation4_spill]] (!%p551_p2) }
   0xc   : > { %s6109_s28 = sld [smem:[#allocation5_spill]] (!%p551_p2)  ;;  %s6110_s14 = sld [smem:[#allocation7_spill]] (!%p551_p2) }
   0xd   : > { %s6111_s24 = sld [smem:[#allocation6_spill]] (!%p551_p2)  ;;  %s4736_s29 = smov (!%p551_p2), 112  }
   0xe   : > { %s4737_s27 = smov (!%p551_p2), 16  }
  0x12   : > { %s6113_s30 = smov (!%p616_p3, %s3856_s30), 1 }
  0x13   : > { %s4846_s20 = sshll.u32 %s6113_s30, 6 }
  0x14   : > { %s4852_s2 = scalar_lea.vmem %s6107_s22, %s4846_s20  ;;  %s4861_s3 = scalar_lea.vmem %s6108_s25, %s4846_s20 }
  0x15   : > { %v637_v0 = vld [vmem:[%s4852_s2] sm:$0xff]  ;;  %v639_v1 = vld [vmem:[%s4852_s2 + $0x10] sm:$0xff]  ;;  %v638_v2 = vld [vmem:[%s4852_s2 + $0x8] sm:$0xff]  ;;  %s630_s30 = scalar_lea.vmem %s6098_s18, %s4846_s20 }
  0x16   : > { %v656_v3 = vsel %vm655_vm0, %v637_v0, 0.0  ;;  %v662_v4 = vsel %vm655_vm0, %v639_v1, 0.0  ;;  %v640_v5 = vld [vmem:[%s4852_s2 + $0x18] sm:$0xff]  ;;  %v4867_v6 = vld [vmem:[%s4852_s2 + $0x20] sm:$0xff]  ;;  %v4870_v7 = vld [vmem:[%s4852_s2 + $0x28] sm:$0xff]  ;;  %v659_v10 = vsel %vm655_vm0, %v638_v2, 0.0 }
  0x17   : > { %657 = vadd.xlane.f32.xlu0 %v656_v3  ;;  %663 = vadd.xlane.f32.xlu1 %v662_v4  ;;  %v4873_v8 = vld [vmem:[%s4852_s2 + $0x30] sm:$0xff]  ;;  %v4876_v9 = vld [vmem:[%s4852_s2 + $0x38] sm:$0xff]  ;;  %v665_v11 = vsel %vm655_vm0, %v640_v5, 0.0  ;;  %v4881_v12 = vld [vmem:[%s4861_s3] sm:$0xff]  ;;  %v668_v14 = vsel %vm655_vm0, %v4867_v6, 0.0  ;;  %v671_v15 = vsel %vm655_vm0, %v4870_v7, 0.0 }
  0x18   : > { %v4884_v13 = vld [vmem:[%s4861_s3 + $0x8] sm:$0xff]  ;;  %v674_v16 = vsel %vm655_vm0, %v4873_v8, 0.0  ;;  %v677_v17 = vsel %vm655_vm0, %v4876_v9, 0.0  ;;  %v789_v18 = vsel %vm655_vm0, %v4881_v12, 0.0  ;;  %v4899_v20 = vld [vmem:[%s4861_s3 + $0x10] sm:$0xff]  ;;  %v4902_v21 = vld [vmem:[%s4861_s3 + $0x18] sm:$0xff] }
  0x19   : > { %v792_v19 = vsel %vm655_vm0, %v4884_v13, 0.0  ;;  %v795_v22 = vsel %vm655_vm0, %v4899_v20, 0.0  ;;  %v798_v23 = vsel %vm655_vm0, %v4902_v21, 0.0  ;;  %v4909_v24 = vld [vmem:[%s4861_s3 + $0x20] sm:$0xff]  ;;  %v4912_v25 = vld [vmem:[%s4861_s3 + $0x28] sm:$0xff]  ;;  %v4919_v28 = vld [vmem:[%s4861_s3 + $0x30] sm:$0xff] }
  0x1a   : > { %v801_v26 = vsel %vm655_vm0, %v4909_v24, 0.0  ;;  %v804_v27 = vsel %vm655_vm0, %v4912_v25, 0.0  ;;  %v4922_v29 = vld [vmem:[%s4861_s3 + $0x38] sm:$0xff]  ;;  %v807_v30 = vsel %vm655_vm0, %v4919_v28, 0.0 }
  0x1b   : > { %660 = vadd.xlane.f32.xlu0 %v659_v10  ;;  %666 = vadd.xlane.f32.xlu1 %v665_v11  ;;  %v810_v31 = vsel %vm655_vm0, %v4922_v29, 0.0 }
  0x1f   : > { %669 = vadd.xlane.f32.xlu0 %v668_v14  ;;  %672 = vadd.xlane.f32.xlu1 %v671_v15 }
  0x23   : > { %675 = vadd.xlane.f32.xlu0 %v674_v16  ;;  %678 = vadd.xlane.f32.xlu1 %v677_v17 }
  0x27   : > { %790 = vadd.xlane.f32.xlu0 %v789_v18  ;;  %793 = vadd.xlane.f32.xlu1 %v792_v19 }
  0x2b   : > { %796 = vadd.xlane.f32.xlu0 %v795_v22  ;;  %799 = vadd.xlane.f32.xlu1 %v798_v23 }
  0x2f   : > { %802 = vadd.xlane.f32.xlu0 %v801_v26  ;;  %805 = vadd.xlane.f32.xlu1 %v804_v27 }
  0x33   : > { %808 = vadd.xlane.f32.xlu0 %v807_v30  ;;  %811 = vadd.xlane.f32.xlu1 %v810_v31 }
  0xa4   : > { %v658_v32 = vpop.xlane.xlu0 %657  ;;  %v664_v33 = vpop.xlane.xlu1 %663 }
  0xa5   : > { %v681_v34 = vmul.f32 0.03125, %v658_v32  ;;  %v683_v35 = vmul.f32 0.03125, %v664_v33 }
  0xa7   : > { %v4928_v36 = vsub.f32 %v637_v0, %v681_v34  ;;  %v4930_v37 = vsub.f32 %v639_v1, %v683_v35 }
  0xa8   : > { %v661_v38 = vpop.xlane.xlu0 %660  ;;  %v667_v39 = vpop.xlane.xlu1 %666 }
  0xa9   : > { %v682_v40 = vmul.f32 0.03125, %v661_v38  ;;  %v684_v41 = vmul.f32 0.03125, %v667_v39  ;;  %v697_v42 = vmul.f32 %v4928_v36, %v4928_v36  ;;  %v699_v43 = vmul.f32 %v4930_v37, %v4930_v37 }
  0xab   : > { %v4936_v44 = vsub.f32 %v638_v2, %v682_v40  ;;  %v4938_v45 = vsub.f32 %v640_v5, %v684_v41  ;;  %v705_v46 = vsel %vm655_vm0, %v697_v42, 0.0  ;;  %v711_v49 = vsel %vm655_vm0, %v699_v43, 0.0 }
  0xac   : > { %706 = vadd.xlane.f32.xlu0 %v705_v46  ;;  %v670_v47 = vpop.xlane.xlu0 %669  ;;  %v673_v48 = vpop.xlane.xlu1 %672 }
  0xad   : > { %v685_v50 = vmul.f32 0.03125, %v670_v47  ;;  %v686_v51 = vmul.f32 0.03125, %v673_v48  ;;  %v698_v52 = vmul.f32 %v4936_v44, %v4936_v44  ;;  %v700_v53 = vmul.f32 %v4938_v45, %v4938_v45 }
  0xaf   : > { %v4947_v54 = vsub.f32 %v4867_v6, %v685_v50  ;;  %v4950_v55 = vsub.f32 %v4870_v7, %v686_v51  ;;  %v708_v56 = vsel %vm655_vm0, %v698_v52, 0.0  ;;  %v714_v59 = vsel %vm655_vm0, %v700_v53, 0.0  ;;  %v4454_v53 = vld [vmem:[%s6109_s28 + $0x8] sm:$0xff]  }
  0xb0   : > { %712 = vadd.xlane.f32.xlu0 %v711_v49  ;;  %709 = vadd.xlane.f32.xlu1 %v708_v56  ;;  %v676_v57 = vpop.xlane.xlu0 %675  ;;  %v679_v58 = vpop.xlane.xlu1 %678  ;;  %v5029_v56 = vld [vmem:[%s6084_s4] sm:$0xff]  }
  0xb1   : > { %v687_v60 = vmul.f32 0.03125, %v676_v57  ;;  %v688_v61 = vmul.f32 0.03125, %v679_v58  ;;  %v701_v62 = vmul.f32 %v4947_v54, %v4947_v54  ;;  %v702_v63 = vmul.f32 %v4950_v55, %v4950_v55  ;;  %v4457_v57 = vld [vmem:[%s6086_s6] sm:$0xff]   ;;  %v4458_v58 = vld [vmem:[%s6086_s6 + $0x8] sm:$0xff]  }
  0xb2   : > { %4155 = vmatprep.subr.bf16.mxu0 %v4457_v57 }
  0xb3   : > { %v4959_v0 = vsub.f32 %v4873_v8, %v687_v60  ;;  %v4962_v1 = vsub.f32 %v4876_v9, %v688_v61  ;;  %v717_v2 = vsel %vm655_vm0, %v701_v62, 0.0  ;;  %v720_v5 = vsel %vm655_vm0, %v702_v63, 0.0  ;;  %4156 = vmatpush3.bf16.msra.mxu0 %v4457_v57 }
  0xb4   : > { %715 = vadd.xlane.f32.xlu1 %v714_v59  ;;  %718 = vadd.xlane.f32.xlu0 %v717_v2  ;;  %v791_v3 = vpop.xlane.xlu0 %790  ;;  %v794_v4 = vpop.xlane.xlu1 %793 }
  0xb5   : > { %v813_v6 = vmul.f32 0.03125, %v791_v3  ;;  %v814_v7 = vmul.f32 0.03125, %v794_v4  ;;  %v703_v10 = vmul.f32 %v4959_v0, %v4959_v0  ;;  %v704_v8 = vmul.f32 %v4962_v1, %v4962_v1  ;;  %4157 = vmatprep.subr.bf16.mxu0 %v4458_v58 }
  0xb7   : > { %v4971_v11 = vsub.f32 %v4881_v12, %v813_v6  ;;  %v4974_v9 = vsub.f32 %v4884_v13, %v814_v7  ;;  %v723_v14 = vsel %vm655_vm0, %v703_v10, 0.0  ;;  %v726_v17 = vsel %vm655_vm0, %v704_v8, 0.0  ;;  %4158 = vmatpush3.bf16.msra.mxu0 %v4458_v58 }
  0xb8   : > { %721 = vadd.xlane.f32.xlu1 %v720_v5  ;;  %724 = vadd.xlane.f32.xlu0 %v723_v14  ;;  %v797_v15 = vpop.xlane.xlu0 %796  ;;  %v800_v16 = vpop.xlane.xlu1 %799 }
  0xb9   : > { %v815_v18 = vmul.f32 0.03125, %v797_v15  ;;  %v816_v19 = vmul.f32 0.03125, %v800_v16  ;;  %v829_v22 = vmul.f32 %v4971_v11, %v4971_v11  ;;  %v830_v12 = vmul.f32 %v4974_v9, %v4974_v9 }
  0xbb   : > { %v4983_v23 = vsub.f32 %v4899_v20, %v815_v18  ;;  %v4986_v13 = vsub.f32 %v4902_v21, %v816_v19  ;;  %v837_v26 = vsel %vm655_vm0, %v829_v22, 0.0  ;;  %v840_v31 = vsel %vm655_vm0, %v830_v12, 0.0 }
  0xbc   : > { %727 = vadd.xlane.f32.xlu1 %v726_v17  ;;  %838 = vadd.xlane.f32.xlu0 %v837_v26  ;;  %v803_v27 = vpop.xlane.xlu0 %802  ;;  %v806_v30 = vpop.xlane.xlu1 %805 }
  0xbd   : > { %v817_v32 = vmul.f32 0.03125, %v803_v27  ;;  %v818_v33 = vmul.f32 0.03125, %v806_v30  ;;  %v831_v34 = vmul.f32 %v4983_v23, %v4983_v23  ;;  %v832_v20 = vmul.f32 %v4986_v13, %v4986_v13 }
  0xbf   : > { %v4995_v35 = vsub.f32 %v4909_v24, %v817_v32  ;;  %v4998_v21 = vsub.f32 %v4912_v25, %v818_v33  ;;  %v843_v38 = vsel %vm655_vm0, %v831_v34, 0.0  ;;  %v846_v41 = vsel %vm655_vm0, %v832_v20, 0.0  ;;  %v5042_v34 = vld [vmem:[%s6110_s14] ss:$0 sm:$0xff] }
  0xc0   : > { %841 = vadd.xlane.f32.xlu1 %v840_v31  ;;  %844 = vadd.xlane.f32.xlu0 %v843_v38  ;;  %v809_v39 = vpop.xlane.xlu0 %808  ;;  %v812_v40 = vpop.xlane.xlu1 %811 }
  0xc1   : > { %v819_v42 = vmul.f32 0.03125, %v809_v39  ;;  %v820_v43 = vmul.f32 0.03125, %v812_v40  ;;  %v833_v46 = vmul.f32 %v4995_v35, %v4995_v35  ;;  %v834_v24 = vmul.f32 %v4998_v21, %v4998_v21 }
  0xc3   : > { %v5007_v47 = vsub.f32 %v4919_v28, %v819_v42  ;;  %v5010_v25 = vsub.f32 %v4922_v29, %v820_v43  ;;  %v849_v48 = vsel %vm655_vm0, %v833_v46, 0.0  ;;  %v852_v49 = vsel %vm655_vm0, %v834_v24, 0.0  ;;  %v4453_v29 = vld [vmem:[%s6109_s28] sm:$0xff]  }
  0xc4   : > { %847 = vadd.xlane.f32.xlu1 %v846_v41  ;;  %850 = vadd.xlane.f32.xlu0 %v849_v48  ;;  %v5049_v24 = vld [vmem:[%s6095_s15] ss:$0 sm:$0xff] }
  0xc5   : > { %v835_v50 = vmul.f32 %v5007_v47, %v5007_v47  ;;  %v836_v51 = vmul.f32 %v5010_v25, %v5010_v25  ;;  %4131 = vmatprep.subr.bf16.mxu1 %v4453_v29 }
  0xc6   : > { %4132 = vmatpush3.bf16.msra.mxu1 %v4453_v29 }
  0xc7   : > { %v855_v52 = vsel %vm655_vm0, %v835_v50, 0.0  ;;  %v858_v28 = vsel %vm655_vm0, %v836_v51, 0.0  ;;  %4133 = vmatprep.subr.bf16.mxu1 %v4454_v53 }
  0xc8   : > { %853 = vadd.xlane.f32.xlu1 %v852_v49  ;;  %856 = vadd.xlane.f32.xlu0 %v855_v52 }
  0xca   : > { %4134 = vmatpush3.bf16.msra.mxu1 %v4454_v53 }
  0xcb   : > { %4143 = vmatprep.subr.bf16.mxu1 %v5029_v56 }
  0xcc   : > { %859 = vadd.xlane.f32.xlu1 %v858_v28 }
 0x139   : > { %v707_v59 = vpop.xlane.xlu0 %706 }
 0x13a   : > { %v729_v60 = vmul.f32 0.03125, %v707_v59 }
 0x13c   : > { %v737_v61 = vadd.f32 1e-05, %v729_v60 }
 0x13d   : > { %v710_v62 = vpop.xlane.xlu1 %709  ;;  %v713_v63 = vpop.xlane.xlu0 %712 }
 0x13e   : > { %4479 = vrsqrt.f32 %v737_v61  ;;  %v730_v2 = vmul.f32 0.03125, %v710_v62  ;;  %v731_v3 = vmul.f32 0.03125, %v713_v63 }
 0x140   : > { %v738_v4 = vadd.f32 1e-05, %v730_v2  ;;  %v739_v5 = vadd.f32 1e-05, %v731_v3 }
 0x141   : > { %v716_v6 = vpop.xlane.xlu1 %715  ;;  %v719_v7 = vpop.xlane.xlu0 %718 }
 0x142   : > { %4481 = vrsqrt.f32 %v738_v4  ;;  %v732_v10 = vmul.f32 0.03125, %v716_v6  ;;  %v733_v8 = vmul.f32 0.03125, %v719_v7 }
 0x143   : > { %4483 = vrsqrt.f32 %v739_v5 }
 0x144   : > { %v740_v14 = vadd.f32 1e-05, %v732_v10  ;;  %v741_v15 = vadd.f32 1e-05, %v733_v8 }
 0x145   : > { %v722_v16 = vpop.xlane.xlu1 %721  ;;  %v725_v17 = vpop.xlane.xlu0 %724 }
 0x146   : > { %4485 = vrsqrt.f32 %v740_v14  ;;  %v734_v18 = vmul.f32 0.03125, %v722_v16  ;;  %v735_v19 = vmul.f32 0.03125, %v725_v17 }
 0x147   : > { %4487 = vrsqrt.f32 %v741_v15 }
 0x148   : > { %v4480_v22 = vpop.eup %4479  ;;  %v742_v12 = vadd.f32 1e-05, %v734_v18  ;;  %v743_v26 = vadd.f32 1e-05, %v735_v19 }
 0x149   : > { %v728_v27 = vpop.xlane.xlu1 %727  ;;  %v839_v30 = vpop.xlane.xlu0 %838  ;;  %v753_v31 = vmul.f32 %v4480_v22, %v4928_v36  ;;  %v4456_v22 = vld [vmem:[%s6084_s4 + $0x8] sm:$0xff]  }
 0x14a   : > { %4489 = vrsqrt.f32 %v742_v12  ;;  %v736_v32 = vmul.f32 0.03125, %v728_v27  ;;  %v861_v33 = vmul.f32 0.03125, %v839_v30 }
 0x14b   : > { %4491 = vrsqrt.f32 %v743_v26  ;;  %v767_v46 = vmul.f32 %v5042_v34, %v753_v31 }
 0x14c   : > { %v4482_v20 = vpop.eup %4481  ;;  %v744_v38 = vadd.f32 1e-05, %v736_v32  ;;  %v869_v39 = vadd.f32 1e-05, %v861_v33 }
 0x14d   : > { %v4484_v40 = vpop.eup %4483  ;;  %v842_v41 = vpop.xlane.xlu1 %841  ;;  %v754_v43 = vmul.f32 %v4482_v20, %v4936_v44  ;;  %v781_v57 = vadd.f32 %v5049_v24, %v767_v46 }
 0x14e   : > { %v845_v42 = vpop.xlane.xlu0 %844  ;;  %4493 = vrsqrt.f32 %v744_v38  ;;  %v862_v36 = vmul.f32 0.03125, %v842_v41  ;;  %v755_v49 = vmul.f32 %v4484_v40, %v4930_v37 }
 0x14f   : > { %v863_v48 = vmul.f32 0.03125, %v845_v42  ;;  %4495 = vrsqrt.f32 %v869_v39  ;;  %v768_v50 = vmul.f32 %v5042_v34, %v754_v43 }
 0x150   : > { %v4486_v51 = vpop.eup %4485  ;;  %v870_v52 = vadd.f32 1e-05, %v862_v36  ;;  %v769_v60 = vmul.f32 %v5042_v34, %v755_v49 }
 0x151   : > { %v871_v28 = vadd.f32 1e-05, %v863_v48  ;;  %v4488_v29 = vpop.eup %4487  ;;  %v848_v44 = vpop.xlane.xlu1 %847  ;;  %v782_v58 = vadd.f32 %v5049_v24, %v768_v50  ;;  %v756_v59 = vmul.f32 %v4486_v51, %v4938_v45 }
 0x152   : > { %v851_v53 = vpop.xlane.xlu0 %850  ;;  %4497 = vrsqrt.f32 %v870_v52  ;;  %v864_v61 = vmul.f32 0.03125, %v848_v44  ;;  %v757_v2 = vmul.f32 %v4488_v29, %v4947_v54  ;;  %v783_v45 = vadd.f32 %v5049_v24, %v769_v60 }
 0x153   : > { %v865_v37 = vmul.f32 0.03125, %v851_v53  ;;  %4499 = vrsqrt.f32 %v871_v28  ;;  %v909_v62 = vpack.c.bf16 %v782_v58, %v781_v57  ;;  %v770_v63 = vmul.f32 %v5042_v34, %v756_v59 }
 0x154   : > { %v4490_v3 = vpop.eup %4489  ;;  %v872_v4 = vadd.f32 1e-05, %v864_v61  ;;  %v771_v15 = vmul.f32 %v5042_v34, %v757_v2 }
 0x155   : > { %v873_v5 = vadd.f32 1e-05, %v865_v37  ;;  %v4492_v6 = vpop.eup %4491  ;;  %v854_v7 = vpop.xlane.xlu1 %853  ;;  %4135 = vmatprep.mubr.msk.bf16.mxu1 %vm655_vm0, %v909_v62  ;;  %v784_v8 = vadd.f32 %v5049_v24, %v770_v63  ;;  %v758_v14 = vmul.f32 %v4490_v3, %v4950_v55 }
 0x156   : > { %v857_v10 = vpop.xlane.xlu0 %856  ;;  %4501 = vrsqrt.f32 %v872_v4  ;;  %v866_v16 = vmul.f32 0.03125, %v854_v7  ;;  %v759_v54 = vmul.f32 %v4492_v6, %v4959_v0  ;;  %v785_v31 = vadd.f32 %v5049_v24, %v771_v15 }
 0x157   : > { %v867_v17 = vmul.f32 0.03125, %v857_v10  ;;  %4503 = vrsqrt.f32 %v873_v5  ;;  %v910_v18 = vpack.c.bf16 %v784_v8, %v783_v45  ;;  %v772_v19 = vmul.f32 %v5042_v34, %v758_v14  ;;  %v5136_v45 = vld [vmem:[%s6111_s24 + $0x18] sm:$0xff]  ;;  %v5141_v8 = vld [vmem:[%s6111_s24] sm:$0xff]  ;;  %v5146_v14 = vld [vmem:[%s6111_s24 + $0x8] sm:$0xff] }
 0x158   : > { %v4494_v12 = vpop.eup %4493  ;;  %v874_v26 = vadd.f32 1e-05, %v866_v16  ;;  %v773_v33 = vmul.f32 %v5042_v34, %v759_v54 }
 0x159   : > { %v875_v27 = vadd.f32 1e-05, %v867_v17  ;;  %v4496_v30 = vpop.eup %4495  ;;  %v860_v55 = vpop.xlane.xlu1 %859  ;;  %4136 = vmatmul.mubr.msk.bf16.vlgmr.msra.gmra.mrb[0].mxu1 %vm655_vm0, %v910_v18  ;;  %v786_v32 = vadd.f32 %v5049_v24, %v772_v19  ;;  %v760_v0 = vmul.f32 %v4494_v12, %v4962_v1 }
 0x15a   : > { %4505 = vrsqrt.f32 %v874_v26  ;;  %v868_v20 = vmul.f32 0.03125, %v860_v55  ;;  %4144 = vmatpush3.bf16.msra.mxu1 %v5029_v56  ;;  %v885_v38 = vmul.f32 %v4496_v30, %v4971_v11  ;;  %v787_v1 = vadd.f32 %v5049_v24, %v773_v33  ;;  %v5159_v26 = vld [vmem:[%s6111_s24 + $0x30] sm:$0xff]  ;;  %v5166_v30 = vld [vmem:[%s6111_s24 + $0x38] sm:$0xff] }
 0x15b   : > { %4507 = vrsqrt.f32 %v875_v27  ;;  %v911_v39 = vpack.c.bf16 %v786_v32, %v785_v31  ;;  %v774_v40 = vmul.f32 %v5042_v34, %v760_v0  ;;  %4145 = vmatprep.subr.bf16.mxu1 %v4456_v22  ;;  %v5171_v31 = vld [vmem:[%s6111_s24 + $0x20] sm:$0xff]  ;;  %v5176_v32 = vld [vmem:[%s6111_s24 + $0x28] sm:$0xff] }
 0x15c   : > { %v4498_v41 = vpop.eup %4497  ;;  %v876_v42 = vadd.f32 1e-05, %v868_v20  ;;  %v893_v56 = vmul.f32 %v5042_v34, %v885_v38 }
 0x15d   : > { %v4500_v43 = vpop.eup %4499  ;;  %4139 = vmatprep.mubr.msk.bf16.mxu1 %vm655_vm0, %v911_v39  ;;  %v788_v46 = vadd.f32 %v5049_v24, %v774_v40  ;;  %v886_v36 = vmul.f32 %v4498_v41, %v4974_v9 }
 0x15e   : > { %v887_v11 = vmul.f32 %v4500_v43, %v4983_v23  ;;  %4509 = vrsqrt.f32 %v876_v42  ;;  %4146 = vmatpush3.bf16.msra.mxu1 %v4456_v22  ;;  %v901_v29 = vadd.f32 %v5049_v24, %v893_v56  ;;  %v1024_v43 = vld [vmem:[%s6085_s5 + $0x10] sm:$0xff]  ;;  %v1025_v56 = vld [vmem:[%s6085_s5 + $0x18] sm:$0xff] }
 0x15f   : > { %v912_v48 = vpack.c.bf16 %v788_v46, %v787_v1  ;;  %v894_v49 = vmul.f32 %v5042_v34, %v886_v36  ;;  %v3883_v36 = vld [vmem:[%s6087_s7] ss:$0 sm:$0xff] }
 0x160   : > { %v4502_v50 = vpop.eup %4501  ;;  %v895_v52 = vmul.f32 %v5042_v34, %v887_v11 }
 0x161   : > { %v4504_v51 = vpop.eup %4503  ;;  %v888_v28 = vmul.f32 %v4502_v50, %v4986_v13  ;;  %4140 = vmatmul.mubr.msk.bf16.gmra.mrb[4].mxu1 %vm655_vm0, %v912_v48  ;;  %v902_v9 = vadd.f32 %v5049_v24, %v894_v49  ;;  %v1022_v48 = vld [vmem:[%s6085_s5] sm:$0xff]  ;;  %v1023_v50 = vld [vmem:[%s6085_s5 + $0x8] sm:$0xff] }
 0x162   : > { %v889_v44 = vmul.f32 %v4504_v51, %v4995_v35  ;;  %v903_v60 = vadd.f32 %v5049_v24, %v895_v52 }
 0x163   : > { %v896_v23 = vmul.f32 %v5042_v34, %v888_v28  ;;  %v5091_v53 = vpack.c.bf16 %v902_v9, %v901_v29 }
 0x164   : > { %v4506_v57 = vpop.eup %4505  ;;  %v897_v58 = vmul.f32 %v5042_v34, %v889_v44 }
 0x165   : > { %v4508_v59 = vpop.eup %4507  ;;  %v904_v13 = vadd.f32 %v5049_v24, %v896_v23  ;;  %4147 = vmatprep.mubr.msk.bf16.mxu1 %vm655_vm0, %v5091_v53  ;;  %4159 = vmatprep.mubr.msk.bf16.mxu0 %vm655_vm0, %v5091_v53  ;;  %v890_v35 = vmul.f32 %v4506_v57, %v4998_v21 }
 0x166   : > { %v891_v61 = vmul.f32 %v4508_v59, %v5007_v47  ;;  %v905_v2 = vadd.f32 %v5049_v24, %v897_v58 }
 0x167   : > { %v5102_v37 = vpack.c.bf16 %v904_v13, %v903_v60  ;;  %v898_v62 = vmul.f32 %v5042_v34, %v890_v35 }
 0x168   : > { %v4510_v63 = vpop.eup %4509  ;;  %v899_v21 = vmul.f32 %v5042_v34, %v891_v61 }
 0x169   : > { %4148 = vmatmul.mubr.msk.bf16.vlgmr.msra.gmra.mrb[8].mxu1 %vm655_vm0, %v5102_v37  ;;  %4160 = vmatmul.mubr.msk.bf16.vlgmr.msra.gmra.mrb[0].mxu0 %vm655_vm0, %v5102_v37  ;;  %v906_v3 = vadd.f32 %v5049_v24, %v898_v62  ;;  %v892_v4 = vmul.f32 %v4510_v63, %v5010_v25  ;;  %v5131_v25 = vld [vmem:[%s6111_s24 + $0x10] sm:$0xff] }
 0x16a   : > { %v907_v6 = vadd.f32 %v5049_v24, %v899_v21 }
 0x16b   : > { %v5113_v47 = vpack.c.bf16 %v906_v3, %v905_v2  ;;  %v900_v5 = vmul.f32 %v5042_v34, %v892_v4  ;;  %v1028_v2 = vld [vmem:[%s6085_s5 + $0x30] sm:$0xff] }
 0x16d   : > { %4151 = vmatprep.mubr.msk.bf16.mxu1 %vm655_vm0, %v5113_v47  ;;  %4163 = vmatprep.mubr.msk.bf16.mxu0 %vm655_vm0, %v5113_v47  ;;  %v908_v7 = vadd.f32 %v5049_v24, %v900_v5  ;;  %v1029_v5 = vld [vmem:[%s6085_s5 + $0x38] sm:$0xff] }
 0x16f   : > { %v5122_v10 = vpack.c.bf16 %v908_v7, %v907_v6  ;;  %v1026_v7 = vld [vmem:[%s6085_s5 + $0x20] sm:$0xff] }
 0x171   : > { %4152 = vmatmul.mubr.msk.bf16.gmra.mrb[12].mxu1 %vm655_vm0, %v5122_v10  ;;  %4164 = vmatmul.mubr.msk.bf16.gmra.mrb[4].mxu0 %vm655_vm0, %v5122_v10 }
 0x22c   : > { %v4137_v34 = vpop.f32.mrb[0].mxu1 }
 0x22d   : > { %v987_v24 = vpop.f32.mrb[1].mxu1  ;;  %v996_v16 = vadd.f32 %v4137_v34, %v5131_v25 }
 0x22e   : > { %v4138_v15 = vpop.f32.mrb[2].mxu1  ;;  %v988_v18 = vadd.f32 %v987_v24, %v5141_v8  ;;  %v1027_v24 = vld [vmem:[%s6085_s5 + $0x28] sm:$0xff] }
 0x22f   : > { %v999_v17 = vadd.f32 %v4138_v15, %v5136_v45  ;;  %v990_v54 = vpop.f32.mrb[3].mxu1 }
 0x230   : > { %v991_v19 = vadd.f32 %v990_v54, %v5146_v14 }
 0x231   : > { %v5152_v22 = vpack.c.bf16 %v999_v17, %v996_v16 }
 0x232   : > { %v5154_v12 = vpack.c.bf16 %v991_v19, %v988_v18 }
 0x234   : > { %v4141_v27 = vpop.f32.mrb[4].mxu1  ;;  %4175 = vmatprep.mubr.msk.bf16.mxu1 %vm1219_vm1, %v5154_v12 }
 0x235   : > { %v1003_v55 = vpop.f32.mrb[5].mxu1  ;;  %v1012_v33 = vadd.f32 %v4141_v27, %v5159_v26 }
 0x236   : > { %v4142_v0 = vpop.f32.mrb[6].mxu1  ;;  %v1004_v39 = vadd.f32 %v1003_v55, %v5171_v31 }
 0x237   : > { %v1015_v20 = vadd.f32 %v4142_v0, %v5166_v30  ;;  %v1006_v38 = vpop.f32.mrb[7].mxu1 }
 0x238   : > { %v1007_v40 = vadd.f32 %v1006_v38, %v5176_v32 }
 0x239   : > { %v5182_v41 = vpack.c.bf16 %v1015_v20, %v1012_v33 }
 0x23a   : > { %v5184_v42 = vpack.c.bf16 %v1007_v40, %v1004_v39 }
 0x23c   : > { %v4149_v1 = vpop.f32.mrb[8].mxu1  ;;  %v4161_v46 = vpop.f32.mrb[0].mxu0 }
 0x23d   : > { %v1088_v11 = vpop.f32.mrb[9].mxu1  ;;  %v1176_v49 = vpop.f32.mrb[1].mxu0  ;;  %v1097_v28 = vadd.f32 %v4149_v1, %v1024_v43  ;;  %v1185_v29 = vadd.f32 %v4161_v46, %v3883_v36 }
 0x23e   : > { %v4150_v51 = vpop.f32.mrb[10].mxu1  ;;  %v4162_v52 = vpop.f32.mrb[2].mxu0  ;;  %v1089_v58 = vadd.f32 %v1088_v11, %v1022_v48  ;;  %v1177_v59 = vadd.f32 %v3883_v36, %v1176_v49 }
 0x23f   : > { %v1100_v9 = vadd.f32 %v4150_v51, %v1025_v56  ;;  %v1188_v44 = vadd.f32 %v4162_v52, %v3883_v36  ;;  %v1091_v23 = vpop.f32.mrb[11].mxu1  ;;  %v1179_v57 = vpop.f32.mrb[3].mxu0 }
 0x240   : > { %v1092_v60 = vadd.f32 %v1091_v23, %v1023_v50  ;;  %v1180_v13 = vadd.f32 %v3883_v36, %v1179_v57 }
 0x241   : > { %v5201_v35 = vpack.c.bf16 %v1100_v9, %v1097_v28  ;;  %v5203_v61 = vpack.c.bf16 %v1188_v44, %v1185_v29 }
 0x242   : > { %v5205_v62 = vpack.c.bf16 %v1092_v60, %v1089_v58  ;;  %v5207_v63 = vpack.c.bf16 %v1180_v13, %v1177_v59 }
 0x243   : > { %v1236_v46 = vsel %vm1219_vm1, %v5201_v35, 0 }
 0x244   : > { %v4153_v3 = vpop.f32.mrb[12].mxu1  ;;  %v4165_v4 = vpop.f32.mrb[4].mxu0  ;;  %4427 = vmatprep.subr.msk.bf16.mxu1 %vm1219_vm1, %v5205_v62  ;;  %4183 = vmatprep.subr.bf16.mxu0 %v5207_v63  ;;  %v1233_v21 = vsel %vm1219_vm1, %v5205_v62, 0 }
 0x245   : > { %v1104_v6 = vpop.f32.mrb[13].mxu1  ;;  %v1192_v34 = vpop.f32.mrb[5].mxu0  ;;  %4168 = vmatpush3.bf16.xpose.msra.mxu1 %v1233_v21  ;;  %4184 = vmatpush3.bf16.msra.mxu0 %v5207_v63  ;;  %v1113_v17 = vadd.f32 %v4153_v3, %v1028_v2  ;;  %v1201_v54 = vadd.f32 %v4165_v4, %v3883_v36 }
 0x246   : > { %v4154_v15 = vpop.f32.mrb[14].mxu1  ;;  %v4166_v16 = vpop.f32.mrb[6].mxu0  ;;  %4428 = vmatprep.subr.msk.bf16.mxu1 %vm1219_vm1, %v5201_v35  ;;  %4185 = vmatprep.subr.bf16.mxu0 %v5203_v61  ;;  %v1105_v0 = vadd.f32 %v1104_v6, %v1026_v7  ;;  %v1193_v33 = vadd.f32 %v3883_v36, %v1192_v34 }
 0x247   : > { %v1116_v18 = vadd.f32 %v4154_v15, %v1029_v5  ;;  %v1204_v19 = vadd.f32 %v4166_v16, %v3883_v36  ;;  %v1107_v27 = vpop.f32.mrb[15].mxu1  ;;  %v1195_v55 = vpop.f32.mrb[7].mxu0 }
 0x248   : > { %v1108_v20 = vadd.f32 %v1107_v27, %v1027_v24  ;;  %v1196_v38 = vadd.f32 %v3883_v36, %v1195_v55 }
 0x249   : > { %v5230_v39 = vpack.c.bf16 %v1116_v18, %v1113_v17  ;;  %v5232_v40 = vpack.c.bf16 %v1204_v19, %v1201_v54  ;;  %4186 = vmatpush3.bf16.msra.mxu0 %v5203_v61 }
 0x24a   : > { %v5235_v43 = vpack.c.bf16 %v1108_v20, %v1105_v0  ;;  %v5237_v1 = vpack.c.bf16 %v1196_v38, %v1193_v33 }
 0x24b   : > { %v1242_v56 = vsel %vm1219_vm1, %v5230_v39, 0 }
 0x24c   : > { %4187 = vmatprep.subr.bf16.mxu0 %v5237_v1  ;;  %v1239_v36 = vsel %vm1219_vm1, %v5235_v43, 0 }
 0x24d   : > { %4170 = vmatpush3.bf16.xpose.msra.mxu1 %v1236_v46  ;;  %4188 = vmatpush3.bf16.msra.mxu0 %v5237_v1 }
 0x24e   : > { %4429 = vmatprep.subr.msk.bf16.mxu1 %vm1219_vm1, %v5235_v43  ;;  %4189 = vmatprep.subr.bf16.mxu0 %v5232_v40 }
 0x251   : > { %4190 = vmatpush3.bf16.msra.mxu0 %v5232_v40 }
 0x255   : > { %4172 = vmatpush3.bf16.xpose.msra.mxu1 %v1239_v36 }
 0x256   : > { %4430 = vmatprep.subr.msk.bf16.mxu1 %vm1219_vm1, %v5230_v39 }
 0x25d   : > { %4174 = vmatpush3.bf16.xpose.msra.mxu1 %v1242_v56 }
 0x264   : > { %4176 = vmatmul.mubr.msk.bf16.vlgmr.msra.gmra.mrb[16].mxu1 %vm1219_vm1, %v5152_v22 }
 0x265   : > { %4179 = vmatprep.mubr.msk.bf16.mxu1 %vm1219_vm1, %v5184_v42 }
 0x26c   : > { %4180 = vmatmul.mubr.msk.bf16.gmra.mrb[20].mxu1 %vm1219_vm1, %v5182_v41 }
 0x337   : > { %v4177_v11 = vpop.f32.mrb[16].mxu1 }
 0x338   : > { %v1278_v48 = vpop.f32.mrb[17].mxu1  ;;  %v1316_v28 = vsel %vm1309_vm2, %v4177_v11, -inf }
 0x339   : > { %v4178_v49 = vpop.f32.mrb[18].mxu1  ;;  %v1310_v50 = vsel %vm1309_vm2, %v1278_v48, -inf }
 0x33a   : > { %1311 = vmax.xlane.f32.xlu0 %v1310_v50  ;;  %v1281_v51 = vpop.f32.mrb[19].mxu1  ;;  %v1319_v9 = vsel %vm1309_vm2, %v4178_v49, -inf }
 0x33b   : > { %v1313_v52 = vsel %vm1309_vm2, %v1281_v51, -inf }
 0x33c   : > { %1314 = vmax.xlane.f32.xlu1 %v1313_v52 }
 0x33e   : > { %1317 = vmax.xlane.f32.xlu0 %v1316_v28 }
 0x33f   : > { %v4181_v29 = vpop.f32.mrb[20].mxu1 }
 0x340   : > { %1320 = vmax.xlane.f32.xlu1 %v1319_v9  ;;  %v1294_v44 = vpop.f32.mrb[21].mxu1  ;;  %v1328_v60 = vsel %vm1309_vm2, %v4181_v29, -inf }
 0x341   : > { %v4182_v23 = vpop.f32.mrb[22].mxu1  ;;  %v1322_v57 = vsel %vm1309_vm2, %v1294_v44, -inf }
 0x342   : > { %1323 = vmax.xlane.f32.xlu0 %v1322_v57  ;;  %v1297_v58 = vpop.f32.mrb[23].mxu1  ;;  %v1331_v13 = vsel %vm1309_vm2, %v4182_v23, -inf }
 0x343   : > { %v1325_v59 = vsel %vm1309_vm2, %v1297_v58, -inf }
 0x344   : > { %1326 = vmax.xlane.f32.xlu1 %v1325_v59 }
 0x346   : > { %1329 = vmax.xlane.f32.xlu0 %v1328_v60 }
 0x348   : > { %1332 = vmax.xlane.f32.xlu1 %v1331_v13 }
 0x3c7   : > { %v1312_v2 = vpop.xlane.xlu0 %1311 }
 0x3c8   : > { %v1334_v3 = vsub.f32 %v1278_v48, %v1312_v2 }
 0x3c9   : > { %v1315_v4 = vpop.xlane.xlu1 %1314 }
 0x3ca   : > { %v1335_v5 = vsub.f32 %v1281_v51, %v1315_v4  ;;  %v1342_v7 = vmul.f32 1.442695, %v1334_v3 }
 0x3cb   : > { %v1318_v21 = vpop.xlane.xlu0 %1317 }
 0x3cc   : > { %v1336_v6 = vsub.f32 %v4177_v11, %v1318_v21  ;;  %v1344_v17 = vmul.f32 1.442695, %v1335_v5 }
 0x3cd   : > { %v1321_v34 = vpop.xlane.xlu1 %1320 }
 0x3ce   : > { %v1346_v24 = vmul.f32 1.442695, %v1336_v6  ;;  %v1337_v15 = vsub.f32 %v4178_v49, %v1321_v34 }
 0x3cf   : > { %v1324_v16 = vpop.xlane.xlu0 %1323 }
 0x3d0   : > { %4511 = vpow2.f32 %v1346_v24  ;;  %v1348_v54 = vmul.f32 1.442695, %v1337_v15  ;;  %v1338_v18 = vsub.f32 %v1294_v44, %v1324_v16 }
 0x3d1   : > { %4513 = vpow2.f32 %v1342_v7  ;;  %v1327_v28 = vpop.xlane.xlu1 %1326 }
 0x3d2   : > { %4515 = vpow2.f32 %v1348_v54  ;;  %v1350_v55 = vmul.f32 1.442695, %v1338_v18  ;;  %v1339_v44 = vsub.f32 %v1297_v58, %v1327_v28 }
 0x3d3   : > { %v1330_v19 = vpop.xlane.xlu0 %1329  ;;  %4517 = vpow2.f32 %v1344_v17 }
 0x3d4   : > { %v1340_v27 = vsub.f32 %v4181_v29, %v1330_v19  ;;  %v1352_v59 = vmul.f32 1.442695, %v1339_v44 }
 0x3d5   : > { %v1333_v29 = vpop.xlane.xlu1 %1332 }
 0x3d6   : > { %v1354_v0 = vmul.f32 1.442695, %v1340_v27  ;;  %v1341_v9 = vsub.f32 %v4182_v23, %v1333_v29 }
 0x3d8   : > { %4519 = vpow2.f32 %v1354_v0  ;;  %v1356_v57 = vmul.f32 1.442695, %v1341_v9  ;;  %v4460_v9 = vld [vmem:[%s6109_s28 + $0x8] sm:$0xff]  }
 0x3d9   : > { %4521 = vpow2.f32 %v1350_v55  ;;  %v4459_v55 = vld [vmem:[%s6109_s28] sm:$0xff]  }
 0x3da   : > { %v4512_v33 = vpop.eup %4511  ;;  %4523 = vpow2.f32 %v1356_v57 }
 0x3db   : > { %v4514_v20 = vpop.eup %4513  ;;  %v1364_v38 = vsel %vm1309_vm2, %v4512_v33, 0.0  ;;  %4525 = vpow2.f32 %v1352_v59 }
 0x3dc   : > { %v4516_v46 = vpop.eup %4515  ;;  %1365 = vadd.xlane.f32.xlu0 %v1364_v38  ;;  %v1358_v11 = vsel %vm1309_vm2, %v4514_v20, 0.0 }
 0x3dd   : > { %v1367_v36 = vsel %vm1309_vm2, %v4516_v46, 0.0  ;;  %v4518_v56 = vpop.eup %4517 }
 0x3de   : > { %1368 = vadd.xlane.f32.xlu1 %v1367_v36  ;;  %v1361_v48 = vsel %vm1309_vm2, %v4518_v56, 0.0 }
 0x3e0   : > { %1359 = vadd.xlane.f32.xlu0 %v1358_v11 }
 0x3e2   : > { %v5271_v49 = vpop.eup %4519  ;;  %1362 = vadd.xlane.f32.xlu1 %v1361_v48 }
 0x3e3   : > { %v1376_v50 = vsel %vm1309_vm2, %v5271_v49, 0.0  ;;  %v5275_v51 = vpop.eup %4521 }
 0x3e4   : > { %1377 = vadd.xlane.f32.xlu0 %v1376_v50  ;;  %v1370_v52 = vsel %vm1309_vm2, %v5275_v51, 0.0 }
 0x3e8   : > { %1371 = vadd.xlane.f32.xlu0 %v1370_v52 }
 0x3f3   : > { %1513 = vrot.lane.b32.xlu1 %v5201_v35, %s4736_s29  ;;  %v4524_v35 = vpop.eup %4523 }
 0x3f4   : > { %v4526_v60 = vpop.eup %4525 }
 0x3f7   : > { %1515 = vrot.lane.b32.xlu1 %v5235_v43, %s4736_s29  ;;  %v1379_v43 = vsel %vm1309_vm2, %v4524_v35, 0.0 }
 0x3fe   : > { %1511 = vrot.lane.b32.xlu0 %v5205_v62, %s4736_s29  ;;  %v1373_v62 = vsel %vm1309_vm2, %v4526_v60, 0.0 }
 0x402   : > { %1499 = vrot.lane.b32.xlu0 %v5154_v12, %s4736_s29 }
 0x406   : > { %1503 = vrot.lane.b32.xlu0 %v5184_v42, %s4736_s29 }
 0x41b   : > { %1380 = vadd.xlane.f32.xlu1 %v1379_v43 }
 0x41f   : > { %1374 = vadd.xlane.f32.xlu1 %v1373_v62 }
 0x430   : > { %1517 = vrot.lane.b32.xlu1 %v5230_v39, %s4736_s29 }
 0x434   : > { %1501 = vrot.lane.b32.xlu1 %v5152_v22, %s4736_s29 }
 0x438   : > { %1505 = vrot.lane.b32.xlu1 %v5182_v41, %s4736_s29 }
 0x469   : > { %v1366_v12 = vpop.xlane.xlu0 %1365 }
 0x46b   : > { %v1369_v42 = vpop.xlane.xlu1 %1368 }
 0x46c   : > { %4527 = vrcp.f32 %v1369_v42 }
 0x46d   : > { %v1360_v23 = vpop.xlane.xlu0 %1359 }
 0x46e   : > { %4529 = vrcp.f32 %v1360_v23 }
 0x46f   : > { %4531 = vrcp.f32 %v1366_v12  ;;  %v1363_v58 = vpop.xlane.xlu1 %1362 }
 0x470   : > { %4533 = vrcp.f32 %v1363_v58 }
 0x471   : > { %v1378_v13 = vpop.xlane.xlu0 %1377 }
 0x473   : > { %v1514_v16 = vpop.permute.xlu1 %1513 }
 0x474   : > { %v1535_v17 = vsel %vm1219_vm1, %v1514_v16, 0 }
 0x475   : > { %v1372_v2 = vpop.xlane.xlu0 %1371 }
 0x476   : > { %v4528_v3 = vpop.eup %4527 }
 0x477   : > { %v1401_v6 = vmul.f32 %v4528_v3, %v4516_v46  ;;  %v1516_v54 = vpop.permute.xlu1 %1515 }
 0x478   : > { %v4530_v4 = vpop.eup %4529  ;;  %v1538_v18 = vsel %vm1219_vm1, %v1516_v54, 0 }
 0x479   : > { %v4532_v21 = vpop.eup %4531  ;;  %v1512_v39 = vpop.permute.xlu0 %1511  ;;  %v1398_v22 = vmul.f32 %v4530_v4, %v4514_v20 }
 0x47a   : > { %v4534_v5 = vpop.eup %4533  ;;  %4431 = vmatprep.subr.msk.bf16.mxu0 %vm1219_vm1, %v1512_v39  ;;  %v1400_v7 = vmul.f32 %v4532_v21, %v4512_v33  ;;  %v1532_v15 = vsel %vm1219_vm1, %v1512_v39, 0 }
 0x47b   : > { %v1399_v41 = vmul.f32 %v4534_v5, %v4518_v56 }
 0x47c   : > { %v1407_v24 = vpack.c.bf16 %v1401_v6, %v1400_v7 }
 0x47d   : > { %v1406_v34 = vpack.c.bf16 %v1399_v41, %v1398_v22  ;;  %v1500_v29 = vpop.permute.xlu0 %1499 }
 0x47f   : > { %4191 = vmatprep.mubr.msk.bf16.mxu0 %vm1309_vm2, %v1406_v34 }
 0x480   : > { %4192 = vmatmul.mubr.msk.bf16.vlgmr.msra.gmra.mrb[8].mxu0 %vm1309_vm2, %v1407_v24 }
 0x481   : > { %4200 = vmatpush3.bf16.xpose.msra.mxu0 %v1532_v15  ;;  %v1504_v57 = vpop.permute.xlu0 %1503 }
 0x482   : > { %4432 = vmatprep.subr.msk.bf16.mxu0 %vm1219_vm1, %v1514_v16 }
 0x489   : > { %4202 = vmatpush3.bf16.xpose.msra.mxu0 %v1535_v17 }
 0x48a   : > { %4433 = vmatprep.subr.msk.bf16.mxu0 %vm1219_vm1, %v1516_v54 }
 0x491   : > { %4204 = vmatpush3.bf16.xpose.msra.mxu0 %v1538_v18 }
 0x4a8   : > { %v1381_v19 = vpop.xlane.xlu1 %1380 }
 0x4a9   : > { %4535 = vrcp.f32 %v1381_v19 }
 0x4aa   : > { %4537 = vrcp.f32 %v1372_v2 }
 0x4ab   : > { %4539 = vrcp.f32 %v1378_v13 }
 0x4ac   : > { %v1375_v27 = vpop.xlane.xlu1 %1374 }
 0x4ad   : > { %4541 = vrcp.f32 %v1375_v27 }
 0x4b0   : > { %v1518_v0 = vpop.permute.xlu1 %1517 }
 0x4b1   : > { %4434 = vmatprep.subr.msk.bf16.mxu0 %vm1219_vm1, %v1518_v0  ;;  %v1541_v33 = vsel %vm1219_vm1, %v1518_v0, 0 }
 0x4b2   : > { %4206 = vmatpush3.bf16.xpose.msra.mxu0 %v1541_v33 }
 0x4b3   : > { %4243 = vmatprep.subr.bf16.mxu0 %v4459_v55  ;;  %v4536_v20 = vpop.eup %4535 }
 0x4b4   : > { %v4538_v38 = vpop.eup %4537  ;;  %v1405_v56 = vmul.f32 %v4536_v20, %v4524_v35  ;;  %v1502_v44 = vpop.permute.xlu1 %1501 }
 0x4b5   : > { %v4540_v46 = vpop.eup %4539  ;;  %v1402_v11 = vmul.f32 %v4538_v38, %v5275_v51 }
 0x4b6   : > { %v1404_v50 = vmul.f32 %v4540_v46, %v5271_v49 }
 0x4b7   : > { %v4542_v36 = vpop.eup %4541 }
 0x4b8   : > { %v1403_v48 = vmul.f32 %v4542_v36, %v4526_v60  ;;  %v1409_v28 = vpack.c.bf16 %v1405_v56, %v1404_v50  ;;  %v1506_v49 = vpop.permute.xlu1 %1505 }
 0x4ba   : > { %v1408_v52 = vpack.c.bf16 %v1403_v48, %v1402_v11 }
 0x4bc   : > { %4195 = vmatprep.mubr.msk.bf16.mxu0 %vm1309_vm2, %v1408_v52 }
 0x4bd   : > { %4196 = vmatmul.mubr.msk.bf16.gmra.mrb[12].mxu0 %vm1309_vm2, %v1409_v28 }
 0x4be   : > { %4207 = vmatprep.mubr.msk.bf16.mxu0 %vm1219_vm1, %v1500_v29 }
 0x4c5   : > { %4208 = vmatmul.mubr.msk.bf16.vlgmr.msra.gmra.mrb[16].mxu0 %vm1219_vm1, %v1502_v44 }
 0x4c6   : > { %4211 = vmatprep.mubr.msk.bf16.mxu0 %vm1219_vm1, %v1504_v57  ;;  %4244 = vmatpush3.bf16.msra.mxu0 %v4459_v55 }
 0x4c7   : > { %4245 = vmatprep.subr.bf16.mxu0 %v4460_v9 }
 0x4ca   : > { %4246 = vmatpush3.bf16.msra.mxu0 %v4460_v9 }
 0x4cd   : > { %4212 = vmatmul.mubr.msk.bf16.gmra.mrb[20].mxu0 %vm1219_vm1, %v1506_v49 }
 0x4ce   : > { %4247 = vmatprep.mubr.msk.bf16.mxu0 %vm655_vm0, %v5091_v53 }
 0x4d5   : > { %4248 = vmatmul.mubr.msk.bf16.vlgmr.msra.gmra.mrb[24].mxu0 %vm655_vm0, %v5102_v37 }
 0x4d6   : > { %4251 = vmatprep.mubr.msk.bf16.mxu0 %vm655_vm0, %v5113_v47 }
 0x4dd   : > { %4252 = vmatmul.mubr.msk.bf16.gmra.mrb[28].mxu0 %vm655_vm0, %v5122_v10 }
 0x553   : > { %v4193_v51 = vpop.f32.mrb[8].mxu0 }
 0x554   : > { %1489 = vst.msk [vmem:[#allocation2 + $0x10] sm:$0xff] %vm1219_vm1, %v4193_v51  ;;  %v1456_v59 = vpop.f32.mrb[9].mxu0 }
 0x555   : > { %1487 = vst.msk [vmem:[#allocation2] sm:$0xff] %vm1219_vm1, %v1456_v59  ;;  %v4194_v35 = vpop.f32.mrb[10].mxu0 }
 0x556   : > { %1490 = vst.msk [vmem:[#allocation2 + $0x18] sm:$0xff] %vm1219_vm1, %v4194_v35  ;;  %v1459_v43 = vpop.f32.mrb[11].mxu0 }
 0x557   : > { %1488 = vst.msk [vmem:[#allocation2 + $0x8] sm:$0xff] %vm1219_vm1, %v1459_v43 }
 0x590   : > { %v4197_v53 = vpop.f32.mrb[12].mxu0 }
 0x591   : > { %1493 = vst.msk [vmem:[#allocation2 + $0x30] sm:$0xff] %vm1219_vm1, %v4197_v53  ;;  %v1472_v37 = vpop.f32.mrb[13].mxu0 }
 0x592   : > { %1491 = vst.msk [vmem:[#allocation2 + $0x20] sm:$0xff] %vm1219_vm1, %v1472_v37  ;;  %v4198_v47 = vpop.f32.mrb[14].mxu0 }
 0x593   : > { %1494 = vst.msk [vmem:[#allocation2 + $0x38] sm:$0xff] %vm1219_vm1, %v4198_v47  ;;  %v1475_v10 = vpop.f32.mrb[15].mxu0 }
 0x594   : > { %1492 = vst.msk [vmem:[#allocation2 + $0x28] sm:$0xff] %vm1219_vm1, %v1475_v10 }
 0x598   : > { %v4209_v60 = vpop.f32.mrb[16].mxu0 }
 0x599   : > { %v1577_v62 = vpop.f32.mrb[17].mxu0  ;;  %v1614_v13 = vsel %vm1309_vm2, %v4209_v60, -inf }
 0x59a   : > { %v4210_v12 = vpop.f32.mrb[18].mxu0  ;;  %v1608_v42 = vsel %vm1309_vm2, %v1577_v62, -inf }
 0x59b   : > { %1609 = vmax.xlane.f32.xlu0 %v1608_v42  ;;  %v1580_v23 = vpop.f32.mrb[19].mxu0  ;;  %v1617_v21 = vsel %vm1309_vm2, %v4210_v12, -inf }
 0x59c   : > { %v1611_v58 = vsel %vm1309_vm2, %v1580_v23, -inf }
 0x59d   : > { %1612 = vmax.xlane.f32.xlu1 %v1611_v58 }
 0x59f   : > { %1615 = vmax.xlane.f32.xlu0 %v1614_v13 }
 0x5a0   : > { %v4213_v2 = vpop.f32.mrb[20].mxu0 }
 0x5a1   : > { %v1593_v3 = vpop.f32.mrb[21].mxu0  ;;  %v1626_v24 = vsel %vm1309_vm2, %v4213_v2, -inf }
 0x5a2   : > { %v5340_v4 = vpop.f32.mrb[22].mxu0  ;;  %v1620_v6 = vsel %vm1309_vm2, %v1593_v3, -inf }
 0x5a3   : > { %1618 = vmax.xlane.f32.xlu0 %v1617_v21  ;;  %v5343_v39 = vpop.f32.mrb[23].mxu0  ;;  %v1629_v41 = vsel %vm1309_vm2, %v5340_v4, -inf }
 0x5a4   : > { %v1623_v5 = vsel %vm1309_vm2, %v5343_v39, -inf }
 0x5a5   : > { %1624 = vmax.xlane.f32.xlu1 %v1623_v5 }
 0x5a7   : > { %1621 = vmax.xlane.f32.xlu0 %v1620_v6 }
 0x5a8   : > { %v4249_v22 = vpop.f32.mrb[24].mxu0 }
 0x5a9   : > { %v2024_v7 = vpop.f32.mrb[25].mxu0  ;;  %1630 = vmax.xlane.f32.xlu1 %v1629_v41  ;;  %v2033_v15 = vadd.f32 %v4249_v22, %v5131_v25 }
 0x5aa   : > { %v4250_v34 = vpop.f32.mrb[26].mxu0  ;;  %v2025_v54 = vadd.f32 %v2024_v7, %v5141_v8 }
 0x5ab   : > { %v2036_v16 = vadd.f32 %v4250_v34, %v5136_v45  ;;  %1627 = vmax.xlane.f32.xlu0 %v1626_v24  ;;  %v2027_v17 = vpop.f32.mrb[27].mxu0 }
 0x5ac   : > { %v2028_v18 = vadd.f32 %v2027_v17, %v5146_v14 }
 0x5ad   : > { %v5355_v19 = vpack.c.bf16 %v2036_v16, %v2033_v15 }
 0x5ae   : > { %v5357_v27 = vpack.c.bf16 %v2028_v18, %v2025_v54 }
 0x5b0   : > { %v4253_v55 = vpop.f32.mrb[28].mxu0 }
 0x5b1   : > { %v2040_v0 = vpop.f32.mrb[29].mxu0  ;;  %v2049_v20 = vadd.f32 %v4253_v55, %v5159_v26 }
 0x5b2   : > { %v4254_v33 = vpop.f32.mrb[30].mxu0  ;;  %v2041_v45 = vadd.f32 %v2040_v0, %v5171_v31 }
 0x5b3   : > { %v2052_v38 = vadd.f32 %v4254_v33, %v5166_v30  ;;  %v2043_v25 = vpop.f32.mrb[31].mxu0 }
 0x5b4   : > { %v2044_v46 = vadd.f32 %v2043_v25, %v5176_v32 }
 0x5b5   : > { %v5363_v36 = vpack.c.bf16 %v2052_v38, %v2049_v20 }
 0x5b6   : > { %v5365_v8 = vpack.c.bf16 %v2044_v46, %v2041_v45 }
 0x5c1   : > { %1712 = vrot.lane.b32.xlu0 %v5207_v63, %s4736_s29 }
 0x628   : > { %v1610_v14 = vpop.xlane.xlu0 %1609 }
 0x629   : > { %v1632_v56 = vsub.f32 %v1577_v62, %v1610_v14 }
 0x62a   : > { %v1613_v11 = vpop.xlane.xlu1 %1612 }
 0x62b   : > { %v1640_v26 = vmul.f32 1.442695, %v1632_v56  ;;  %v1633_v52 = vsub.f32 %v1580_v23, %v1613_v11 }
 0x62c   : > { %v1616_v48 = vpop.xlane.xlu0 %1615 }
 0x62d   : > { %v1634_v50 = vsub.f32 %v4209_v60, %v1616_v48  ;;  %v1642_v32 = vmul.f32 1.442695, %v1633_v52 }
 0x62f   : > { %v1644_v30 = vmul.f32 1.442695, %v1634_v50 }
 0x630   : > { %v1619_v28 = vpop.xlane.xlu0 %1618 }
 0x631   : > { %4543 = vpow2.f32 %v1644_v30  ;;  %v1635_v31 = vsub.f32 %v4210_v12, %v1619_v28 }
 0x632   : > { %v1625_v29 = vpop.xlane.xlu1 %1624  ;;  %4545 = vpow2.f32 %v1640_v26 }
 0x633   : > { %v1646_v9 = vmul.f32 1.442695, %v1635_v31  ;;  %v1637_v62 = vsub.f32 %v5343_v39, %v1625_v29 }
 0x634   : > { %v1622_v44 = vpop.xlane.xlu0 %1621 }
 0x635   : > { %4547 = vpow2.f32 %v1646_v9  ;;  %v1636_v57 = vsub.f32 %v1593_v3, %v1622_v44  ;;  %v1650_v13 = vmul.f32 1.442695, %v1637_v62  ;;  %v4461_v9 = vld [vmem:[%s6088_s8] sm:$0xff]   ;;  %v4462_v44 = vld [vmem:[%s6088_s8 + $0x8] sm:$0xff]  }
 0x636   : > { %4549 = vpow2.f32 %v1642_v32  ;;  %v1631_v63 = vpop.xlane.xlu1 %1630 }
 0x637   : > { %v1648_v35 = vmul.f32 1.442695, %v1636_v57  ;;  %v1639_v43 = vsub.f32 %v5340_v4, %v1631_v63 }
 0x638   : > { %v1628_v49 = vpop.xlane.xlu0 %1627 }
 0x639   : > { %v1638_v51 = vsub.f32 %v4213_v2, %v1628_v49  ;;  %v1654_v12 = vmul.f32 1.442695, %v1639_v43 }
 0x63b   : > { %v5369_v59 = vpop.eup %4543  ;;  %v1652_v53 = vmul.f32 1.442695, %v1638_v51 }
 0x63c   : > { %v1713_v37 = vpop.permute.xlu0 %1712  ;;  %v1662_v47 = vsel %vm1309_vm2, %v5369_v59, 0.0  ;;  %v4546_v10 = vpop.eup %4545 }
 0x63d   : > { %4551 = vpow2.f32 %v1652_v53  ;;  %1663 = vadd.xlane.f32.xlu0 %v1662_v47  ;;  %4215 = vmatprep.subr.bf16.mxu1 %v1713_v37  ;;  %v1656_v42 = vsel %vm1309_vm2, %v4546_v10, 0.0 }
 0x63e   : > { %4216 = vmatpush3.bf16.msra.mxu1 %v1713_v37  ;;  %4553 = vpow2.f32 %v1648_v35  ;;  %v4463_v37 = vld [vmem:[%s6084_s4] sm:$0xff]  }
 0x63f   : > { %v4548_v60 = vpop.eup %4547  ;;  %4555 = vpow2.f32 %v1654_v12 }
 0x640   : > { %v1665_v23 = vsel %vm1309_vm2, %v4548_v60, 0.0  ;;  %v4550_v58 = vpop.eup %4549  ;;  %4557 = vpow2.f32 %v1650_v13 }
 0x641   : > { %1657 = vadd.xlane.f32.xlu0 %v1656_v42  ;;  %1666 = vadd.xlane.f32.xlu1 %v1665_v23  ;;  %v1659_v2 = vsel %vm1309_vm2, %v4550_v58, 0.0 }
 0x645   : > { %1660 = vadd.xlane.f32.xlu1 %v1659_v2 }
 0x647   : > { %v4552_v3 = vpop.eup %4551 }
 0x648   : > { %v1674_v4 = vsel %vm1309_vm2, %v4552_v3, 0.0  ;;  %v4554_v21 = vpop.eup %4553 }
 0x649   : > { %1675 = vadd.xlane.f32.xlu1 %v1674_v4  ;;  %v1668_v39 = vsel %vm1309_vm2, %v4554_v21, 0.0  ;;  %v4556_v5 = vpop.eup %4555 }
 0x64a   : > { %v1677_v6 = vsel %vm1309_vm2, %v4556_v5, 0.0  ;;  %v4558_v22 = vpop.eup %4557 }
 0x64b   : > { %v1671_v41 = vsel %vm1309_vm2, %v4558_v22, 0.0 }
 0x64d   : > { %1669 = vadd.xlane.f32.xlu1 %v1668_v39 }
 0x651   : > { %1678 = vadd.xlane.f32.xlu1 %v1677_v6 }
 0x655   : > { %1672 = vadd.xlane.f32.xlu1 %v1671_v41 }
 0x657   : > { %1716 = vrot.lane.b32.xlu0 %v5237_v1, %s4736_s29 }
 0x65b   : > { %1718 = vrot.lane.b32.xlu0 %v5232_v40, %s4736_s29 }
 0x666   : > { %1714 = vrot.lane.b32.xlu1 %v5203_v61, %s4736_s29 }
 0x6ca   : > { %v1664_v7 = vpop.xlane.xlu0 %1663 }
 0x6ce   : > { %v1658_v34 = vpop.xlane.xlu0 %1657  ;;  %v1667_v24 = vpop.xlane.xlu1 %1666 }
 0x6cf   : > { %4559 = vrcp.f32 %v1658_v34 }
 0x6d2   : > { %v1661_v15 = vpop.xlane.xlu1 %1660  ;;  %v1717_v40 = vpop.permute.xlu0 %1716 }
 0x6d3   : > { %4561 = vrcp.f32 %v1661_v15  ;;  %v4464_v15 = vld [vmem:[%s6084_s4 + $0x8] sm:$0xff]  }
 0x6d4   : > { %4563 = vrcp.f32 %v1667_v24  ;;  %v4465_v24 = vld [vmem:[%s6086_s6] sm:$0xff]  }
 0x6d5   : > { %4565 = vrcp.f32 %v1664_v7  ;;  %4267 = vmatprep.subr.bf16.mxu0 %v4465_v24 }
 0x6d6   : > { %v1676_v16 = vpop.xlane.xlu1 %1675  ;;  %v1719_v46 = vpop.permute.xlu0 %1718  ;;  %4268 = vmatpush3.bf16.msra.mxu0 %v4465_v24 }
 0x6d9   : > { %v4560_v54 = vpop.eup %4559 }
 0x6da   : > { %v1670_v17 = vpop.xlane.xlu1 %1669  ;;  %v1696_v0 = vmul.f32 %v4560_v54, %v4546_v10 }
 0x6db   : > { %4567 = vrcp.f32 %v1670_v17  ;;  %v5434_v17 = vld [vmem:[%s6089_s9] ss:$0 sm:$0xff] }
 0x6dd   : > { %v4562_v18 = vpop.eup %4561 }
 0x6de   : > { %v1679_v55 = vpop.xlane.xlu1 %1678  ;;  %v1697_v33 = vmul.f32 %v4562_v18, %v4550_v58  ;;  %v4564_v38 = vpop.eup %4563 }
 0x6df   : > { %v4566_v25 = vpop.eup %4565  ;;  %v1699_v56 = vmul.f32 %v4564_v38, %v4548_v60 }
 0x6e0   : > { %v1704_v1 = vpack.c.bf16 %v1697_v33, %v1696_v0  ;;  %v1698_v48 = vmul.f32 %v4566_v25, %v5369_v59  ;;  %v4704_v25 = vld [vmem:[%s4852_s2] sm:$0xff] }
 0x6e2   : > { %4223 = vmatprep.mubr.msk.bf16.mxu1 %vm1309_vm2, %v1704_v1  ;;  %v1673_v61 = vpop.xlane.xlu1 %1672  ;;  %v1705_v26 = vpack.c.bf16 %v1699_v56, %v1698_v48  ;;  %v4706_v56 = vld [vmem:[%s4852_s2 + $0x10] sm:$0xff] }
 0x6e3   : > { %4569 = vrcp.f32 %v1673_v61 }
 0x6e4   : > { %4571 = vrcp.f32 %v1679_v55 }
 0x6e5   : > { %4573 = vrcp.f32 %v1676_v16  ;;  %v4568_v45 = vpop.eup %4567  ;;  %v4466_v16 = vld [vmem:[%s6086_s6 + $0x8] sm:$0xff]  }
 0x6e6   : > { %v1715_v20 = vpop.permute.xlu1 %1714  ;;  %v1700_v50 = vmul.f32 %v4568_v45, %v4554_v21  ;;  %4269 = vmatprep.subr.bf16.mxu0 %v4466_v16 }
 0x6e7   : > { %4217 = vmatprep.subr.bf16.mxu1 %v1715_v20  ;;  %4270 = vmatpush3.bf16.msra.mxu0 %v4466_v16 }
 0x6e8   : > { %4218 = vmatpush3.bf16.msra.mxu1 %v1715_v20  ;;  %v4703_v20 = vld [vmem:[%s4852_s2 + $0x18] sm:$0xff] }
 0x6e9   : > { %4219 = vmatprep.subr.bf16.mxu1 %v1717_v40 }
 0x6ec   : > { %4220 = vmatpush3.bf16.msra.mxu1 %v1717_v40 }
 0x6ed   : > { %v4570_v14 = vpop.eup %4569  ;;  %4221 = vmatprep.subr.bf16.mxu1 %v1719_v46 }
 0x6ee   : > { %v1701_v11 = vmul.f32 %v4570_v14, %v4558_v22  ;;  %v4572_v52 = vpop.eup %4571 }
 0x6ef   : > { %v4574_v28 = vpop.eup %4573  ;;  %v1703_v31 = vmul.f32 %v4572_v52, %v4556_v5 }
 0x6f0   : > { %4222 = vmatpush3.bf16.msra.mxu1 %v1719_v46  ;;  %v1706_v30 = vpack.c.bf16 %v1701_v11, %v1700_v50  ;;  %v1702_v29 = vmul.f32 %v4574_v28, %v4552_v3  ;;  %v4705_v46 = vld [vmem:[%s4852_s2 + $0x8] sm:$0xff] }
 0x6f1   : > { %4231 = vmatprep.subr.bf16.mxu1 %v4461_v9 }
 0x6f2   : > { %v1707_v32 = vpack.c.bf16 %v1703_v31, %v1702_v29 }
 0x6f3   : > { %4224 = vmatmul.mubr.msk.bf16.vlgmr.msra.gmra.mrb[24].mxu1 %vm1309_vm2, %v1705_v26 }
 0x6f4   : > { %4227 = vmatprep.mubr.msk.bf16.mxu1 %vm1309_vm2, %v1706_v30  ;;  %4232 = vmatpush3.bf16.msra.mxu1 %v4461_v9 }
 0x6f5   : > { %4233 = vmatprep.subr.bf16.mxu1 %v4462_v44 }
 0x6f8   : > { %4234 = vmatpush3.bf16.msra.mxu1 %v4462_v44  ;;  %v4707_v44 = vld [vmem:[%s4852_s2 + $0x38] sm:$0xff] }
 0x6f9   : > { %4255 = vmatprep.subr.bf16.mxu1 %v4463_v37 }
 0x6fb   : > { %4228 = vmatmul.mubr.msk.bf16.gmra.mrb[28].mxu1 %vm1309_vm2, %v1707_v32 }
 0x7c6   : > { %v4225_v57 = vpop.f32.mrb[24].mxu1 }
 0x7c7   : > { %v1770_v63 = vpop.f32.mrb[25].mxu1 }
 0x7c8   : > { %1809 = vrot.lane.b32.xlu0 %v1770_v63, %s4737_s27  ;;  %v4226_v49 = vpop.f32.mrb[26].mxu1  ;;  %v4708_v63 = vld [vmem:[%s4852_s2 + $0x20] sm:$0xff] }
 0x7c9   : > { %v1773_v51 = vpop.f32.mrb[27].mxu1 }
 0x7ca   : > { %1811 = vrot.lane.b32.xlu1 %v1773_v51, %s4737_s27  ;;  %v4709_v51 = vld [vmem:[%s4852_s2 + $0x28] sm:$0xff] }
 0x7cc   : > { %1813 = vrot.lane.b32.xlu0 %v4225_v57, %s4737_s27 }
 0x7ce   : > { %1815 = vrot.lane.b32.xlu1 %v4226_v49, %s4737_s27  ;;  %v4229_v59 = vpop.f32.mrb[28].mxu1 }
 0x7cf   : > { %v1786_v35 = vpop.f32.mrb[29].mxu1 }
 0x7d0   : > { %1817 = vrot.lane.b32.xlu0 %v1786_v35, %s4737_s27  ;;  %v4230_v43 = vpop.f32.mrb[30].mxu1  ;;  %v4710_v35 = vld [vmem:[%s4852_s2 + $0x30] sm:$0xff]  ;;  %s635_s2 = scalar_lea.vmem %s6099_s19, %s4846_s20 }
 0x7d1   : > { %v1789_v53 = vpop.f32.mrb[31].mxu1 }
 0x7d2   : > { %1819 = vrot.lane.b32.xlu1 %v1789_v53, %s4737_s27 }
 0x7d4   : > { %1821 = vrot.lane.b32.xlu0 %v4229_v59, %s4737_s27 }
 0x7d6   : > { %1823 = vrot.lane.b32.xlu1 %v4230_v43, %s4737_s27 }
 0x83a   : > { %v1810_v47 = vpop.permute.xlu0 %1809 }
 0x83b   : > { %1834 = vst.msk [vmem:[#allocation2] sm:$0xff] %vm1833_vm3, %v1810_v47 }
 0x83c   : > { %v1812_v10 = vpop.permute.xlu1 %1811 }
 0x83d   : > { %1835 = vst.msk [vmem:[#allocation2 + $0x8] sm:$0xff] %vm1833_vm3, %v1812_v10 }
 0x83e   : > { %v1814_v60 = vpop.permute.xlu0 %1813 }
 0x83f   : > { %1836 = vst.msk [vmem:[#allocation2 + $0x10] sm:$0xff] %vm1833_vm3, %v1814_v60 }
 0x840   : > { %v1816_v62 = vpop.permute.xlu1 %1815 }
 0x841   : > { %1837 = vst.msk [vmem:[#allocation2 + $0x18] sm:$0xff] %vm1833_vm3, %v1816_v62 }
 0x842   : > { %v1818_v12 = vpop.permute.xlu0 %1817  ;;  %v1842_v23 = vld [vmem:[#allocation2] sm:$0xff] }
 0x843   : > { %1838 = vst.msk [vmem:[#allocation2 + $0x20] sm:$0xff] %vm1833_vm3, %v1818_v12 }
 0x844   : > { %v1820_v42 = vpop.permute.xlu1 %1819  ;;  %v1843_v58 = vld [vmem:[#allocation2 + $0x8] sm:$0xff] }
 0x845   : > { %1839 = vst.msk [vmem:[#allocation2 + $0x28] sm:$0xff] %vm1833_vm3, %v1820_v42  ;;  %v1850_v13 = vpack.c.bf16 %v1843_v58, %v1842_v23  ;;  %v4711_v23 = vld [vmem:[%s6085_s5 + $0x10] sm:$0xff] }
 0x846   : > { %v1822_v2 = vpop.permute.xlu0 %1821  ;;  %v1844_v4 = vld [vmem:[#allocation2 + $0x10] sm:$0xff] }
 0x847   : > { %1840 = vst.msk [vmem:[#allocation2 + $0x30] sm:$0xff] %vm1833_vm3, %v1822_v2  ;;  %4235 = vmatprep.mubr.msk.bf16.mxu1 %vm655_vm0, %v1850_v13  ;;  %v4712_v13 = vld [vmem:[%s6087_s7] ss:$0 sm:$0xff] }
 0x848   : > { %v1824_v3 = vpop.permute.xlu1 %1823  ;;  %v1845_v21 = vld [vmem:[#allocation2 + $0x18] sm:$0xff] }
 0x849   : > { %1841 = vst.msk [vmem:[#allocation2 + $0x38] sm:$0xff] %vm1833_vm3, %v1824_v3  ;;  %v1851_v39 = vpack.c.bf16 %v1845_v21, %v1844_v4  ;;  %v4713_v3 = vld [vmem:[%s6085_s5 + $0x18] sm:$0xff] }
 0x84a   : > { %v1846_v5 = vld [vmem:[#allocation2 + $0x20] sm:$0xff] }
 0x84b   : > { %4236 = vmatmul.mubr.msk.bf16.vlgmr.msra.gmra.mrb[32].mxu1 %vm655_vm0, %v1851_v39 }
 0x84c   : > { %v1847_v6 = vld [vmem:[#allocation2 + $0x28] sm:$0xff]  ;;  %4256 = vmatpush3.bf16.msra.mxu1 %v4463_v37 }
 0x84d   : > { %v1852_v22 = vpack.c.bf16 %v1847_v6, %v1846_v5  ;;  %4257 = vmatprep.subr.bf16.mxu1 %v4464_v15  ;;  %v4714_v6 = vld [vmem:[%s6085_s5] sm:$0xff] }
 0x84e   : > { %v1848_v41 = vld [vmem:[#allocation2 + $0x30] sm:$0xff] }
 0x84f   : > { %4239 = vmatprep.mubr.msk.bf16.mxu1 %vm655_vm0, %v1852_v22 }
 0x850   : > { %v1849_v7 = vld [vmem:[#allocation2 + $0x38] sm:$0xff]  ;;  %4258 = vmatpush3.bf16.msra.mxu1 %v4464_v15 }
 0x851   : > { %v1853_v34 = vpack.c.bf16 %v1849_v7, %v1848_v41  ;;  %v4715_v7 = vld [vmem:[%s6085_s5 + $0x8] sm:$0xff] }
 0x853   : > { %4240 = vmatmul.mubr.msk.bf16.gmra.mrb[36].mxu1 %vm655_vm0, %v1853_v34 }
 0x91e   : > { %v4237_v54 = vpop.f32.mrb[32].mxu1 }
 0x91f   : > { %v1923_v18 = vpop.f32.mrb[33].mxu1  ;;  %v1932_v33 = vadd.f32 %v4237_v54, %v5434_v17 }
 0x920   : > { %v1924_v55 = vadd.f32 %v5434_v17, %v1923_v18  ;;  %v4238_v0 = vpop.f32.mrb[34].mxu1 }
 0x921   : > { %v1935_v1 = vadd.f32 %v4238_v0, %v5434_v17  ;;  %v1926_v61 = vpop.f32.mrb[35].mxu1  ;;  %v5450_v11 = vadd.f32 %v4706_v56, %v1932_v33 }
 0x922   : > { %v1927_v40 = vadd.f32 %v5434_v17, %v1926_v61  ;;  %v5444_v45 = vadd.f32 %v4704_v25, %v1924_v55  ;;  %v4716_v25 = vld [vmem:[%s6085_s5 + $0x30] sm:$0xff] }
 0x923   : > { %v5441_v38 = vadd.f32 %v4703_v20, %v1935_v1 }
 0x924   : > { %v5447_v14 = vadd.f32 %v4705_v46, %v1927_v40 }
 0x925   : > { %v1963_v26 = vpack.c.bf16 %v5441_v38, %v5450_v11 }
 0x926   : > { %v4241_v48 = vpop.f32.mrb[36].mxu1  ;;  %v1962_v50 = vpack.c.bf16 %v5447_v14, %v5444_v45 }
 0x927   : > { %v1939_v52 = vpop.f32.mrb[37].mxu1  ;;  %v1948_v31 = vadd.f32 %v4241_v48, %v5434_v17  ;;  %v4717_v48 = vld [vmem:[%s6085_s5 + $0x38] sm:$0xff] }
 0x928   : > { %v1940_v30 = vadd.f32 %v5434_v17, %v1939_v52  ;;  %v4242_v28 = vpop.f32.mrb[38].mxu1  ;;  %4259 = vmatprep.mubr.msk.bf16.mxu1 %vm655_vm0, %v1962_v50  ;;  %4271 = vmatprep.mubr.msk.bf16.mxu0 %vm655_vm0, %v1962_v50 }
 0x929   : > { %v1951_v29 = vadd.f32 %v4242_v28, %v5434_v17  ;;  %v1942_v32 = vpop.f32.mrb[39].mxu1  ;;  %4260 = vmatmul.mubr.msk.bf16.vlgmr.msra.gmra.mrb[40].mxu1 %vm655_vm0, %v1963_v26  ;;  %4272 = vmatmul.mubr.msk.bf16.vlgmr.msra.gmra.mrb[32].mxu0 %vm655_vm0, %v1963_v26  ;;  %v5474_v43 = vadd.f32 %v4710_v35, %v1948_v31  ;;  %v4718_v28 = vld [vmem:[%s6085_s5 + $0x20] sm:$0xff] }
 0x92a   : > { %v1943_v9 = vadd.f32 %v5434_v17, %v1942_v32  ;;  %v5468_v49 = vadd.f32 %v4708_v63, %v1940_v30  ;;  %v4719_v32 = vld [vmem:[%s6085_s5 + $0x28] sm:$0xff] }
 0x92b   : > { %v5465_v57 = vadd.f32 %v4707_v44, %v1951_v29 }
 0x92c   : > { %v5471_v59 = vadd.f32 %v4709_v51, %v1943_v9 }
 0x92d   : > { %v1965_v37 = vpack.c.bf16 %v5465_v57, %v5474_v43 }
 0x92e   : > { %v1964_v53 = vpack.c.bf16 %v5471_v59, %v5468_v49 }
 0x930   : > { %4263 = vmatprep.mubr.msk.bf16.mxu1 %vm655_vm0, %v1964_v53  ;;  %4275 = vmatprep.mubr.msk.bf16.mxu0 %vm655_vm0, %v1964_v53 }
 0x931   : > { %4264 = vmatmul.mubr.msk.bf16.gmra.mrb[44].mxu1 %vm655_vm0, %v1965_v37  ;;  %4276 = vmatmul.mubr.msk.bf16.gmra.mrb[36].mxu0 %vm655_vm0, %v1965_v37 }
 0x932   : > { %4287 = vmatprep.mubr.msk.bf16.mxu1 %vm1219_vm1, %v5357_v27 }
 0x9fc   : > { %v4261_v47 = vpop.f32.mrb[40].mxu1  ;;  %v4273_v10 = vpop.f32.mrb[32].mxu0 }
 0x9fd   : > { %v2125_v60 = vpop.f32.mrb[41].mxu1  ;;  %v2213_v62 = vpop.f32.mrb[33].mxu0  ;;  %v2134_v58 = vadd.f32 %v4711_v23, %v4261_v47  ;;  %v2222_v2 = vadd.f32 %v4712_v13, %v4273_v10 }
 0x9fe   : > { %v4262_v12 = vpop.f32.mrb[42].mxu1  ;;  %v4274_v42 = vpop.f32.mrb[34].mxu0  ;;  %v2126_v22 = vadd.f32 %v4714_v6, %v2125_v60  ;;  %v2214_v41 = vadd.f32 %v4712_v13, %v2213_v62 }
 0x9ff   : > { %v2137_v4 = vadd.f32 %v4713_v3, %v4262_v12  ;;  %v2225_v21 = vadd.f32 %v4712_v13, %v4274_v42  ;;  %v2128_v39 = vpop.f32.mrb[43].mxu1  ;;  %v2216_v5 = vpop.f32.mrb[35].mxu0 }
 0xa00   : > { %v2129_v34 = vadd.f32 %v4715_v7, %v2128_v39  ;;  %v2217_v24 = vadd.f32 %v4712_v13, %v2216_v5 }
 0xa01   : > { %v5501_v15 = vpack.c.bf16 %v2137_v4, %v2134_v58  ;;  %v5503_v16 = vpack.c.bf16 %v2225_v21, %v2222_v2 }
 0xa02   : > { %v5505_v54 = vpack.c.bf16 %v2129_v34, %v2126_v22  ;;  %v5507_v18 = vpack.c.bf16 %v2217_v24, %v2214_v41 }
 0xa03   : > { %v2272_v37 = vsel %vm1219_vm1, %v5501_v15, 0 }
 0xa04   : > { %v4265_v55 = vpop.f32.mrb[44].mxu1  ;;  %v4277_v0 = vpop.f32.mrb[36].mxu0  ;;  %4435 = vmatprep.subr.msk.bf16.mxu1 %vm1219_vm1, %v5505_v54  ;;  %4295 = vmatprep.subr.bf16.mxu0 %v5507_v18  ;;  %v2269_v33 = vsel %vm1219_vm1, %v5505_v54, 0 }
 0xa05   : > { %v2141_v1 = vpop.f32.mrb[45].mxu1  ;;  %v2229_v61 = vpop.f32.mrb[37].mxu0  ;;  %4280 = vmatpush3.bf16.xpose.msra.mxu1 %v2269_v33  ;;  %4296 = vmatpush3.bf16.msra.mxu0 %v5507_v18  ;;  %v2150_v46 = vadd.f32 %v4716_v25, %v4265_v55  ;;  %v2238_v56 = vadd.f32 %v4712_v13, %v4277_v0 }
 0xa06   : > { %v4266_v40 = vpop.f32.mrb[46].mxu1  ;;  %v4278_v20 = vpop.f32.mrb[38].mxu0  ;;  %4436 = vmatprep.subr.msk.bf16.mxu1 %vm1219_vm1, %v5501_v15  ;;  %4297 = vmatprep.subr.bf16.mxu0 %v5503_v16  ;;  %v2142_v31 = vadd.f32 %v4718_v28, %v2141_v1  ;;  %v2230_v29 = vadd.f32 %v4712_v13, %v2229_v61 }
 0xa07   : > { %v2153_v50 = vadd.f32 %v4717_v48, %v4266_v40  ;;  %v2241_v26 = vadd.f32 %v4712_v13, %v4278_v20  ;;  %v2144_v52 = vpop.f32.mrb[47].mxu1  ;;  %v2232_v30 = vpop.f32.mrb[39].mxu0 }
 0xa08   : > { %v2145_v9 = vadd.f32 %v4719_v32, %v2144_v52  ;;  %v2233_v44 = vadd.f32 %v4712_v13, %v2232_v30 }
 0xa09   : > { %v5530_v63 = vpack.c.bf16 %v2153_v50, %v2150_v46  ;;  %v5532_v51 = vpack.c.bf16 %v2241_v26, %v2238_v56  ;;  %4298 = vmatpush3.bf16.msra.mxu0 %v5503_v16 }
 0xa0a   : > { %v5535_v35 = vpack.c.bf16 %v2145_v9, %v2142_v31  ;;  %v5537_v53 = vpack.c.bf16 %v2233_v44, %v2230_v29 }
 0xa0b   : > { %v2278_v10 = vsel %vm1219_vm1, %v5530_v63, 0 }
 0xa0c   : > { %4299 = vmatprep.subr.bf16.mxu0 %v5537_v53  ;;  %v2275_v47 = vsel %vm1219_vm1, %v5535_v35, 0 }
 0xa0d   : > { %4282 = vmatpush3.bf16.xpose.msra.mxu1 %v2272_v37  ;;  %4300 = vmatpush3.bf16.msra.mxu0 %v5537_v53 }
 0xa0e   : > { %4437 = vmatprep.subr.msk.bf16.mxu1 %vm1219_vm1, %v5535_v35  ;;  %4301 = vmatprep.subr.bf16.mxu0 %v5532_v51 }
 0xa11   : > { %4302 = vmatpush3.bf16.msra.mxu0 %v5532_v51 }
 0xa15   : > { %4284 = vmatpush3.bf16.xpose.msra.mxu1 %v2275_v47 }
 0xa16   : > { %4438 = vmatprep.subr.msk.bf16.mxu1 %vm1219_vm1, %v5530_v63 }
 0xa1d   : > { %4286 = vmatpush3.bf16.xpose.msra.mxu1 %v2278_v10 }
 0xa24   : > { %4288 = vmatmul.mubr.msk.bf16.vlgmr.msra.gmra.mrb[48].mxu1 %vm1219_vm1, %v5355_v19 }
 0xa25   : > { %4291 = vmatprep.mubr.msk.bf16.mxu1 %vm1219_vm1, %v5365_v8 }
 0xa2c   : > { %4292 = vmatmul.mubr.msk.bf16.gmra.mrb[52].mxu1 %vm1219_vm1, %v5363_v36 }
 0xaf7   : > { %v4289_v60 = vpop.f32.mrb[48].mxu1 }
 0xaf8   : > { %v2314_v62 = vpop.f32.mrb[49].mxu1  ;;  %v2351_v13 = vsel %vm1309_vm2, %v4289_v60, -inf }
 0xaf9   : > { %v4290_v12 = vpop.f32.mrb[50].mxu1  ;;  %v2345_v42 = vsel %vm1309_vm2, %v2314_v62, -inf }
 0xafa   : > { %2346 = vmax.xlane.f32.xlu0 %v2345_v42  ;;  %v2317_v23 = vpop.f32.mrb[51].mxu1  ;;  %v2354_v21 = vsel %vm1309_vm2, %v4290_v12, -inf }
 0xafb   : > { %v2348_v58 = vsel %vm1309_vm2, %v2317_v23, -inf }
 0xafc   : > { %2349 = vmax.xlane.f32.xlu1 %v2348_v58 }
 0xafe   : > { %2352 = vmax.xlane.f32.xlu0 %v2351_v13 }
 0xaff   : > { %v4293_v2 = vpop.f32.mrb[52].mxu1 }
 0xb00   : > { %v2330_v3 = vpop.f32.mrb[53].mxu1  ;;  %v2363_v41 = vsel %vm1309_vm2, %v4293_v2, -inf }
 0xb01   : > { %v5562_v4 = vpop.f32.mrb[54].mxu1  ;;  %v2357_v6 = vsel %vm1309_vm2, %v2330_v3, -inf }
 0xb02   : > { %2355 = vmax.xlane.f32.xlu0 %v2354_v21  ;;  %v2333_v39 = vpop.f32.mrb[55].mxu1  ;;  %v2366_v22 = vsel %vm1309_vm2, %v5562_v4, -inf }
 0xb03   : > { %v2360_v5 = vsel %vm1309_vm2, %v2333_v39, -inf }
 0xb04   : > { %2361 = vmax.xlane.f32.xlu1 %v2360_v5 }
 0xb06   : > { %2358 = vmax.xlane.f32.xlu0 %v2357_v6 }
 0xb08   : > { %2367 = vmax.xlane.f32.xlu1 %v2366_v22 }
 0xb0a   : > { %2364 = vmax.xlane.f32.xlu0 %v2363_v41 }
 0xb87   : > { %v2347_v7 = vpop.xlane.xlu0 %2346 }
 0xb88   : > { %v2369_v34 = vsub.f32 %v2314_v62, %v2347_v7 }
 0xb89   : > { %v2350_v24 = vpop.xlane.xlu1 %2349 }
 0xb8a   : > { %v2377_v33 = vmul.f32 1.442695, %v2369_v34  ;;  %v2370_v1 = vsub.f32 %v2317_v23, %v2350_v24 }
 0xb8b   : > { %v2353_v55 = vpop.xlane.xlu0 %2352 }
 0xb8c   : > { %v2371_v0 = vsub.f32 %v4289_v60, %v2353_v55  ;;  %v2379_v25 = vmul.f32 1.442695, %v2370_v1 }
 0xb8e   : > { %v2381_v61 = vmul.f32 1.442695, %v2371_v0 }
 0xb8f   : > { %v2356_v40 = vpop.xlane.xlu0 %2355 }
 0xb90   : > { %4575 = vpow2.f32 %v2381_v61  ;;  %v2372_v20 = vsub.f32 %v4290_v12, %v2356_v40 }
 0xb91   : > { %4577 = vpow2.f32 %v2377_v33  ;;  %v2362_v42 = vpop.xlane.xlu1 %2361 }
 0xb92   : > { %v2383_v46 = vmul.f32 1.442695, %v2372_v20  ;;  %v2374_v13 = vsub.f32 %v2333_v39, %v2362_v42 }
 0xb93   : > { %v2359_v56 = vpop.xlane.xlu0 %2358 }
 0xb94   : > { %4579 = vpow2.f32 %v2383_v46  ;;  %v2373_v48 = vsub.f32 %v2330_v3, %v2359_v56  ;;  %v2387_v3 = vmul.f32 1.442695, %v2374_v13 }
 0xb95   : > { %4581 = vpow2.f32 %v2379_v25  ;;  %v2368_v23 = vpop.xlane.xlu1 %2367 }
 0xb96   : > { %v2385_v30 = vmul.f32 1.442695, %v2373_v48  ;;  %v2376_v58 = vsub.f32 %v5562_v4, %v2368_v23 }
 0xb97   : > { %v2365_v50 = vpop.xlane.xlu0 %2364 }
 0xb98   : > { %v2375_v26 = vsub.f32 %v4293_v2, %v2365_v50  ;;  %v2391_v2 = vmul.f32 1.442695, %v2376_v58 }
 0xb9a   : > { %v4576_v52 = vpop.eup %4575  ;;  %v2389_v28 = vmul.f32 1.442695, %v2375_v26 }
 0xb9b   : > { %v2399_v31 = vsel %vm1309_vm2, %v4576_v52, 0.0  ;;  %v4578_v29 = vpop.eup %4577 }
 0xb9c   : > { %4583 = vpow2.f32 %v2389_v28  ;;  %2400 = vadd.xlane.f32.xlu0 %v2399_v31  ;;  %v2393_v9 = vsel %vm1309_vm2, %v4578_v29, 0.0 }
 0xb9d   : > { %4585 = vpow2.f32 %v2385_v30 }
 0xb9e   : > { %v4580_v32 = vpop.eup %4579  ;;  %4587 = vpow2.f32 %v2391_v2 }
 0xb9f   : > { %v2402_v44 = vsel %vm1309_vm2, %v4580_v32, 0.0  ;;  %v4582_v37 = vpop.eup %4581  ;;  %4589 = vpow2.f32 %v2387_v3 }
 0xba0   : > { %2394 = vadd.xlane.f32.xlu0 %v2393_v9  ;;  %2403 = vadd.xlane.f32.xlu1 %v2402_v44  ;;  %v2396_v47 = vsel %vm1309_vm2, %v4582_v37, 0.0 }
 0xba4   : > { %2397 = vadd.xlane.f32.xlu1 %v2396_v47 }
 0xba6   : > { %v5574_v10 = vpop.eup %4583 }
 0xba7   : > { %v2411_v60 = vsel %vm1309_vm2, %v5574_v10, 0.0  ;;  %v5578_v62 = vpop.eup %4585 }
 0xba8   : > { %2412 = vadd.xlane.f32.xlu0 %v2411_v60  ;;  %v2405_v12 = vsel %vm1309_vm2, %v5578_v62, 0.0 }
 0xbac   : > { %2406 = vadd.xlane.f32.xlu0 %v2405_v12 }
 0xbb5   : > { %2548 = vrot.lane.b32.xlu1 %v5501_v15, %s4736_s29  ;;  %v4588_v15 = vpop.eup %4587 }
 0xbb6   : > { %v4590_v21 = vpop.eup %4589 }
 0xbb9   : > { %2550 = vrot.lane.b32.xlu1 %v5535_v35, %s4736_s29  ;;  %v2414_v35 = vsel %vm1309_vm2, %v4588_v15, 0.0 }
 0xbc2   : > { %2546 = vrot.lane.b32.xlu0 %v5505_v54, %s4736_s29  ;;  %v2408_v54 = vsel %vm1309_vm2, %v4590_v21, 0.0 }
 0xbc6   : > { %2534 = vrot.lane.b32.xlu0 %v5357_v27, %s4736_s29 }
 0xbca   : > { %2538 = vrot.lane.b32.xlu0 %v5365_v8, %s4736_s29 }
 0xbdd   : > { %2415 = vadd.xlane.f32.xlu1 %v2414_v35 }
 0xbe1   : > { %2409 = vadd.xlane.f32.xlu1 %v2408_v54 }
 0xbf2   : > { %2552 = vrot.lane.b32.xlu1 %v5530_v63, %s4736_s29 }
 0xbf6   : > { %2536 = vrot.lane.b32.xlu1 %v5355_v19, %s4736_s29 }
 0xbfa   : > { %2540 = vrot.lane.b32.xlu1 %v5363_v36, %s4736_s29 }
 0xc29   : > { %v2401_v27 = vpop.xlane.xlu0 %2400 }
 0xc2d   : > { %v2395_v8 = vpop.xlane.xlu0 %2394  ;;  %v2404_v4 = vpop.xlane.xlu1 %2403 }
 0xc2e   : > { %4591 = vrcp.f32 %v2404_v4 }
 0xc2f   : > { %4593 = vrcp.f32 %v2395_v8 }
 0xc30   : > { %4595 = vrcp.f32 %v2401_v27 }
 0xc31   : > { %v2398_v39 = vpop.xlane.xlu1 %2397 }
 0xc32   : > { %4597 = vrcp.f32 %v2398_v39 }
 0xc35   : > { %v2413_v5 = vpop.xlane.xlu0 %2412  ;;  %v2549_v61 = vpop.permute.xlu1 %2548 }
 0xc36   : > { %v2570_v40 = vsel %vm1219_vm1, %v2549_v61, 0 }
 0xc38   : > { %v4592_v6 = vpop.eup %4591 }
 0xc39   : > { %v2407_v22 = vpop.xlane.xlu0 %2406  ;;  %v4594_v41 = vpop.eup %4593  ;;  %v2436_v34 = vmul.f32 %v4592_v6, %v4580_v32 }
 0xc3a   : > { %v4596_v7 = vpop.eup %4595  ;;  %v2433_v19 = vmul.f32 %v4594_v41, %v4578_v29  ;;  %v2551_v20 = vpop.permute.xlu1 %2550 }
 0xc3b   : > { %v2435_v0 = vmul.f32 %v4596_v7, %v4576_v52  ;;  %v2573_v25 = vsel %vm1219_vm1, %v2551_v20, 0 }
 0xc3c   : > { %v4598_v63 = vpop.eup %4597 }
 0xc3d   : > { %v2547_v24 = vpop.permute.xlu0 %2546  ;;  %v2434_v55 = vmul.f32 %v4598_v63, %v4582_v37  ;;  %v2442_v33 = vpack.c.bf16 %v2436_v34, %v2435_v0 }
 0xc3e   : > { %4439 = vmatprep.subr.msk.bf16.mxu0 %vm1219_vm1, %v2547_v24  ;;  %v2567_v1 = vsel %vm1219_vm1, %v2547_v24, 0 }
 0xc3f   : > { %v2441_v36 = vpack.c.bf16 %v2434_v55, %v2433_v19 }
 0xc41   : > { %4303 = vmatprep.mubr.msk.bf16.mxu0 %vm1309_vm2, %v2441_v36  ;;  %v2535_v47 = vpop.permute.xlu0 %2534 }
 0xc42   : > { %4304 = vmatmul.mubr.msk.bf16.vlgmr.msra.gmra.mrb[40].mxu0 %vm1309_vm2, %v2442_v33 }
 0xc43   : > { %4312 = vmatpush3.bf16.xpose.msra.mxu0 %v2567_v1 }
 0xc44   : > { %4440 = vmatprep.subr.msk.bf16.mxu0 %vm1219_vm1, %v2549_v61 }
 0xc45   : > { %v2539_v12 = vpop.permute.xlu0 %2538 }
 0xc4b   : > { %4314 = vmatpush3.bf16.xpose.msra.mxu0 %v2570_v40 }
 0xc4c   : > { %4441 = vmatprep.subr.msk.bf16.mxu0 %vm1219_vm1, %v2551_v20 }
 0xc53   : > { %4316 = vmatpush3.bf16.xpose.msra.mxu0 %v2573_v25 }
 0xc6a   : > { %v2416_v46 = vpop.xlane.xlu1 %2415 }
 0xc6b   : > { %4599 = vrcp.f32 %v2416_v46 }
 0xc6c   : > { %4601 = vrcp.f32 %v2407_v22 }
 0xc6d   : > { %4603 = vrcp.f32 %v2413_v5 }
 0xc6e   : > { %v2410_v56 = vpop.xlane.xlu1 %2409 }
 0xc6f   : > { %4605 = vrcp.f32 %v2410_v56 }
 0xc72   : > { %v2553_v48 = vpop.permute.xlu1 %2552 }
 0xc73   : > { %v2576_v50 = vsel %vm1219_vm1, %v2553_v48, 0  ;;  %4442 = vmatprep.subr.msk.bf16.mxu0 %vm1219_vm1, %v2553_v48 }
 0xc74   : > { %4318 = vmatpush3.bf16.xpose.msra.mxu0 %v2576_v50 }
 0xc75   : > { %v4600_v26 = vpop.eup %4599 }
 0xc76   : > { %v4602_v52 = vpop.eup %4601  ;;  %v2440_v31 = vmul.f32 %v4600_v26, %v4588_v15  ;;  %v2537_v60 = vpop.permute.xlu1 %2536 }
 0xc77   : > { %v4604_v30 = vpop.eup %4603  ;;  %v2437_v29 = vmul.f32 %v4602_v52, %v5578_v62 }
 0xc78   : > { %v2439_v9 = vmul.f32 %v4604_v30, %v5574_v10 }
 0xc79   : > { %v4606_v28 = vpop.eup %4605 }
 0xc7a   : > { %v2438_v32 = vmul.f32 %v4606_v28, %v4590_v21  ;;  %v2444_v37 = vpack.c.bf16 %v2440_v31, %v2439_v9  ;;  %v2541_v42 = vpop.permute.xlu1 %2540 }
 0xc7c   : > { %v2443_v44 = vpack.c.bf16 %v2438_v32, %v2437_v29 }
 0xc7e   : > { %4307 = vmatprep.mubr.msk.bf16.mxu0 %vm1309_vm2, %v2443_v44 }
 0xc7f   : > { %4308 = vmatmul.mubr.msk.bf16.gmra.mrb[44].mxu0 %vm1309_vm2, %v2444_v37 }
 0xc80   : > { %4319 = vmatprep.mubr.msk.bf16.mxu0 %vm1219_vm1, %v2535_v47 }
 0xc87   : > { %4320 = vmatmul.mubr.msk.bf16.vlgmr.msra.gmra.mrb[48].mxu0 %vm1219_vm1, %v2537_v60 }
 0xc88   : > { %4323 = vmatprep.mubr.msk.bf16.mxu0 %vm1219_vm1, %v2539_v12 }
 0xc8f   : > { %4324 = vmatmul.mubr.msk.bf16.gmra.mrb[52].mxu0 %vm1219_vm1, %v2541_v42 }
 0xd15   : > { %v4305_v62 = vpop.f32.mrb[40].mxu0 }
 0xd16   : > { %2524 = vst.msk [vmem:[#allocation2 + $0x10] sm:$0xff] %vm1219_vm1, %v4305_v62  ;;  %v2491_v10 = vpop.f32.mrb[41].mxu0 }
 0xd17   : > { %2522 = vst.msk [vmem:[#allocation2] sm:$0xff] %vm1219_vm1, %v2491_v10  ;;  %v4306_v23 = vpop.f32.mrb[42].mxu0 }
 0xd18   : > { %2525 = vst.msk [vmem:[#allocation2 + $0x18] sm:$0xff] %vm1219_vm1, %v4306_v23  ;;  %v2494_v58 = vpop.f32.mrb[43].mxu0 }
 0xd19   : > { %2523 = vst.msk [vmem:[#allocation2 + $0x8] sm:$0xff] %vm1219_vm1, %v2494_v58 }
 0xd52   : > { %v4309_v13 = vpop.f32.mrb[44].mxu0 }
 0xd53   : > { %2528 = vst.msk [vmem:[#allocation2 + $0x30] sm:$0xff] %vm1219_vm1, %v4309_v13  ;;  %v2507_v2 = vpop.f32.mrb[45].mxu0 }
 0xd54   : > { %2526 = vst.msk [vmem:[#allocation2 + $0x20] sm:$0xff] %vm1219_vm1, %v2507_v2  ;;  %v4310_v3 = vpop.f32.mrb[46].mxu0 }
 0xd55   : > { %2529 = vst.msk [vmem:[#allocation2 + $0x38] sm:$0xff] %vm1219_vm1, %v4310_v3  ;;  %v2510_v15 = vpop.f32.mrb[47].mxu0 }
 0xd56   : > { %2527 = vst.msk [vmem:[#allocation2 + $0x28] sm:$0xff] %vm1219_vm1, %v2510_v15 }
 0xd5a   : > { %v4321_v35 = vpop.f32.mrb[48].mxu0 }
 0xd5b   : > { %v2612_v21 = vpop.f32.mrb[49].mxu0  ;;  %v2649_v39 = vsel %vm1309_vm2, %v4321_v35, -inf }
 0xd5c   : > { %v4322_v54 = vpop.f32.mrb[50].mxu0  ;;  %v2643_v27 = vsel %vm1309_vm2, %v2612_v21, -inf }
 0xd5d   : > { %2644 = vmax.xlane.f32.xlu0 %v2643_v27  ;;  %v2615_v8 = vpop.f32.mrb[51].mxu0  ;;  %v2652_v41 = vsel %vm1309_vm2, %v4322_v54, -inf }
 0xd5e   : > { %v2646_v4 = vsel %vm1309_vm2, %v2615_v8, -inf }
 0xd5f   : > { %2647 = vmax.xlane.f32.xlu1 %v2646_v4 }
 0xd61   : > { %2650 = vmax.xlane.f32.xlu0 %v2649_v39 }
 0xd62   : > { %v4325_v5 = vpop.f32.mrb[52].mxu0 }
 0xd63   : > { %v2628_v6 = vpop.f32.mrb[53].mxu0  ;;  %v2661_v19 = vsel %vm1309_vm2, %v4325_v5, -inf }
 0xd64   : > { %v4326_v22 = vpop.f32.mrb[54].mxu0  ;;  %v2655_v34 = vsel %vm1309_vm2, %v2628_v6, -inf }
 0xd65   : > { %2653 = vmax.xlane.f32.xlu0 %v2652_v41  ;;  %v2631_v7 = vpop.f32.mrb[55].mxu0  ;;  %v2664_v24 = vsel %vm1309_vm2, %v4326_v22, -inf }
 0xd66   : > { %v2658_v63 = vsel %vm1309_vm2, %v2631_v7, -inf }
 0xd67   : > { %2659 = vmax.xlane.f32.xlu1 %v2658_v63 }
 0xd69   : > { %2656 = vmax.xlane.f32.xlu0 %v2655_v34 }
 0xd6b   : > { %2665 = vmax.xlane.f32.xlu1 %v2664_v24 }
 0xd6d   : > { %2662 = vmax.xlane.f32.xlu0 %v2661_v19 }
 0xdea   : > { %v2645_v55 = vpop.xlane.xlu0 %2644 }
 0xdeb   : > { %v2667_v0 = vsub.f32 %v2612_v21, %v2645_v55 }
 0xdec   : > { %v2648_v36 = vpop.xlane.xlu1 %2647 }
 0xded   : > { %v2675_v61 = vmul.f32 1.442695, %v2667_v0  ;;  %v2668_v40 = vsub.f32 %v2615_v8, %v2648_v36 }
 0xdee   : > { %v2651_v33 = vpop.xlane.xlu0 %2650 }
 0xdef   : > { %v2669_v1 = vsub.f32 %v4321_v35, %v2651_v33  ;;  %v2677_v56 = vmul.f32 1.442695, %v2668_v40 }
 0xdf1   : > { %v2679_v20 = vmul.f32 1.442695, %v2669_v1 }
 0xdf2   : > { %v2654_v25 = vpop.xlane.xlu0 %2653 }
 0xdf3   : > { %4607 = vpow2.f32 %v2679_v20  ;;  %v2670_v46 = vsub.f32 %v4322_v54, %v2654_v25 }
 0xdf4   : > { %4609 = vpow2.f32 %v2675_v61  ;;  %v2660_v58 = vpop.xlane.xlu1 %2659 }
 0xdf5   : > { %v2681_v48 = vmul.f32 1.442695, %v2670_v46  ;;  %v2672_v3 = vsub.f32 %v2631_v7, %v2660_v58  ;;  %v3007_v58 = vsel %vm655_vm0, %v5441_v38, 0.0 }
 0xdf6   : > { %v2657_v50 = vpop.xlane.xlu0 %2656 }
 0xdf7   : > { %4611 = vpow2.f32 %v2681_v48  ;;  %v2671_v26 = vsub.f32 %v2628_v6, %v2657_v50  ;;  %v2685_v35 = vmul.f32 1.442695, %v2672_v3  ;;  %v3019_v3 = vsel %vm655_vm0, %v5465_v57, 0.0 }
 0xdf8   : > { %4613 = vpow2.f32 %v2677_v56  ;;  %v2666_v13 = vpop.xlane.xlu1 %2665 }
 0xdf9   : > { %v2683_v31 = vmul.f32 1.442695, %v2671_v26  ;;  %v2674_v2 = vsub.f32 %v4326_v22, %v2666_v13  ;;  %v3013_v13 = vsel %vm655_vm0, %v5471_v59, 0.0 }
 0xdfa   : > { %v2663_v52 = vpop.xlane.xlu0 %2662 }
 0xdfb   : > { %v2673_v30 = vsub.f32 %v4325_v5, %v2663_v52  ;;  %v2689_v15 = vmul.f32 1.442695, %v2674_v2  ;;  %v3010_v2 = vsel %vm655_vm0, %v5468_v49, 0.0 }
 0xdfd   : > { %v5635_v28 = vpop.eup %4607  ;;  %v2687_v29 = vmul.f32 1.442695, %v2673_v30 }
 0xdfe   : > { %v2697_v32 = vsel %vm1309_vm2, %v5635_v28, 0.0  ;;  %v4610_v9 = vpop.eup %4609 }
 0xdff   : > { %4615 = vpow2.f32 %v2687_v29  ;;  %2698 = vadd.xlane.f32.xlu0 %v2697_v32  ;;  %v2691_v37 = vsel %vm1309_vm2, %v4610_v9, 0.0  ;;  %v4468_v29 = vld [vmem:[%s6088_s8 + $0x8] sm:$0xff]  }
 0xe00   : > { %4617 = vpow2.f32 %v2683_v31 }
 0xe01   : > { %v5639_v44 = vpop.eup %4611  ;;  %4619 = vpow2.f32 %v2689_v15  ;;  %v3016_v15 = vsel %vm655_vm0, %v5474_v43, 0.0 }
 0xe02   : > { %v2700_v47 = vsel %vm1309_vm2, %v5639_v44, 0.0  ;;  %v4614_v60 = vpop.eup %4613  ;;  %4621 = vpow2.f32 %v2685_v35 }
 0xe03   : > { %2692 = vadd.xlane.f32.xlu0 %v2691_v37  ;;  %2701 = vadd.xlane.f32.xlu1 %v2700_v47  ;;  %v2694_v12 = vsel %vm1309_vm2, %v4614_v60, 0.0 }
 0xe07   : > { %2695 = vadd.xlane.f32.xlu1 %v2694_v12 }
 0xe09   : > { %v5645_v42 = vpop.eup %4615 }
 0xe0a   : > { %v2709_v62 = vsel %vm1309_vm2, %v5645_v42, 0.0  ;;  %v5649_v10 = vpop.eup %4617 }
 0xe0b   : > { %2710 = vadd.xlane.f32.xlu0 %v2709_v62  ;;  %v2703_v23 = vsel %vm1309_vm2, %v5649_v10, 0.0  ;;  %v4620_v21 = vpop.eup %4619  ;;  %v2998_v62 = vsel %vm655_vm0, %v5444_v45, 0.0 }
 0xe0c   : > { %v2712_v54 = vsel %vm1309_vm2, %v4620_v21, 0.0  ;;  %v4622_v27 = vpop.eup %4621 }
 0xe0f   : > { %2704 = vadd.xlane.f32.xlu0 %v2703_v23  ;;  %v3001_v23 = vsel %vm655_vm0, %v5447_v14, 0.0 }
 0xe18   : > { %2749 = vrot.lane.b32.xlu1 %v5503_v16, %s4736_s29  ;;  %v2706_v16 = vsel %vm1309_vm2, %v4622_v27, 0.0 }
 0xe1c   : > { %2751 = vrot.lane.b32.xlu1 %v5537_v53, %s4736_s29 }
 0xe25   : > { %2747 = vrot.lane.b32.xlu0 %v5507_v18, %s4736_s29 }
 0xe40   : > { %2713 = vadd.xlane.f32.xlu1 %v2712_v54 }
 0xe44   : > { %2707 = vadd.xlane.f32.xlu1 %v2706_v16 }
 0xe55   : > { %2753 = vrot.lane.b32.xlu1 %v5532_v51, %s4736_s29 }
 0xe8c   : > { %v2699_v53 = vpop.xlane.xlu0 %2698 }
 0xe90   : > { %v2693_v18 = vpop.xlane.xlu0 %2692  ;;  %v2702_v8 = vpop.xlane.xlu1 %2701 }
 0xe91   : > { %4623 = vrcp.f32 %v2693_v18 }
 0xe94   : > { %v2696_v4 = vpop.xlane.xlu1 %2695 }
 0xe95   : > { %4625 = vrcp.f32 %v2696_v4 }
 0xe96   : > { %4627 = vrcp.f32 %v2702_v8 }
 0xe97   : > { %4629 = vrcp.f32 %v2699_v53 }
 0xe98   : > { %v2711_v39 = vpop.xlane.xlu0 %2710  ;;  %v2750_v41 = vpop.permute.xlu1 %2749 }
 0xe9b   : > { %v4624_v6 = vpop.eup %4623 }
 0xe9c   : > { %v2705_v5 = vpop.xlane.xlu0 %2704  ;;  %v2731_v63 = vmul.f32 %v4624_v6, %v4610_v9  ;;  %v2752_v51 = vpop.permute.xlu1 %2751 }
 0xe9f   : > { %v4626_v22 = vpop.eup %4625 }
 0xea0   : > { %v2748_v7 = vpop.permute.xlu0 %2747  ;;  %v2732_v34 = vmul.f32 %v4626_v22, %v4614_v60  ;;  %v4628_v55 = vpop.eup %4627 }
 0xea1   : > { %4327 = vmatprep.subr.bf16.mxu1 %v2748_v7  ;;  %v4630_v36 = vpop.eup %4629  ;;  %v2734_v33 = vmul.f32 %v4628_v55, %v5639_v44 }
 0xea2   : > { %4328 = vmatpush3.bf16.msra.mxu1 %v2748_v7  ;;  %v2739_v24 = vpack.c.bf16 %v2732_v34, %v2731_v63  ;;  %v2733_v61 = vmul.f32 %v4630_v36, %v5635_v28  ;;  %v4467_v28 = vld [vmem:[%s6088_s8] sm:$0xff]  }
 0xea3   : > { %4329 = vmatprep.subr.bf16.mxu1 %v2750_v41 }
 0xea4   : > { %4335 = vmatprep.mubr.msk.bf16.mxu1 %vm1309_vm2, %v2739_v24  ;;  %v2740_v40 = vpack.c.bf16 %v2734_v33, %v2733_v61 }
 0xea6   : > { %4330 = vmatpush3.bf16.msra.mxu1 %v2750_v41 }
 0xea7   : > { %4331 = vmatprep.subr.bf16.mxu1 %v2752_v51 }
 0xeaa   : > { %4332 = vmatpush3.bf16.msra.mxu1 %v2752_v51 }
 0xecd   : > { %v2714_v19 = vpop.xlane.xlu1 %2713 }
 0xece   : > { %4631 = vrcp.f32 %v2714_v19 }
 0xecf   : > { %4633 = vrcp.f32 %v2705_v5 }
 0xed0   : > { %4635 = vrcp.f32 %v2711_v39 }
 0xed1   : > { %v2708_v0 = vpop.xlane.xlu1 %2707 }
 0xed2   : > { %4637 = vrcp.f32 %v2708_v0 }
 0xed5   : > { %v2754_v1 = vpop.permute.xlu1 %2753 }
 0xed6   : > { %4333 = vmatprep.subr.bf16.mxu1 %v2754_v1 }
 0xed7   : > { %4334 = vmatpush3.bf16.msra.mxu1 %v2754_v1 }
 0xed8   : > { %v4632_v20 = vpop.eup %4631  ;;  %4343 = vmatprep.subr.bf16.mxu1 %v4467_v28 }
 0xed9   : > { %v4634_v25 = vpop.eup %4633  ;;  %v2738_v48 = vmul.f32 %v4632_v20, %v4620_v21 }
 0xeda   : > { %4336 = vmatmul.mubr.msk.bf16.vlgmr.msra.gmra.mrb[56].mxu1 %vm1309_vm2, %v2740_v40  ;;  %v4636_v46 = vpop.eup %4635  ;;  %v2735_v50 = vmul.f32 %v4634_v25, %v5649_v10  ;;  %v3004_v10 = vsel %vm655_vm0, %v5450_v11, 0.0  ;;  %v4720_v25 = vld [vmem:[%s4861_s3] sm:$0xff] }
 0xedb   : > { %v2737_v52 = vmul.f32 %v4636_v46, %v5645_v42  ;;  %4344 = vmatpush3.bf16.msra.mxu1 %v4467_v28 }
 0xedc   : > { %v4638_v56 = vpop.eup %4637  ;;  %4345 = vmatprep.subr.bf16.mxu1 %v4468_v29 }
 0xedd   : > { %v2736_v26 = vmul.f32 %v4638_v56, %v4622_v27  ;;  %v2742_v31 = vpack.c.bf16 %v2738_v48, %v2737_v52  ;;  %v4722_v52 = vld [vmem:[%s4861_s3 + $0x8] sm:$0xff] }
 0xedf   : > { %v2741_v30 = vpack.c.bf16 %v2736_v26, %v2735_v50  ;;  %4346 = vmatpush3.bf16.msra.mxu1 %v4468_v29  ;;  %v4721_v50 = vld [vmem:[%s4861_s3 + $0x10] sm:$0xff] }
 0xee1   : > { %4339 = vmatprep.mubr.msk.bf16.mxu1 %vm1309_vm2, %v2741_v30 }
 0xee2   : > { %4340 = vmatmul.mubr.msk.bf16.gmra.mrb[60].mxu1 %vm1309_vm2, %v2742_v31 }
 0xfad   : > { %v4337_v32 = vpop.f32.mrb[56].mxu1 }
 0xfae   : > { %v2805_v9 = vpop.f32.mrb[57].mxu1 }
 0xfaf   : > { %2844 = vrot.lane.b32.xlu0 %v2805_v9, %s4737_s27  ;;  %v4338_v44 = vpop.f32.mrb[58].mxu1 }
 0xfb0   : > { %v2808_v37 = vpop.f32.mrb[59].mxu1 }
 0xfb1   : > { %2846 = vrot.lane.b32.xlu1 %v2808_v37, %s4737_s27 }
 0xfb3   : > { %2848 = vrot.lane.b32.xlu0 %v4337_v32, %s4737_s27  ;;  %v4723_v32 = vld [vmem:[%s4861_s3 + $0x18] sm:$0xff] }
 0xfb5   : > { %2850 = vrot.lane.b32.xlu1 %v4338_v44, %s4737_s27  ;;  %v4341_v47 = vpop.f32.mrb[60].mxu1 }
 0xfb6   : > { %v2821_v60 = vpop.f32.mrb[61].mxu1 }
 0xfb7   : > { %2852 = vrot.lane.b32.xlu0 %v2821_v60, %s4737_s27  ;;  %v4342_v12 = vpop.f32.mrb[62].mxu1 }
 0xfb8   : > { %v2824_v42 = vpop.f32.mrb[63].mxu1 }
 0xfb9   : > { %2854 = vrot.lane.b32.xlu1 %v2824_v42, %s4737_s27 }
 0xfbb   : > { %2856 = vrot.lane.b32.xlu0 %v4341_v47, %s4737_s27 }
 0xfbd   : > { %2858 = vrot.lane.b32.xlu1 %v4342_v12, %s4737_s27 }
 0xfda   : > { %2999 = vadd.xlane.f32.xlu0 %v2998_v62 }
 0xfde   : > { %3005 = vadd.xlane.f32.xlu0 %v3004_v10 }
 0xfe1   : > { %3002 = vadd.xlane.f32.xlu1 %v3001_v23 }
 0xfe2   : > { %3008 = vadd.xlane.f32.xlu0 %v3007_v58 }
 0xfe5   : > { %3014 = vadd.xlane.f32.xlu1 %v3013_v13  ;;  %v4724_v13 = vld [vmem:[%s4861_s3 + $0x20] sm:$0xff] }
 0xfe6   : > { %3011 = vadd.xlane.f32.xlu0 %v3010_v2 }
 0xfe9   : > { %3020 = vadd.xlane.f32.xlu1 %v3019_v3 }
 0xfea   : > { %3017 = vadd.xlane.f32.xlu0 %v3016_v15 }
0x1021   : > { %v2845_v35 = vpop.permute.xlu0 %2844 }
0x1022   : > { %2868 = vst.msk [vmem:[#allocation2] sm:$0xff] %vm1833_vm3, %v2845_v35 }
0x1023   : > { %v2847_v21 = vpop.permute.xlu1 %2846 }
0x1024   : > { %2869 = vst.msk [vmem:[#allocation2 + $0x8] sm:$0xff] %vm1833_vm3, %v2847_v21 }
0x1025   : > { %v2849_v54 = vpop.permute.xlu0 %2848 }
0x1026   : > { %2870 = vst.msk [vmem:[#allocation2 + $0x10] sm:$0xff] %vm1833_vm3, %v2849_v54 }
0x1027   : > { %v2851_v27 = vpop.permute.xlu1 %2850 }
0x1028   : > { %2871 = vst.msk [vmem:[#allocation2 + $0x18] sm:$0xff] %vm1833_vm3, %v2851_v27 }
0x1029   : > { %v2853_v16 = vpop.permute.xlu0 %2852  ;;  %v2876_v18 = vld [vmem:[#allocation2] sm:$0xff] }
0x102a   : > { %2872 = vst.msk [vmem:[#allocation2 + $0x20] sm:$0xff] %vm1833_vm3, %v2853_v16  ;;  %v4725_v16 = vld [vmem:[%s4861_s3 + $0x30] sm:$0xff] }
0x102b   : > { %v2855_v53 = vpop.permute.xlu1 %2854  ;;  %v2877_v8 = vld [vmem:[#allocation2 + $0x8] sm:$0xff] }
0x102c   : > { %2873 = vst.msk [vmem:[#allocation2 + $0x28] sm:$0xff] %vm1833_vm3, %v2855_v53  ;;  %v2884_v4 = vpack.c.bf16 %v2877_v8, %v2876_v18  ;;  %v4726_v18 = vld [vmem:[%s4861_s3 + $0x28] sm:$0xff] }
0x102d   : > { %v2857_v39 = vpop.permute.xlu0 %2856  ;;  %v2878_v6 = vld [vmem:[#allocation2 + $0x10] sm:$0xff] }
0x102e   : > { %2874 = vst.msk [vmem:[#allocation2 + $0x30] sm:$0xff] %vm1833_vm3, %v2857_v39  ;;  %4347 = vmatprep.mubr.msk.bf16.mxu1 %vm655_vm0, %v2884_v4 }
0x102f   : > { %v2859_v5 = vpop.permute.xlu1 %2858  ;;  %v2879_v22 = vld [vmem:[#allocation2 + $0x18] sm:$0xff] }
0x1030   : > { %2875 = vst.msk [vmem:[#allocation2 + $0x38] sm:$0xff] %vm1833_vm3, %v2859_v5  ;;  %v2885_v41 = vpack.c.bf16 %v2879_v22, %v2878_v6  ;;  %v4727_v6 = vld [vmem:[%s4861_s3 + $0x38] sm:$0xff] }
0x1031   : > { %v2880_v7 = vld [vmem:[#allocation2 + $0x20] sm:$0xff] }
0x1032   : > { %4348 = vmatmul.mubr.msk.bf16.vlgmr.msra.gmra.mrb[64].mxu1 %vm655_vm0, %v2885_v41 }
0x1033   : > { %v2881_v63 = vld [vmem:[#allocation2 + $0x28] sm:$0xff] }
0x1034   : > { %v2886_v34 = vpack.c.bf16 %v2881_v63, %v2880_v7 }
0x1035   : > { %v2882_v24 = vld [vmem:[#allocation2 + $0x30] sm:$0xff] }
0x1036   : > { %4351 = vmatprep.mubr.msk.bf16.mxu1 %vm655_vm0, %v2886_v34 }
0x1037   : > { %v2883_v51 = vld [vmem:[#allocation2 + $0x38] sm:$0xff] }
0x1038   : > { %v2887_v19 = vpack.c.bf16 %v2883_v51, %v2882_v24 }
0x103a   : > { %4352 = vmatmul.mubr.msk.bf16.gmra.mrb[68].mxu1 %vm655_vm0, %v2887_v19 }
0x1067   : > { %v3000_v55 = vpop.xlane.xlu0 %2999 }
0x1068   : > { %v3022_v47 = vmul.f32 0.03125, %v3000_v55 }
0x106a   : > { %v5745_v21 = vsub.f32 %v5444_v45, %v3022_v47 }
0x106b   : > { %v3006_v36 = vpop.xlane.xlu0 %3005 }
0x106c   : > { %v3024_v27 = vmul.f32 0.03125, %v3006_v36  ;;  %v3038_v24 = vmul.f32 %v5745_v21, %v5745_v21 }
0x106e   : > { %v3003_v29 = vpop.xlane.xlu1 %3002  ;;  %v5764_v7 = vsub.f32 %v5450_v11, %v3024_v27 }
0x106f   : > { %v3009_v28 = vpop.xlane.xlu0 %3008  ;;  %v3023_v23 = vmul.f32 0.03125, %v3003_v29 }
0x1070   : > { %v3025_v5 = vmul.f32 0.03125, %v3009_v28 }
0x1072   : > { %v3015_v39 = vpop.xlane.xlu1 %3014  ;;  %v5771_v19 = vsub.f32 %v5441_v38, %v3025_v5 }
0x1073   : > { %v3012_v54 = vpop.xlane.xlu0 %3011  ;;  %v3027_v55 = vmul.f32 0.03125, %v3015_v39 }
0x1074   : > { %v3026_v63 = vmul.f32 0.03125, %v3012_v54 }
0x1077   : > { %v3018_v51 = vpop.xlane.xlu0 %3017 }
0x1105   : > { %v4349_v0 = vpop.f32.mrb[64].mxu1 }
0x1106   : > { %v2957_v33 = vpop.f32.mrb[65].mxu1  ;;  %v2966_v1 = vadd.f32 %v4349_v0, %v5434_v17 }
0x1107   : > { %v2958_v61 = vadd.f32 %v5434_v17, %v2957_v33  ;;  %v4350_v40 = vpop.f32.mrb[66].mxu1  ;;  %v3021_v33 = vpop.xlane.xlu1 %3020 }
0x1108   : > { %v2960_v20 = vpop.f32.mrb[67].mxu1  ;;  %v2969_v56 = vadd.f32 %v4350_v40, %v5434_v17  ;;  %v5721_v26 = vadd.f32 %v4721_v50, %v2966_v1  ;;  %v5778_v1 = vsub.f32 %v5468_v49, %v3026_v63  ;;  %v3046_v40 = vsel %vm655_vm0, %v3038_v24, 0.0 }
0x1109   : > { %v5716_v46 = vadd.f32 %v4720_v25, %v2958_v61  ;;  %v2961_v48 = vadd.f32 %v5434_v17, %v2960_v20  ;;  %v3028_v61 = vmul.f32 0.03125, %v3018_v51  ;;  %v3040_v20 = vmul.f32 %v5764_v7, %v5764_v7 }
0x110a   : > { %v5729_v9 = vadd.f32 %v4723_v32, %v2969_v56  ;;  %v3428_v10 = vsel %vm655_vm0, %v5721_v26, 0.0  ;;  %v5784_v25 = vsub.f32 %v5471_v59, %v3027_v55  ;;  %v3029_v56 = vmul.f32 0.03125, %v3021_v33 }
0x110b   : > { %v5724_v30 = vadd.f32 %v4722_v52, %v2961_v48  ;;  %v3422_v31 = vsel %vm655_vm0, %v5716_v46, 0.0  ;;  %v3041_v50 = vmul.f32 %v5771_v19, %v5771_v19  ;;  %v5790_v52 = vsub.f32 %v5474_v43, %v3028_v61 }
0x110c   : > { %3423 = vadd.xlane.f32.xlu0 %v3422_v31  ;;  %v3431_v35 = vsel %vm655_vm0, %v5729_v9, 0.0  ;;  %v3052_v31 = vsel %vm655_vm0, %v3040_v20, 0.0  ;;  %v3042_v28 = vmul.f32 %v5778_v1, %v5778_v1  ;;  %v5796_v29 = vsub.f32 %v5465_v57, %v3029_v56 }
0x110d   : > { %v4353_v44 = vpop.f32.mrb[68].mxu1  ;;  %v3425_v37 = vsel %vm655_vm0, %v5724_v30, 0.0  ;;  %v3055_v32 = vsel %vm655_vm0, %v3041_v50, 0.0  ;;  %v3044_v47 = vmul.f32 %v5790_v52, %v5790_v52 }
0x110e   : > { %v2973_v60 = vpop.f32.mrb[69].mxu1  ;;  %3426 = vadd.xlane.f32.xlu1 %v3425_v37  ;;  %v2982_v12 = vadd.f32 %v4353_v44, %v5434_v17  ;;  %v3043_v44 = vmul.f32 %v5784_v25, %v5784_v25  ;;  %v3058_v37 = vsel %vm655_vm0, %v3042_v28, 0.0 }
0x110f   : > { %v2974_v42 = vadd.f32 %v5434_v17, %v2973_v60  ;;  %v4354_v62 = vpop.f32.mrb[70].mxu1 }
0x1110   : > { %v2976_v58 = vpop.f32.mrb[71].mxu1  ;;  %3429 = vadd.xlane.f32.xlu0 %v3428_v10  ;;  %v2985_v3 = vadd.f32 %v4354_v62, %v5434_v17  ;;  %v5748_v53 = vadd.f32 %v4725_v16, %v2982_v12  ;;  %v3061_v60 = vsel %vm655_vm0, %v3043_v44, 0.0  ;;  %v3045_v12 = vmul.f32 %v5796_v29, %v5796_v29  ;;  %v5812_v10 = vld [vmem:[%s6090_s10] sm:$0xff]  }
0x1111   : > { %v5738_v2 = vadd.f32 %v4724_v13, %v2974_v42  ;;  %v2977_v15 = vadd.f32 %v5434_v17, %v2976_v58  ;;  %v5756_v17 = vsub.f32 %v5447_v14, %v3023_v23  ;;  %v3064_v42 = vsel %vm655_vm0, %v3044_v47, 0.0  ;;  %4355 = vmatprep.subr.bf16.mxu0 %v5812_v10  ;;  %v5819_v23 = vld [vmem:[%s6090_s10 + $0x8] sm:$0xff]  }
0x1112   : > { %3432 = vadd.xlane.f32.xlu1 %v3431_v35  ;;  %v5759_v22 = vadd.f32 %v4727_v6, %v2985_v3  ;;  %v3440_v34 = vsel %vm655_vm0, %v5748_v53, 0.0  ;;  %v3067_v62 = vsel %vm655_vm0, %v3045_v12, 0.0  ;;  %4356 = vmatpush3.bf16.msra.mxu0 %v5812_v10 }
0x1113   : > { %v5751_v8 = vadd.f32 %v4726_v18, %v2977_v15  ;;  %v3434_v4 = vsel %vm655_vm0, %v5738_v2, 0.0  ;;  %v3039_v36 = vmul.f32 %v5756_v17, %v5756_v17  ;;  %4357 = vmatprep.subr.bf16.mxu0 %v5819_v23 }
0x1114   : > { %3435 = vadd.xlane.f32.xlu0 %v3434_v4  ;;  %v3443_v0 = vsel %vm655_vm0, %v5759_v22, 0.0 }
0x1115   : > { %v3437_v41 = vsel %vm655_vm0, %v5751_v8, 0.0  ;;  %v3049_v48 = vsel %vm655_vm0, %v3039_v36, 0.0 }
0x1116   : > { %3438 = vadd.xlane.f32.xlu1 %v3437_v41  ;;  %4358 = vmatpush3.bf16.msra.mxu0 %v5819_v23 }
0x1117   : > { %4391 = vmatprep.subr.bf16.mxu0 %v5812_v10 }
0x1118   : > { %3441 = vadd.xlane.f32.xlu0 %v3440_v34 }
0x111a   : > { %3444 = vadd.xlane.f32.xlu1 %v3443_v0 }
0x111c   : > { %3047 = vadd.xlane.f32.xlu0 %v3046_v40 }
0x111e   : > { %3050 = vadd.xlane.f32.xlu1 %v3049_v48 }
0x1120   : > { %3053 = vadd.xlane.f32.xlu0 %v3052_v31 }
0x1122   : > { %3056 = vadd.xlane.f32.xlu1 %v3055_v32 }
0x1124   : > { %3059 = vadd.xlane.f32.xlu0 %v3058_v37 }
0x1126   : > { %3062 = vadd.xlane.f32.xlu1 %v3061_v60 }
0x1128   : > { %3065 = vadd.xlane.f32.xlu0 %v3064_v42 }
0x112a   : > { %3068 = vadd.xlane.f32.xlu1 %v3067_v62 }
0x1199   : > { %v3424_v58 = vpop.xlane.xlu0 %3423 }
0x119a   : > { %v3446_v13 = vmul.f32 0.03125, %v3424_v58 }
0x119b   : > { %v3427_v3 = vpop.xlane.xlu1 %3426 }
0x119c   : > { %v5825_v15 = vsub.f32 %v5716_v46, %v3446_v13  ;;  %v3447_v35 = vmul.f32 0.03125, %v3427_v3 }
0x119d   : > { %v3430_v54 = vpop.xlane.xlu0 %3429 }
0x119e   : > { %v5828_v27 = vsub.f32 %v5724_v30, %v3447_v35  ;;  %v3448_v16 = vmul.f32 0.03125, %v3430_v54  ;;  %v3462_v18 = vmul.f32 %v5825_v15, %v5825_v15 }
0x119f   : > { %v3433_v4 = vpop.xlane.xlu1 %3432 }
0x11a0   : > { %v5833_v39 = vsub.f32 %v5721_v26, %v3448_v16  ;;  %v3449_v5 = vmul.f32 0.03125, %v3433_v4  ;;  %v3470_v6 = vsel %vm655_vm0, %v3462_v18, 0.0  ;;  %v3463_v41 = vmul.f32 %v5828_v27, %v5828_v27 }
0x11a1   : > { %3471 = vadd.xlane.f32.xlu0 %v3470_v6  ;;  %v3436_v63 = vpop.xlane.xlu0 %3435 }
0x11a2   : > { %v5839_v34 = vsub.f32 %v5729_v9, %v3449_v5  ;;  %v3450_v24 = vmul.f32 0.03125, %v3436_v63  ;;  %v3473_v51 = vsel %vm655_vm0, %v3463_v41, 0.0  ;;  %v3464_v55 = vmul.f32 %v5833_v39, %v5833_v39 }
0x11a3   : > { %3474 = vadd.xlane.f32.xlu1 %v3473_v51  ;;  %v3439_v0 = vpop.xlane.xlu1 %3438 }
0x11a4   : > { %v5845_v36 = vsub.f32 %v5738_v2, %v3450_v24  ;;  %v3451_v33 = vmul.f32 0.03125, %v3439_v0  ;;  %v3476_v61 = vsel %vm655_vm0, %v3464_v55, 0.0  ;;  %v3465_v40 = vmul.f32 %v5839_v34, %v5839_v34 }
0x11a5   : > { %3477 = vadd.xlane.f32.xlu0 %v3476_v61  ;;  %v3442_v20 = vpop.xlane.xlu0 %3441 }
0x11a6   : > { %v5851_v56 = vsub.f32 %v5751_v8, %v3451_v33  ;;  %v3452_v48 = vmul.f32 0.03125, %v3442_v20  ;;  %v3479_v50 = vsel %vm655_vm0, %v3465_v40, 0.0  ;;  %v3466_v31 = vmul.f32 %v5845_v36, %v5845_v36 }
0x11a7   : > { %3480 = vadd.xlane.f32.xlu1 %v3479_v50  ;;  %v3445_v28 = vpop.xlane.xlu1 %3444 }
0x11a8   : > { %v5857_v32 = vsub.f32 %v5748_v53, %v3452_v48  ;;  %v3453_v44 = vmul.f32 0.03125, %v3445_v28  ;;  %v3482_v37 = vsel %vm655_vm0, %v3466_v31, 0.0  ;;  %v3467_v47 = vmul.f32 %v5851_v56, %v5851_v56 }
0x11a9   : > { %3483 = vadd.xlane.f32.xlu0 %v3482_v37  ;;  %v3048_v60 = vpop.xlane.xlu0 %3047 }
0x11aa   : > { %v5863_v12 = vsub.f32 %v5759_v22, %v3453_v44  ;;  %v3070_v42 = vmul.f32 0.03125, %v3048_v60  ;;  %v3485_v62 = vsel %vm655_vm0, %v3467_v47, 0.0  ;;  %v3468_v58 = vmul.f32 %v5857_v32, %v5857_v32  ;;  %v5875_v44 = vld [vmem:[%s6096_s16] ss:$0 sm:$0xff] }
0x11ab   : > { %3486 = vadd.xlane.f32.xlu1 %v3485_v62  ;;  %v3051_v13 = vpop.xlane.xlu1 %3050 }
0x11ac   : > { %v3078_v3 = vadd.f32 1e-05, %v3070_v42  ;;  %v3071_v35 = vmul.f32 0.03125, %v3051_v13  ;;  %v3488_v54 = vsel %vm655_vm0, %v3468_v58, 0.0  ;;  %v3469_v16 = vmul.f32 %v5863_v12, %v5863_v12 }
0x11ad   : > { %3489 = vadd.xlane.f32.xlu0 %v3488_v54  ;;  %v3054_v18 = vpop.xlane.xlu0 %3053 }
0x11ae   : > { %4639 = vrsqrt.f32 %v3078_v3  ;;  %v3079_v4 = vadd.f32 1e-05, %v3071_v35  ;;  %v3072_v5 = vmul.f32 0.03125, %v3054_v18  ;;  %v3491_v6 = vsel %vm655_vm0, %v3469_v16, 0.0  ;;  %v5883_v35 = vld [vmem:[%s6097_s17] ss:$0 sm:$0xff] }
0x11af   : > { %3492 = vadd.xlane.f32.xlu1 %v3491_v6  ;;  %v3057_v41 = vpop.xlane.xlu1 %3056 }
0x11b0   : > { %4641 = vrsqrt.f32 %v3079_v4  ;;  %v3080_v63 = vadd.f32 1e-05, %v3072_v5  ;;  %v3073_v24 = vmul.f32 0.03125, %v3057_v41 }
0x11b1   : > { %v3060_v51 = vpop.xlane.xlu0 %3059 }
0x11b2   : > { %4643 = vrsqrt.f32 %v3080_v63  ;;  %v3081_v55 = vadd.f32 1e-05, %v3073_v24  ;;  %v3074_v0 = vmul.f32 0.03125, %v3060_v51 }
0x11b3   : > { %v3063_v33 = vpop.xlane.xlu1 %3062 }
0x11b4   : > { %4645 = vrsqrt.f32 %v3081_v55  ;;  %v3082_v61 = vadd.f32 1e-05, %v3074_v0  ;;  %v3075_v40 = vmul.f32 0.03125, %v3063_v33 }
0x11b5   : > { %v3066_v20 = vpop.xlane.xlu0 %3065 }
0x11b6   : > { %4647 = vrsqrt.f32 %v3082_v61  ;;  %v3083_v48 = vadd.f32 1e-05, %v3075_v40  ;;  %v3076_v50 = vmul.f32 0.03125, %v3066_v20 }
0x11b7   : > { %v3069_v31 = vpop.xlane.xlu1 %3068 }
0x11b8   : > { %v4640_v28 = vpop.eup %4639  ;;  %4649 = vrsqrt.f32 %v3083_v48  ;;  %v3084_v37 = vadd.f32 1e-05, %v3076_v50  ;;  %v3077_v47 = vmul.f32 0.03125, %v3069_v31 }
0x11b9   : > { %v3094_v60 = vmul.f32 %v4640_v28, %v5745_v21 }
0x11ba   : > { %v4642_v42 = vpop.eup %4641  ;;  %4651 = vrsqrt.f32 %v3084_v37  ;;  %v3085_v62 = vadd.f32 1e-05, %v3077_v47 }
0x11bb   : > { %v3095_v58 = vmul.f32 %v4642_v42, %v5756_v17  ;;  %v3108_v13 = vmul.f32 %v5875_v44, %v3094_v60  ;;  %v5921_v60 = vld [vmem:[%s6092_s12 + $0x8] sm:$0xff]   ;;  %v5938_v42 = vld [vmem:[%s6092_s12 + $0x18] sm:$0xff]  }
0x11bc   : > { %v4644_v3 = vpop.eup %4643  ;;  %4653 = vrsqrt.f32 %v3085_v62  ;;  %v5945_v62 = vld [vmem:[%s6092_s12 + $0x20] sm:$0xff]  }
0x11bd   : > { %v3096_v54 = vmul.f32 %v4644_v3, %v5764_v7  ;;  %v3109_v16 = vmul.f32 %v5875_v44, %v3095_v58  ;;  %v3122_v17 = vadd.f32 %v5883_v35, %v3108_v13  ;;  %v5952_v58 = vld [vmem:[%s6092_s12 + $0x28] sm:$0xff]   ;;  %v5959_v13 = vld [vmem:[%s6092_s12 + $0x30] sm:$0xff]  }
0x11be   : > { %v4646_v18 = vpop.eup %4645 }
0x11bf   : > { %v3110_v21 = vmul.f32 %v5875_v44, %v3096_v54  ;;  %v3097_v4 = vmul.f32 %v4646_v18, %v5771_v19  ;;  %v3123_v5 = vadd.f32 %v5883_v35, %v3109_v16  ;;  %v5966_v18 = vld [vmem:[%s6092_s12 + $0x38] sm:$0xff]  }
0x11c0   : > { %v4648_v6 = vpop.eup %4647 }
0x11c1   : > { %v3111_v41 = vmul.f32 %v5875_v44, %v3097_v4  ;;  %v3098_v63 = vmul.f32 %v4648_v6, %v5778_v1  ;;  %v3130_v24 = vpack.c.bf16 %v3123_v5, %v3122_v17  ;;  %v3124_v7 = vadd.f32 %v5883_v35, %v3110_v21 }
0x11c2   : > { %v4650_v51 = vpop.eup %4649 }
0x11c3   : > { %v3125_v55 = vadd.f32 %v5883_v35, %v3111_v41  ;;  %v3099_v0 = vmul.f32 %v4650_v51, %v5784_v25  ;;  %4359 = vmatprep.mubr.msk.bf16.mxu0 %vm655_vm0, %v3130_v24  ;;  %v3112_v19 = vmul.f32 %v5875_v44, %v3098_v63 }
0x11c4   : > { %v4652_v33 = vpop.eup %4651 }
0x11c5   : > { %v3100_v61 = vmul.f32 %v4652_v33, %v5790_v52  ;;  %v3131_v40 = vpack.c.bf16 %v3125_v55, %v3124_v7  ;;  %v3113_v20 = vmul.f32 %v5875_v44, %v3099_v0  ;;  %v3126_v50 = vadd.f32 %v5883_v35, %v3112_v19 }
0x11c6   : > { %v4654_v48 = vpop.eup %4653 }
0x11c7   : > { %v3101_v1 = vmul.f32 %v4654_v48, %v5796_v29  ;;  %4360 = vmatmul.mubr.msk.bf16.vlgmr.msra.gmra.mrb[56].mxu0 %vm655_vm0, %v3131_v40  ;;  %v3127_v31 = vadd.f32 %v5883_v35, %v3113_v20  ;;  %v3114_v25 = vmul.f32 %v5875_v44, %v3100_v61 }
0x11c8   : > { %4392 = vmatpush3.bf16.msra.mxu0 %v5812_v10  ;;  %v5916_v10 = vld [vmem:[%s6092_s12] sm:$0xff]  }
0x11c9   : > { %v3132_v28 = vpack.c.bf16 %v3127_v31, %v3126_v50  ;;  %v3115_v37 = vmul.f32 %v5875_v44, %v3101_v1  ;;  %4393 = vmatprep.subr.bf16.mxu0 %v5819_v23  ;;  %v3128_v52 = vadd.f32 %v5883_v35, %v3114_v25  ;;  %4367 = vmatprep.subr.bf16.mxu1 %v5916_v10 }
0x11ca   : > { %4368 = vmatpush3.bf16.msra.mxu1 %v5916_v10 }
0x11cb   : > { %4363 = vmatprep.mubr.msk.bf16.mxu0 %vm655_vm0, %v3132_v28  ;;  %v3129_v29 = vadd.f32 %v5883_v35, %v3115_v37  ;;  %4369 = vmatprep.subr.bf16.mxu1 %v5921_v60 }
0x11cc   : > { %4394 = vmatpush3.bf16.msra.mxu0 %v5819_v23  ;;  %v5931_v23 = vld [vmem:[%s6092_s12 + $0x10] sm:$0xff]  }
0x11cd   : > { %v3133_v47 = vpack.c.bf16 %v3129_v29, %v3128_v52  ;;  %4403 = vmatprep.subr.bf16.mxu0 %v5916_v10 }
0x11ce   : > { %4370 = vmatpush3.bf16.msra.mxu1 %v5921_v60 }
0x11cf   : > { %4364 = vmatmul.mubr.msk.bf16.gmra.mrb[60].mxu0 %vm655_vm0, %v3133_v47  ;;  %4371 = vmatprep.subr.bf16.mxu1 %v5931_v23 }
0x11d2   : > { %4372 = vmatpush3.bf16.msra.mxu1 %v5931_v23 }
0x11d3   : > { %4373 = vmatprep.subr.bf16.mxu1 %v5938_v42 }
0x11d6   : > { %4374 = vmatpush3.bf16.msra.mxu1 %v5938_v42 }
0x11d7   : > { %4375 = vmatprep.subr.bf16.mxu1 %v5945_v62 }
0x11da   : > { %4376 = vmatpush3.bf16.msra.mxu1 %v5945_v62 }
0x11db   : > { %4377 = vmatprep.subr.bf16.mxu1 %v5952_v58 }
0x11de   : > { %4378 = vmatpush3.bf16.msra.mxu1 %v5952_v58 }
0x11df   : > { %4379 = vmatprep.subr.bf16.mxu1 %v5959_v13 }
0x11e2   : > { %4380 = vmatpush3.bf16.msra.mxu1 %v5959_v13 }
0x11e3   : > { %4381 = vmatprep.subr.bf16.mxu1 %v5966_v18 }
0x11e6   : > { %4382 = vmatpush3.bf16.msra.mxu1 %v5966_v18 }
0x122e   : > { %v3472_v3 = vpop.xlane.xlu0 %3471 }
0x122f   : > { %v3494_v54 = vmul.f32 0.03125, %v3472_v3 }
0x1230   : > { %v3475_v16 = vpop.xlane.xlu1 %3474 }
0x1231   : > { %v3502_v21 = vadd.f32 1e-05, %v3494_v54  ;;  %v3495_v4 = vmul.f32 0.03125, %v3475_v16 }
0x1232   : > { %v3478_v17 = vpop.xlane.xlu0 %3477 }
0x1233   : > { %4655 = vrsqrt.f32 %v3502_v21  ;;  %v3503_v5 = vadd.f32 1e-05, %v3495_v4  ;;  %v3496_v6 = vmul.f32 0.03125, %v3478_v17 }
0x1234   : > { %v3481_v41 = vpop.xlane.xlu1 %3480 }
0x1235   : > { %4657 = vrsqrt.f32 %v3503_v5  ;;  %v3504_v63 = vadd.f32 1e-05, %v3496_v6  ;;  %v3497_v24 = vmul.f32 0.03125, %v3481_v41 }
0x1236   : > { %v3484_v51 = vpop.xlane.xlu0 %3483 }
0x1237   : > { %4659 = vrsqrt.f32 %v3504_v63  ;;  %v3505_v7 = vadd.f32 1e-05, %v3497_v24  ;;  %v3498_v55 = vmul.f32 0.03125, %v3484_v51 }
0x1238   : > { %v3487_v0 = vpop.xlane.xlu1 %3486 }
0x1239   : > { %4661 = vrsqrt.f32 %v3505_v7  ;;  %v3506_v19 = vadd.f32 1e-05, %v3498_v55  ;;  %v3499_v33 = vmul.f32 0.03125, %v3487_v0 }
0x123a   : > { %v3490_v61 = vpop.xlane.xlu0 %3489 }
0x123b   : > { %4663 = vrsqrt.f32 %v3506_v19  ;;  %v3507_v40 = vadd.f32 1e-05, %v3499_v33  ;;  %v3500_v20 = vmul.f32 0.03125, %v3490_v61 }
0x123c   : > { %v3493_v48 = vpop.xlane.xlu1 %3492 }
0x123d   : > { %v4656_v1 = vpop.eup %4655  ;;  %4665 = vrsqrt.f32 %v3507_v40  ;;  %v3508_v50 = vadd.f32 1e-05, %v3500_v20  ;;  %v3501_v31 = vmul.f32 0.03125, %v3493_v48 }
0x123e   : > { %v3518_v25 = vmul.f32 %v4656_v1, %v5825_v15 }
0x123f   : > { %v4658_v28 = vpop.eup %4657  ;;  %4667 = vrsqrt.f32 %v3508_v50  ;;  %v3509_v37 = vadd.f32 1e-05, %v3501_v31 }
0x1240   : > { %v3519_v52 = vmul.f32 %v4658_v28, %v5828_v27  ;;  %v3526_v29 = vmul.f32 %v5875_v44, %v3518_v25 }
0x1241   : > { %v4660_v47 = vpop.eup %4659  ;;  %4669 = vrsqrt.f32 %v3509_v37 }
0x1242   : > { %v3520_v3 = vmul.f32 %v4660_v47, %v5833_v39  ;;  %v3527_v54 = vmul.f32 %v5875_v44, %v3519_v52  ;;  %v3534_v15 = vadd.f32 %v5883_v35, %v3526_v29 }
0x1243   : > { %v4662_v16 = vpop.eup %4661 }
0x1244   : > { %v3528_v21 = vmul.f32 %v5875_v44, %v3520_v3  ;;  %v3521_v4 = vmul.f32 %v4662_v16, %v5839_v34  ;;  %v3535_v17 = vadd.f32 %v5883_v35, %v3527_v54 }
0x1245   : > { %v4664_v5 = vpop.eup %4663 }
0x1246   : > { %v3529_v27 = vmul.f32 %v5875_v44, %v3521_v4  ;;  %v3522_v6 = vmul.f32 %v4664_v5, %v5845_v36  ;;  %v3542_v41 = vpack.c.bf16 %v3535_v17, %v3534_v15  ;;  %v3536_v39 = vadd.f32 %v5883_v35, %v3528_v21 }
0x1247   : > { %v4666_v63 = vpop.eup %4665 }
0x1248   : > { %v3537_v24 = vadd.f32 %v5883_v35, %v3529_v27  ;;  %v3523_v51 = vmul.f32 %v4666_v63, %v5851_v56  ;;  %4395 = vmatprep.mubr.msk.bf16.mxu0 %vm655_vm0, %v3542_v41  ;;  %v3530_v34 = vmul.f32 %v5875_v44, %v3522_v6 }
0x1249   : > { %v4668_v7 = vpop.eup %4667 }
0x124a   : > { %v3524_v55 = vmul.f32 %v4668_v7, %v5857_v32  ;;  %v3543_v0 = vpack.c.bf16 %v3537_v24, %v3536_v39  ;;  %v3531_v19 = vmul.f32 %v5875_v44, %v3523_v51  ;;  %v3538_v61 = vadd.f32 %v5883_v35, %v3530_v34 }
0x124b   : > { %v4670_v33 = vpop.eup %4669 }
0x124c   : > { %v3525_v36 = vmul.f32 %v4670_v33, %v5863_v12  ;;  %4396 = vmatmul.mubr.msk.bf16.vlgmr.msra.gmra.mrb[64].mxu0 %vm655_vm0, %v3543_v0  ;;  %v3539_v40 = vadd.f32 %v5883_v35, %v3531_v19  ;;  %v3532_v56 = vmul.f32 %v5875_v44, %v3524_v55 }
0x124d   : > { %4404 = vmatpush3.bf16.msra.mxu0 %v5916_v10 }
0x124e   : > { %v3544_v20 = vpack.c.bf16 %v3539_v40, %v3538_v61  ;;  %v3533_v48 = vmul.f32 %v5875_v44, %v3525_v36  ;;  %4405 = vmatprep.subr.bf16.mxu0 %v5921_v60  ;;  %v3540_v32 = vadd.f32 %v5883_v35, %v3532_v56  ;;  %v6016_v44 = vld [vmem:[%s6091_s11] ss:$0 sm:$0xff] }
0x1250   : > { %4399 = vmatprep.mubr.msk.bf16.mxu0 %vm655_vm0, %v3544_v20  ;;  %v3541_v12 = vadd.f32 %v5883_v35, %v3533_v48 }
0x1251   : > { %4406 = vmatpush3.bf16.msra.mxu0 %v5921_v60 }
0x1252   : > { %v3545_v1 = vpack.c.bf16 %v3541_v12, %v3540_v32  ;;  %4407 = vmatprep.subr.bf16.mxu0 %v5931_v23 }
0x1254   : > { %4400 = vmatmul.mubr.msk.bf16.gmra.mrb[68].mxu0 %vm655_vm0, %v3545_v1 }
0x1255   : > { %4408 = vmatpush3.bf16.msra.mxu0 %v5931_v23 }
0x1256   : > { %4409 = vmatprep.subr.bf16.mxu0 %v5938_v42 }
0x1259   : > { %4410 = vmatpush3.bf16.msra.mxu0 %v5938_v42 }
0x125a   : > { %4411 = vmatprep.subr.bf16.mxu0 %v5945_v62 }
0x125d   : > { %4412 = vmatpush3.bf16.msra.mxu0 %v5945_v62 }
0x125e   : > { %4413 = vmatprep.subr.bf16.mxu0 %v5952_v58 }
0x1261   : > { %4414 = vmatpush3.bf16.msra.mxu0 %v5952_v58 }
0x1262   : > { %4415 = vmatprep.subr.bf16.mxu0 %v5959_v13 }
0x1265   : > { %4416 = vmatpush3.bf16.msra.mxu0 %v5959_v13 }
0x1266   : > { %4417 = vmatprep.subr.bf16.mxu0 %v5966_v18 }
0x1269   : > { %4418 = vmatpush3.bf16.msra.mxu0 %v5966_v18 }
0x129a   : > { %v4361_v35 = vpop.f32.mrb[56].mxu0 }
0x129b   : > { %v3212_v10 = vadd.f32 %v4361_v35, %v6016_v44  ;;  %v3203_v60 = vpop.f32.mrb[57].mxu0 }
0x129c   : > { %v3204_v23 = vadd.f32 %v6016_v44, %v3203_v60  ;;  %v4362_v42 = vpop.f32.mrb[58].mxu0 }
0x129d   : > { %v3244_v62 = vmul.f32 0.70710677, %v3212_v10  ;;  %v3215_v58 = vadd.f32 %v4362_v42, %v6016_v44  ;;  %v3206_v13 = vpop.f32.mrb[59].mxu0  ;;  %v3236_v24 = vmul.f32 0.5, %v3212_v10 }
0x129e   : > { %v3242_v50 = vmul.f32 0.70710677, %v3204_v23  ;;  %v3207_v31 = vadd.f32 %v6016_v44, %v3206_v13  ;;  %v3234_v7 = vmul.f32 0.5, %v3204_v23 }
0x129f   : > { %4671 = verf.f32 %v3244_v62  ;;  %v3245_v18 = vmul.f32 0.70710677, %v3215_v58  ;;  %v3237_v51 = vmul.f32 0.5, %v3215_v58 }
0x12a0   : > { %4673 = verf.f32 %v3242_v50  ;;  %v3243_v25 = vmul.f32 0.70710677, %v3207_v31  ;;  %v3235_v55 = vmul.f32 0.5, %v3207_v31 }
0x12a1   : > { %4675 = verf.f32 %v3245_v18 }
0x12a2   : > { %4677 = verf.f32 %v3243_v25  ;;  %v4365_v28 = vpop.f32.mrb[60].mxu0 }
0x12a3   : > { %v3228_v37 = vadd.f32 %v4365_v28, %v6016_v44  ;;  %v3219_v52 = vpop.f32.mrb[61].mxu0 }
0x12a4   : > { %v3220_v29 = vadd.f32 %v6016_v44, %v3219_v52  ;;  %v4366_v47 = vpop.f32.mrb[62].mxu0 }
0x12a5   : > { %v3248_v3 = vmul.f32 0.70710677, %v3228_v37  ;;  %v3231_v54 = vadd.f32 %v4366_v47, %v6016_v44  ;;  %v3222_v16 = vpop.f32.mrb[63].mxu0  ;;  %v3240_v60 = vmul.f32 0.5, %v3228_v37 }
0x12a6   : > { %v3246_v21 = vmul.f32 0.70710677, %v3220_v29  ;;  %v3223_v4 = vadd.f32 %v6016_v44, %v3222_v16  ;;  %v3238_v23 = vmul.f32 0.5, %v3220_v29 }
0x12a7   : > { %4679 = verf.f32 %v3248_v3  ;;  %v3249_v15 = vmul.f32 0.70710677, %v3231_v54  ;;  %v3241_v10 = vmul.f32 0.5, %v3231_v54 }
0x12a8   : > { %4681 = verf.f32 %v3246_v21  ;;  %v3247_v17 = vmul.f32 0.70710677, %v3223_v4  ;;  %v3239_v62 = vmul.f32 0.5, %v3223_v4 }
0x12a9   : > { %v4672_v5 = vpop.eup %4671  ;;  %4683 = verf.f32 %v3249_v15 }
0x12aa   : > { %v4674_v27 = vpop.eup %4673  ;;  %v3260_v6 = vadd.f32 1.0, %v4672_v5  ;;  %4685 = verf.f32 %v3247_v17 }
0x12ab   : > { %v4676_v41 = vpop.eup %4675  ;;  %v3258_v63 = vadd.f32 1.0, %v4674_v27 }
0x12ac   : > { %v4678_v39 = vpop.eup %4677  ;;  %v3261_v34 = vadd.f32 1.0, %v4676_v41  ;;  %v3268_v19 = vmul.f32 %v3260_v6, %v3236_v24 }
0x12ad   : > { %v3259_v0 = vadd.f32 1.0, %v4678_v39  ;;  %v3266_v36 = vmul.f32 %v3258_v63, %v3234_v7 }
0x12ae   : > { %v3269_v33 = vmul.f32 %v3261_v34, %v3237_v51 }
0x12af   : > { %v3267_v61 = vmul.f32 %v3259_v0, %v3235_v55 }
0x12b0   : > { %v3275_v40 = vpack.c.bf16 %v3269_v33, %v3268_v19 }
0x12b1   : > { %v4680_v56 = vpop.eup %4679  ;;  %v3274_v20 = vpack.c.bf16 %v3267_v61, %v3266_v36 }
0x12b2   : > { %v4682_v48 = vpop.eup %4681  ;;  %v3264_v32 = vadd.f32 1.0, %v4680_v56 }
0x12b3   : > { %v4684_v12 = vpop.eup %4683  ;;  %v3262_v1 = vadd.f32 1.0, %v4682_v48  ;;  %4383 = vmatprep.mubr.bf16.mxu1 %v3274_v20 }
0x12b4   : > { %v4686_v35 = vpop.eup %4685  ;;  %v3265_v42 = vadd.f32 1.0, %v4684_v12  ;;  %4384 = vmatmul.mubr.bf16.vlgmr.msra.gmra.mrb[72].mxu1 %v3275_v40  ;;  %v3272_v13 = vmul.f32 %v3264_v32, %v3240_v60 }
0x12b5   : > { %v3263_v58 = vadd.f32 1.0, %v4686_v35  ;;  %v3270_v31 = vmul.f32 %v3262_v1, %v3238_v23 }
0x12b6   : > { %v3273_v50 = vmul.f32 %v3265_v42, %v3241_v10 }
0x12b7   : > { %v3271_v18 = vmul.f32 %v3263_v58, %v3239_v62 }
0x12b8   : > { %v3277_v25 = vpack.c.bf16 %v3273_v50, %v3272_v13 }
0x12b9   : > { %v3276_v28 = vpack.c.bf16 %v3271_v18, %v3270_v31 }
0x12bb   : > { %4387 = vmatprep.mubr.bf16.mxu1 %v3276_v28 }
0x12bc   : > { %4388 = vmatmul.mubr.bf16.gmra.mrb[76].mxu1 %v3277_v25 }
0x131f   : > { %v4397_v52 = vpop.f32.mrb[64].mxu0 }
0x1320   : > { %v3601_v47 = vadd.f32 %v4397_v52, %v6016_v44  ;;  %v3592_v3 = vpop.f32.mrb[65].mxu0 }
0x1321   : > { %v3593_v37 = vadd.f32 %v6016_v44, %v3592_v3  ;;  %v4398_v54 = vpop.f32.mrb[66].mxu0 }
0x1322   : > { %v3633_v16 = vmul.f32 0.70710677, %v3601_v47  ;;  %v3604_v29 = vadd.f32 %v4398_v54, %v6016_v44  ;;  %v3595_v21 = vpop.f32.mrb[67].mxu0  ;;  %v3625_v48 = vmul.f32 0.5, %v3601_v47 }
0x1323   : > { %v3631_v4 = vmul.f32 0.70710677, %v3593_v37  ;;  %v3596_v15 = vadd.f32 %v6016_v44, %v3595_v21  ;;  %v3623_v1 = vmul.f32 0.5, %v3593_v37 }
0x1324   : > { %4687 = verf.f32 %v3633_v16  ;;  %v3634_v17 = vmul.f32 0.70710677, %v3604_v29  ;;  %v3626_v32 = vmul.f32 0.5, %v3604_v29 }
0x1325   : > { %4689 = verf.f32 %v3631_v4  ;;  %v3632_v5 = vmul.f32 0.70710677, %v3596_v15  ;;  %v3624_v35 = vmul.f32 0.5, %v3596_v15 }
0x1326   : > { %4691 = verf.f32 %v3634_v17 }
0x1327   : > { %4693 = verf.f32 %v3632_v5  ;;  %v4401_v27 = vpop.f32.mrb[68].mxu0 }
0x1328   : > { %v3617_v6 = vadd.f32 %v4401_v27, %v6016_v44  ;;  %v3608_v41 = vpop.f32.mrb[69].mxu0  ;;  %v3964_v27 = vld [vmem:[%s6093_s13] ss:$0 sm:$0xff] }
0x1329   : > { %v3609_v63 = vadd.f32 %v6016_v44, %v3608_v41  ;;  %v4402_v39 = vpop.f32.mrb[70].mxu0 }
0x132a   : > { %v3637_v24 = vmul.f32 0.70710677, %v3617_v6  ;;  %v3620_v51 = vadd.f32 %v4402_v39, %v6016_v44  ;;  %v3611_v34 = vpop.f32.mrb[71].mxu0  ;;  %v3629_v52 = vmul.f32 0.5, %v3617_v6 }
0x132b   : > { %v3635_v7 = vmul.f32 0.70710677, %v3609_v63  ;;  %v3612_v55 = vadd.f32 %v6016_v44, %v3611_v34  ;;  %v3627_v37 = vmul.f32 0.5, %v3609_v63 }
0x132c   : > { %4695 = verf.f32 %v3637_v24  ;;  %v3638_v0 = vmul.f32 0.70710677, %v3620_v51  ;;  %v3630_v47 = vmul.f32 0.5, %v3620_v51 }
0x132d   : > { %4697 = verf.f32 %v3635_v7  ;;  %v3636_v19 = vmul.f32 0.70710677, %v3612_v55  ;;  %v3628_v54 = vmul.f32 0.5, %v3612_v55 }
0x132e   : > { %v4688_v33 = vpop.eup %4687  ;;  %4699 = verf.f32 %v3638_v0 }
0x132f   : > { %v4690_v36 = vpop.eup %4689  ;;  %v3649_v61 = vadd.f32 1.0, %v4688_v33  ;;  %4701 = verf.f32 %v3636_v19 }
0x1330   : > { %v4692_v40 = vpop.eup %4691  ;;  %v3647_v56 = vadd.f32 1.0, %v4690_v36 }
0x1331   : > { %v4694_v20 = vpop.eup %4693  ;;  %v3650_v12 = vadd.f32 1.0, %v4692_v40  ;;  %v3657_v10 = vmul.f32 %v3649_v61, %v3625_v48 }
0x1332   : > { %v3648_v60 = vadd.f32 1.0, %v4694_v20  ;;  %v3655_v42 = vmul.f32 %v3647_v56, %v3623_v1 }
0x1333   : > { %v3658_v44 = vmul.f32 %v3650_v12, %v3626_v32 }
0x1334   : > { %v3656_v23 = vmul.f32 %v3648_v60, %v3624_v35 }
0x1335   : > { %v3664_v62 = vpack.c.bf16 %v3658_v44, %v3657_v10 }
0x1336   : > { %v4696_v58 = vpop.eup %4695  ;;  %v3663_v13 = vpack.c.bf16 %v3656_v23, %v3655_v42 }
0x1337   : > { %v4698_v50 = vpop.eup %4697  ;;  %v3653_v31 = vadd.f32 1.0, %v4696_v58 }
0x1338   : > { %v4700_v18 = vpop.eup %4699  ;;  %v3651_v25 = vadd.f32 1.0, %v4698_v50  ;;  %4419 = vmatprep.mubr.bf16.mxu0 %v3663_v13 }
0x1339   : > { %v4702_v28 = vpop.eup %4701  ;;  %v3654_v3 = vadd.f32 1.0, %v4700_v18  ;;  %4420 = vmatmul.mubr.bf16.vlgmr.msra.gmra.mrb[72].mxu0 %v3664_v62  ;;  %v3661_v29 = vmul.f32 %v3653_v31, %v3629_v52 }
0x133a   : > { %v3652_v16 = vadd.f32 1.0, %v4702_v28  ;;  %v3659_v4 = vmul.f32 %v3651_v25, %v3627_v37 }
0x133b   : > { %v3662_v21 = vmul.f32 %v3654_v3, %v3630_v47 }
0x133c   : > { %v3660_v15 = vmul.f32 %v3652_v16, %v3628_v54 }
0x133d   : > { %v3666_v17 = vpack.c.bf16 %v3662_v21, %v3661_v29 }
0x133e   : > { %v3665_v5 = vpack.c.bf16 %v3660_v15, %v3659_v4 }
0x1340   : > { %4423 = vmatprep.mubr.bf16.mxu0 %v3665_v5 }
0x1341   : > { %4424 = vmatmul.mubr.bf16.gmra.mrb[76].mxu0 %v3666_v17 }
0x1387   : > { %v4385_v6 = vpop.f32.mrb[72].mxu1 }
0x1388   : > { %v3392_v41 = vadd.f32 %v4385_v6, %v3964_v27  ;;  %v3383_v39 = vpop.f32.mrb[73].mxu1 }
0x1389   : > { %v3384_v63 = vadd.f32 %v3964_v27, %v3383_v39  ;;  %v4386_v24 = vpop.f32.mrb[74].mxu1 }
0x138a   : > { %v3416_v51 = vadd.f32 %v3392_v41, %v5450_v11  ;;  %v3395_v34 = vadd.f32 %v4386_v24, %v3964_v27  ;;  %v3386_v7 = vpop.f32.mrb[75].mxu1 }
0x138b   : > { %v3414_v55 = vadd.f32 %v3384_v63, %v5444_v45  ;;  %v3387_v0 = vadd.f32 %v3964_v27, %v3386_v7 }
0x138c   : > { %3742 = vst.msk [vmem:[%s630_s30 + $0x10] sm:$0xff] %vm655_vm0, %v3416_v51  ;;  %v3417_v19 = vadd.f32 %v3395_v34, %v5441_v38 }
0x138d   : > { %3740 = vst.msk [vmem:[%s630_s30] sm:$0xff] %vm655_vm0, %v3414_v55  ;;  %v3415_v33 = vadd.f32 %v3387_v0, %v5447_v14 }
0x138e   : > { %3743 = vst.msk [vmem:[%s630_s30 + $0x18] sm:$0xff] %vm655_vm0, %v3417_v19 }
0x138f   : > { %3741 = vst.msk [vmem:[%s630_s30 + $0x8] sm:$0xff] %vm655_vm0, %v3415_v33  ;;  %v4389_v36 = vpop.f32.mrb[76].mxu1 }
0x1390   : > { %v3408_v61 = vadd.f32 %v4389_v36, %v3964_v27  ;;  %v3399_v11 = vpop.f32.mrb[77].mxu1 }
0x1391   : > { %v3400_v40 = vadd.f32 %v3964_v27, %v3399_v11  ;;  %v4390_v56 = vpop.f32.mrb[78].mxu1 }
0x1392   : > { %v3420_v45 = vadd.f32 %v3408_v61, %v5474_v43  ;;  %v3411_v20 = vadd.f32 %v4390_v56, %v3964_v27  ;;  %v3402_v48 = vpop.f32.mrb[79].mxu1 }
0x1393   : > { %v3418_v38 = vadd.f32 %v3400_v40, %v5468_v49  ;;  %v3403_v32 = vadd.f32 %v3964_v27, %v3402_v48 }
0x1394   : > { %3746 = vst.msk [vmem:[%s630_s30 + $0x30] sm:$0xff] %vm655_vm0, %v3420_v45  ;;  %v3421_v14 = vadd.f32 %v3411_v20, %v5465_v57 }
0x1395   : > { %3744 = vst.msk [vmem:[%s630_s30 + $0x20] sm:$0xff] %vm655_vm0, %v3418_v38  ;;  %v3419_v12 = vadd.f32 %v3403_v32, %v5471_v59 }
0x1396   : > { %3747 = vst.msk [vmem:[%s630_s30 + $0x38] sm:$0xff] %vm655_vm0, %v3421_v14 }
0x1397   : > { %3745 = vst.msk [vmem:[%s630_s30 + $0x28] sm:$0xff] %vm655_vm0, %v3419_v12 }
0x140c   : > { %v4421_v1 = vpop.f32.mrb[72].mxu0 }
0x140d   : > { %v3710_v35 = vadd.f32 %v4421_v1, %v3964_v27  ;;  %v3701_v43 = vpop.f32.mrb[73].mxu0 }
0x140e   : > { %v3702_v49 = vadd.f32 %v3964_v27, %v3701_v43  ;;  %v4422_v60 = vpop.f32.mrb[74].mxu0 }
0x140f   : > { %v3734_v10 = vadd.f32 %v3710_v35, %v5721_v26  ;;  %v3713_v57 = vadd.f32 %v4422_v60, %v3964_v27  ;;  %v3704_v44 = vpop.f32.mrb[75].mxu0 }
0x1410   : > { %v3732_v42 = vadd.f32 %v3702_v49, %v5716_v46  ;;  %v3705_v59 = vadd.f32 %v3964_v27, %v3704_v44 }
0x1411   : > { %3750 = vst.msk [vmem:[%s635_s2 + $0x10] sm:$0xff] %vm655_vm0, %v3734_v10  ;;  %v3735_v23 = vadd.f32 %v3713_v57, %v5729_v9 }
0x1412   : > { %3748 = vst.msk [vmem:[%s635_s2] sm:$0xff] %vm655_vm0, %v3732_v42  ;;  %v3733_v62 = vadd.f32 %v3705_v59, %v5724_v30 }
0x1413   : > { %3751 = vst.msk [vmem:[%s635_s2 + $0x18] sm:$0xff] %vm655_vm0, %v3735_v23 }
0x1414   : > { %3749 = vst.msk [vmem:[%s635_s2 + $0x8] sm:$0xff] %vm655_vm0, %v3733_v62  ;;  %v4425_v58 = vpop.f32.mrb[76].mxu0 }
0x1415   : > { %v3726_v13 = vadd.f32 %v4425_v58, %v3964_v27  ;;  %v3717_v26 = vpop.f32.mrb[77].mxu0 }
0x1416   : > { %v3718_v50 = vadd.f32 %v3964_v27, %v3717_v26  ;;  %v4426_v31 = vpop.f32.mrb[78].mxu0 }
0x1417   : > { %v3738_v46 = vadd.f32 %v3726_v13, %v5748_v53  ;;  %v3729_v18 = vadd.f32 %v4426_v31, %v3964_v27  ;;  %v3720_v25 = vpop.f32.mrb[79].mxu0 }
0x1418   : > { %v3736_v28 = vadd.f32 %v3718_v50, %v5738_v2  ;;  %v3721_v9 = vadd.f32 %v3964_v27, %v3720_v25 }
0x1419   : > { %3754 = vst.msk [vmem:[%s635_s2 + $0x30] sm:$0xff] %vm655_vm0, %v3738_v46  ;;  %v3739_v30 = vadd.f32 %v3729_v18, %v5759_v22 }
0x141a   : > { %3752 = vst.msk [vmem:[%s635_s2 + $0x20] sm:$0xff] %vm655_vm0, %v3736_v28  ;;  %v3737_v52 = vadd.f32 %v3721_v9, %v5751_v8 }
0x141b   : > { %3755 = vst.msk [vmem:[%s635_s2 + $0x38] sm:$0xff] %vm655_vm0, %v3739_v30 }
0x141c   : > { %3753 = vst.msk [vmem:[%s635_s2 + $0x28] sm:$0xff] %vm655_vm0, %v3737_v52 }
0x141d PF: > { %s30_s0 = sadd.s32 1, %s4734_s0  }
0x141e   : > { %p27_p4 = scmp.ge.s32.totalorder %s30_s0, 4  }
0x1420   :  { %29 = sbr.rel (!%p27_p4) target bundleno = 6 (0x6), region = 137 }

</bundles_post_ra>
